<compile_context>
chip_gen: v5e
topology: v5e:2x2
jax: 0.10.0
libtpu: 0.0.40
codegen_flags: <defaults>
</compile_context>

<pallas_src>
import functools

import numpy as np
import jax
import jax.numpy as jnp
from jax import lax
from jax.experimental import pallas as pl
from jax.experimental.pallas import tpu as pltpu


# ----------------------------- Pallas kernel --------------------------------

def _fused_forward_kernel(
    p1_ref,           # [4*B*36, 18]   bf16  conv1 im2col patches (quadrant-major rows)
    w1c_ref,          # [18, 64]       bf16  conv1 weights, branches block-diag on channels
    b1c_ref,          # [1, 64]        f32
    s2_ref,           # [9*16*B, 36*B] bf16  one-hot row selection = in-kernel conv2 im2col
    w2c_ref,          # [576, 128]     bf16  conv2 weights, block-diag over branches
    b2c_ref,          # [1, 128]       f32
    t_ref,            # [4, B, 4*B]    bf16  one-hot fold of (spatial, batch) rows -> batch rows
    w1f_ref,          # [512, 400]     bf16  fc1 both branches; NCHW flatten folded into rows
    b1f_ref,          # [1, 400]       f32
    w2f_ref,          # [400, 20]      bf16  fc2 block-diag -> concatenated branch outputs
    b2f_ref,          # [1, 20]        f32
    w3_ref, b3_ref,   # [20, 300] bf16 / [1, 300] f32
    w4_ref, b4_ref,   # [300, 300] bf16 / [1, 300] f32
    w5_ref, b5_ref,   # [300, 2] bf16 / [1, 2] f32
    out_ref,          # [B, 2] f32
    *, batch):
    bf16 = jnp.bfloat16

    def mm(a, b):
        return jnp.dot(a, b, preferred_element_type=jnp.float32)

    # ---- conv1 (both branches fused on N) + 2x2 maxpool + bias + relu ----
    m1 = batch * 36                                             # pooled 6x6 positions per quadrant
    acc1 = mm(p1_ref[...], w1c_ref[...])                        # [4*m1, 64]
    pooled1 = jnp.maximum(jnp.maximum(acc1[0 * m1:1 * m1], acc1[1 * m1:2 * m1]),
                          jnp.maximum(acc1[2 * m1:3 * m1], acc1[3 * m1:4 * m1]))
    a1 = jnp.maximum(pooled1 + b1c_ref[...], 0.0).astype(bf16)  # [B*36, 64] rows (b, y, x)

    # ---- conv2: in-kernel im2col (one-hot selection matmul per tap) + pool + relu ----
    m2 = batch * 4                                              # pooled 2x2 positions per quadrant
    acc2 = None
    for k in range(9):                                          # 3x3 kernel taps, unrolled
        taps = mm(s2_ref[k * 4 * m2:(k + 1) * 4 * m2, :], a1).astype(bf16)   # [16*B, 64]
        part = mm(taps, w2c_ref[k * 64:(k + 1) * 64, :])                     # [16*B, 128]
        acc2 = part if acc2 is None else acc2 + part
    pooled2 = jnp.maximum(jnp.maximum(acc2[0 * m2:1 * m2], acc2[1 * m2:2 * m2]),
                          jnp.maximum(acc2[2 * m2:3 * m2], acc2[3 * m2:4 * m2]))
    a2 = jnp.maximum(pooled2 + b2c_ref[...], 0.0).astype(bf16)  # [4*B, 128] rows (spatial q, b)

    # ---- fc1 (+relu) and fc2 for both branches; flatten folded into weights ----
    h = None
    for q in range(4):                                          # 2x2 spatial positions, unrolled
        rows_q = mm(t_ref[q], a2).astype(bf16)                  # [B, 128] (row fold, no reshape)
        part = mm(rows_q, w1f_ref[q * 128:(q + 1) * 128, :])    # [B, 400]
        h = part if h is None else h + part
    h = jnp.maximum(h + b1f_ref[...], 0.0).astype(bf16)         # [B, 400]
    cat = (mm(h, w2f_ref[...]) + b2f_ref[...]).astype(bf16)     # [B, 20] == torch.cat((o1,o2),1)

    # ---- shared MLP head ----
    h3 = jnp.maximum(mm(cat, w3_ref[...]) + b3_ref[...], 0.0).astype(bf16)
    h4 = jnp.maximum(mm(h3, w4_ref[...]) + b4_ref[...], 0.0).astype(bf16)
    out_ref[...] = mm(h4, w5_ref[...]) + b5_ref[...]


def _full_spec(shape):
    return pl.BlockSpec(shape, lambda i: (0,) * len(shape))


def base_net_forward(x, fused):
    """x: [B, 2, 14, 14] float32 (NCHW, like the PyTorch module)."""
    batch = x.shape[0]
    p1 = _conv1_pool_patches(x).astype(jnp.bfloat16)
    args = (p1, fused['w1c'], fused['b1c'], fused['s2'], fused['w2c'], fused['b2c'],
            fused['tsel'], fused['w1f'], fused['b1f'], fused['w2f'], fused['b2f'],
            fused['w3'], fused['b3'], fused['w4'], fused['b4'],
            fused['w5'], fused['b5'])
    return pl.pallas_call(
        functools.partial(_fused_forward_kernel, batch=batch),
        grid=(1,),
        in_specs=[_full_spec(a.shape) for a in args],
        out_specs=_full_spec((batch, 2)),
        out_shape=jax.ShapeDtypeStruct((batch, 2), jnp.float32),
        compiler_params=pltpu.CompilerParams(dimension_semantics=("arbitrary",)),
    )(*args)


# ------------------------ trace-time preprocessing ---------------------------

def _conv1_pool_patches(x):
    """im2col for the 3x3 VALID conv on the 14x14 NCHW input (both channels =
    both branches).  Rows are (pool_dy, pool_dx, b, y, x) so the 2x2 maxpool is
    a max over 4 contiguous row chunks; cols are (ky, kx, cin)."""
    b = x.shape[0]
    cols = [x[:, ci, ky:ky + 12, kx:kx + 12]
            for ky in range(3) for kx in range(3) for ci in range(2)]
    p = jnp.stack(cols, axis=-1)              # [B, 12, 12, 18]
    p = p.reshape(b, 6, 2, 6, 2, 18)          # (b, y, dy, x, dx, K)
    p = p.transpose(2, 4, 0, 1, 3, 5)         # (dy, dx, b, y, x, K)
    return p.reshape(4 * b * 36, 18)


def _conv2_select(batch):
    """One-hot [9*16*B, 36*B]: row (tap k, pool_dy, pool_dx, spatial q, b) picks
    conv1's pooled activation row (b, 2i+pool_dy+ky, 2j+pool_dx+kx)."""
    s = np.zeros((9 * 16 * batch, 36 * batch), np.float32)
    for ky in range(3):
        for kx in range(3):
            k = ky * 3 + kx
            for py in range(2):
                for px in range(2):
                    for i in range(2):
                        for j in range(2):
                            for b in range(batch):
                                r = (k * 16 + (py * 2 + px) * 4 + (i * 2 + j)) * batch + b
                                src = b * 36 + (2 * i + py + ky) * 6 + (2 * j + px + kx)
                                s[r, src] = 1.0
    return s


def _fc1_row_select(batch):
    """One-hot [4, B, 4*B]: selects the batch rows of spatial position q."""
    t = np.zeros((4, batch, 4 * batch), np.float32)
    for q in range(4):
        for b in range(batch):
            t[q, b, q * batch + b] = 1.0
    return t


def prepare_fused_params(params, batch):
    """Fold the two branches into block-diagonal (lane-dense) weights, fold the
    NCHW flatten into fc1, and pre-cast all matmul operands to bf16."""
    bf16 = jnp.bfloat16
    b1, b2 = params['b1'], params['b2']

    # conv1: [ky, kx, cin=2, cout=64]; cin 0 -> branch1 (cols 0:32), cin 1 -> branch2.
    w1 = jnp.zeros((3, 3, 2, 64), jnp.float32)
    w1 = w1.at[:, :, 0, 0:32].set(jnp.transpose(b1['cw1'][:, 0], (1, 2, 0)))
    w1 = w1.at[:, :, 1, 32:64].set(jnp.transpose(b2['cw1'][:, 0], (1, 2, 0)))

    # conv2: [ky, kx, cin=64, cout=128], block-diagonal over branches.
    w2 = jnp.zeros((3, 3, 64, 128), jnp.float32)
    w2 = w2.at[:, :, 0:32, 0:64].set(jnp.transpose(b1['cw2'], (2, 3, 1, 0)))
    w2 = w2.at[:, :, 32:64, 64:128].set(jnp.transpose(b2['cw2'], (2, 3, 1, 0)))

    # fc1: rows ordered (spatial q = 2*i + j, combined channel); torch flatten
    # index is c*4 + q, so permute fw1 rows accordingly (block-diag over branches).
    w1f = jnp.zeros((4, 128, 400), jnp.float32)
    w1f = w1f.at[:, 0:64, 0:200].set(jnp.transpose(b1['fw1'].reshape(64, 4, 200), (1, 0, 2)))
    w1f = w1f.at[:, 64:128, 200:400].set(jnp.transpose(b2['fw1'].reshape(64, 4, 200), (1, 0, 2)))

    # fc2: block-diagonal -> output columns are exactly torch.cat((o1, o2), 1).
    w2f = jnp.zeros((400, 20), jnp.float32)
    w2f = w2f.at[0:200, 0:10].set(b1['fw2'])
    w2f = w2f.at[200:400, 10:20].set(b2['fw2'])

    return {
        'w1c': w1.reshape(18, 64).astype(bf16),
        'b1c': jnp.concatenate([b1['cb1'], b2['cb1']])[None, :],
        's2': jnp.asarray(_conv2_select(batch), bf16),
        'w2c': w2.reshape(576, 128).astype(bf16),
        'b2c': jnp.concatenate([b1['cb2'], b2['cb2']])[None, :],
        'tsel': jnp.asarray(_fc1_row_select(batch), bf16),
        'w1f': w1f.reshape(512, 400).astype(bf16),
        'b1f': jnp.concatenate([b1['fb1'], b2['fb1']])[None, :],
        'w2f': w2f.astype(bf16),
        'b2f': jnp.concatenate([b1['fb2'], b2['fb2']])[None, :],
        'w3': params['fw3'].astype(bf16), 'b3': params['fb3'][None, :],
        'w4': params['fw4'].astype(bf16), 'b4': params['fb4'][None, :],
        'w5': params['fw5'].astype(bf16), 'b5': params['fb5'][None, :],
    }


# -------------------------- params / reference ------------------------------

def init_params(key):
    keys = iter(jax.random.split(key, 22))

    def w(shape, fan_in):
        return jax.random.normal(next(keys), shape, jnp.float32) / np.sqrt(fan_in)

    def branch():
        return {
            'cw1': w((32, 1, 3, 3), 9),        'cb1': w((32,), 9),
            'cw2': w((64, 32, 3, 3), 32 * 9),  'cb2': w((64,), 32 * 9),
            'fw1': w((256, 200), 256),         'fb1': w((200,), 256),
            'fw2': w((200, 10), 200),          'fb2': w((10,), 200),
        }

    return {
        'b1': branch(), 'b2': branch(),
        'fw3': w((20, 300), 20),    'fb3': w((300,), 20),
        'fw4': w((300, 300), 300),  'fb4': w((300,), 300),
        'fw5': w((300, 2), 300),    'fb5': w((2,), 300),
    }


def reference_forward(x, params):
    """Pure-JAX (XLA, f32 HIGHEST) replica of the PyTorch forward."""
    hi = lax.Precision.HIGHEST

    def conv(xi, w, bias):
        y = lax.conv_general_dilated(
            xi, w, (1, 1), 'VALID',
            dimension_numbers=('NCHW', 'OIHW', 'NCHW'), precision=hi)
        return y + bias[None, :, None, None]

    def maxpool2(y):
        return lax.reduce_window(y, -jnp.inf, lax.max,
                                 (1, 1, 2, 2), (1, 1, 2, 2), 'VALID')

    def branch(xi, p):
        y = jnp.maximum(maxpool2(conv(xi, p['cw1'], p['cb1'])), 0.0)
        y = jnp.maximum(maxpool2(conv(y, p['cw2'], p['cb2'])), 0.0)
        y = y.reshape(y.shape[0], -1)
        y = jnp.maximum(jnp.dot(y, p['fw1'], precision=hi) + p['fb1'], 0.0)
        return jnp.dot(y, p['fw2'], precision=hi) + p['fb2']

    o1 = branch(x[:, 0:1], params['b1'])
    o2 = branch(x[:, 1:2], params['b2'])
    h = jnp.concatenate([o1, o2], axis=1)
    h = jnp.maximum(jnp.dot(h, params['fw3'], precision=hi) + params['fb3'], 0.0)
    h = jnp.maximum(jnp.dot(h, params['fw4'], precision=hi) + params['fb4'], 0.0)
    return jnp.dot(h, params['fw5'], precision=hi) + params['fb5']


# --------------------------------- main --------------------------------------

if __name__ == "__main__":
    key = jax.random.PRNGKey(0)
    pkey, xkey = jax.random.split(key)
    params = init_params(pkey)
    # Base_Net requires 14x14 inputs with 2 channels (64*2*2 == 256 flatten).
    x = jax.random.normal(xkey, (2, 2, 14, 14), jnp.float32)

    fused = prepare_fused_params(params, x.shape[0])   # one-time weight folding
    fwd = jax.jit(base_net_forward)
    out = jax.block_until_ready(fwd(x, fused))
    assert out.shape == (2, 2), out.shape

    ref = reference_forward(x, params)
    # atol loosened slightly vs pure-f32: matmul operands are bf16 (f32 accumulation).
    np.testing.assert_allclose(np.asarray(out), np.asarray(ref),
                               rtol=2e-2, atol=4e-2)
    print("KERNEL_OK")
</pallas_src>

<mosaic_0001>
module attributes {stable_mosaic.version = 11 : i64} {
  func.func @_fused_forward_kernel(%arg0: i32, %arg1: memref<288x18xbf16, #tpu.memory_space<vmem>>, %arg2: memref<18x64xbf16, #tpu.memory_space<vmem>>, %arg3: memref<1x64xf32, #tpu.memory_space<vmem>>, %arg4: memref<288x72xbf16, #tpu.memory_space<vmem>>, %arg5: memref<576x128xbf16, #tpu.memory_space<vmem>>, %arg6: memref<1x128xf32, #tpu.memory_space<vmem>>, %arg7: memref<4x2x8xbf16, #tpu.memory_space<vmem>>, %arg8: memref<512x400xbf16, #tpu.memory_space<vmem>>, %arg9: memref<1x400xf32, #tpu.memory_space<vmem>>, %arg10: memref<400x20xbf16, #tpu.memory_space<vmem>>, %arg11: memref<1x20xf32, #tpu.memory_space<vmem>>, %arg12: memref<20x300xbf16, #tpu.memory_space<vmem>>, %arg13: memref<1x300xf32, #tpu.memory_space<vmem>>, %arg14: memref<300x300xbf16, #tpu.memory_space<vmem>>, %arg15: memref<1x300xf32, #tpu.memory_space<vmem>>, %arg16: memref<300x2xbf16, #tpu.memory_space<vmem>>, %arg17: memref<1x2xf32, #tpu.memory_space<vmem>>, %arg18: memref<2x2xf32, #tpu.memory_space<vmem>>) attributes {dimension_semantics = [#tpu.dimension_semantics<arbitrary>], iteration_bounds = array<i64: 1>, scalar_prefetch = 0 : i64, scratch_operands = 0 : i64, tpu.core_type = #tpu.core_type<tc>, window_params = [{pipeline_mode = #tpu.pipeline_mode<synchronous>, transform_indices = @transform_0, window_bounds = array<i64: 288, 18>}, {pipeline_mode = #tpu.pipeline_mode<synchronous>, transform_indices = @transform_1, window_bounds = array<i64: 18, 64>}, {pipeline_mode = #tpu.pipeline_mode<synchronous>, transform_indices = @transform_2, window_bounds = array<i64: 1, 64>}, {pipeline_mode = #tpu.pipeline_mode<synchronous>, transform_indices = @transform_3, window_bounds = array<i64: 288, 72>}, {pipeline_mode = #tpu.pipeline_mode<synchronous>, transform_indices = @transform_4, window_bounds = array<i64: 576, 128>}, {pipeline_mode = #tpu.pipeline_mode<synchronous>, transform_indices = @transform_5, window_bounds = array<i64: 1, 128>}, {pipeline_mode = #tpu.pipeline_mode<synchronous>, transform_indices = @transform_6, window_bounds = array<i64: 4, 2, 8>}, {pipeline_mode = #tpu.pipeline_mode<synchronous>, transform_indices = @transform_7, window_bounds = array<i64: 512, 400>}, {pipeline_mode = #tpu.pipeline_mode<synchronous>, transform_indices = @transform_8, window_bounds = array<i64: 1, 400>}, {pipeline_mode = #tpu.pipeline_mode<synchronous>, transform_indices = @transform_9, window_bounds = array<i64: 400, 20>}, {pipeline_mode = #tpu.pipeline_mode<synchronous>, transform_indices = @transform_10, window_bounds = array<i64: 1, 20>}, {pipeline_mode = #tpu.pipeline_mode<synchronous>, transform_indices = @transform_11, window_bounds = array<i64: 20, 300>}, {pipeline_mode = #tpu.pipeline_mode<synchronous>, transform_indices = @transform_12, window_bounds = array<i64: 1, 300>}, {pipeline_mode = #tpu.pipeline_mode<synchronous>, transform_indices = @transform_13, window_bounds = array<i64: 300, 300>}, {pipeline_mode = #tpu.pipeline_mode<synchronous>, transform_indices = @transform_14, window_bounds = array<i64: 1, 300>}, {pipeline_mode = #tpu.pipeline_mode<synchronous>, transform_indices = @transform_15, window_bounds = array<i64: 300, 2>}, {pipeline_mode = #tpu.pipeline_mode<synchronous>, transform_indices = @transform_16, window_bounds = array<i64: 1, 2>}, {pipeline_mode = #tpu.pipeline_mode<synchronous>, transform_indices = @transform_17, window_bounds = array<i64: 2, 2>}]} {
    %c0 = arith.constant 0 : index
    %c0_0 = arith.constant 0 : index
    %0 = vector.load %arg1[%c0, %c0_0] : memref<288x18xbf16, #tpu.memory_space<vmem>>, vector<288x18xbf16>
    %c0_1 = arith.constant 0 : index
    %c0_2 = arith.constant 0 : index
    %1 = vector.load %arg2[%c0_1, %c0_2] : memref<18x64xbf16, #tpu.memory_space<vmem>>, vector<18x64xbf16>
    %cst = arith.constant dense<0.000000e+00> : vector<288x64xf32>
    %2 = tpu.matmul %0, %1, %cst {dimension_numbers = #tpu.dot_dimension_numbers<[1], [0], [0], [1], [0, 0, 1, 1], [], []>} : vector<288x18xbf16>, vector<18x64xbf16>, vector<288x64xf32> -> vector<288x64xf32>
    %3 = vector.extract_strided_slice %2 {offsets = [0, 0], sizes = [72, 64], strides = [1, 1]} : vector<288x64xf32> to vector<72x64xf32>
    %4 = vector.extract_strided_slice %2 {offsets = [72, 0], sizes = [72, 64], strides = [1, 1]} : vector<288x64xf32> to vector<72x64xf32>
    %5 = arith.maximumf %3, %4 : vector<72x64xf32>
    %6 = vector.extract_strided_slice %2 {offsets = [144, 0], sizes = [72, 64], strides = [1, 1]} : vector<288x64xf32> to vector<72x64xf32>
    %7 = vector.extract_strided_slice %2 {offsets = [216, 0], sizes = [72, 64], strides = [1, 1]} : vector<288x64xf32> to vector<72x64xf32>
    %8 = arith.maximumf %6, %7 : vector<72x64xf32>
    %9 = arith.maximumf %5, %8 : vector<72x64xf32>
    %c0_3 = arith.constant 0 : index
    %c0_4 = arith.constant 0 : index
    %10 = vector.load %arg3[%c0_3, %c0_4] : memref<1x64xf32, #tpu.memory_space<vmem>>, vector<1x64xf32>
    %11 = vector.broadcast %10 : vector<1x64xf32> to vector<72x64xf32>
    %12 = arith.addf %9, %11 : vector<72x64xf32>
    %cst_5 = arith.constant 0.000000e+00 : f32
    %13 = vector.broadcast %cst_5 : f32 to vector<72x64xf32>
    %14 = arith.maximumf %12, %13 : vector<72x64xf32>
    %15 = arith.truncf %14 : vector<72x64xf32> to vector<72x64xbf16>
    %c0_6 = arith.constant 0 : index
    %c0_7 = arith.constant 0 : index
    %16 = vector.load %arg4[%c0_6, %c0_7] : memref<288x72xbf16, #tpu.memory_space<vmem>>, vector<32x72xbf16>
    %cst_8 = arith.constant dense<0.000000e+00> : vector<32x64xf32>
    %17 = tpu.matmul %16, %15, %cst_8 {dimension_numbers = #tpu.dot_dimension_numbers<[1], [0], [0], [1], [0, 0, 1, 1], [], []>} : vector<32x72xbf16>, vector<72x64xbf16>, vector<32x64xf32> -> vector<32x64xf32>
    %18 = arith.truncf %17 : vector<32x64xf32> to vector<32x64xbf16>
    %c0_9 = arith.constant 0 : index
    %c0_10 = arith.constant 0 : index
    %19 = vector.load %arg5[%c0_9, %c0_10] : memref<576x128xbf16, #tpu.memory_space<vmem>>, vector<64x128xbf16>
    %cst_11 = arith.constant dense<0.000000e+00> : vector<32x128xf32>
    %20 = tpu.matmul %18, %19, %cst_11 {dimension_numbers = #tpu.dot_dimension_numbers<[1], [0], [0], [1], [0, 0, 1, 1], [], []>} : vector<32x64xbf16>, vector<64x128xbf16>, vector<32x128xf32> -> vector<32x128xf32>
    %c32 = arith.constant 32 : index
    %c0_12 = arith.constant 0 : index
    %21 = vector.load %arg4[%c32, %c0_12] : memref<288x72xbf16, #tpu.memory_space<vmem>>, vector<32x72xbf16>
    %cst_13 = arith.constant dense<0.000000e+00> : vector<32x64xf32>
    %22 = tpu.matmul %21, %15, %cst_13 {dimension_numbers = #tpu.dot_dimension_numbers<[1], [0], [0], [1], [0, 0, 1, 1], [], []>} : vector<32x72xbf16>, vector<72x64xbf16>, vector<32x64xf32> -> vector<32x64xf32>
    %23 = arith.truncf %22 : vector<32x64xf32> to vector<32x64xbf16>
    %c64 = arith.constant 64 : index
    %c0_14 = arith.constant 0 : index
    %24 = vector.load %arg5[%c64, %c0_14] : memref<576x128xbf16, #tpu.memory_space<vmem>>, vector<64x128xbf16>
    %cst_15 = arith.constant dense<0.000000e+00> : vector<32x128xf32>
    %25 = tpu.matmul %23, %24, %cst_15 {dimension_numbers = #tpu.dot_dimension_numbers<[1], [0], [0], [1], [0, 0, 1, 1], [], []>} : vector<32x64xbf16>, vector<64x128xbf16>, vector<32x128xf32> -> vector<32x128xf32>
    %26 = arith.addf %20, %25 : vector<32x128xf32>
    %c64_16 = arith.constant 64 : index
    %c0_17 = arith.constant 0 : index
    %27 = vector.load %arg4[%c64_16, %c0_17] : memref<288x72xbf16, #tpu.memory_space<vmem>>, vector<32x72xbf16>
    %cst_18 = arith.constant dense<0.000000e+00> : vector<32x64xf32>
    %28 = tpu.matmul %27, %15, %cst_18 {dimension_numbers = #tpu.dot_dimension_numbers<[1], [0], [0], [1], [0, 0, 1, 1], [], []>} : vector<32x72xbf16>, vector<72x64xbf16>, vector<32x64xf32> -> vector<32x64xf32>
    %29 = arith.truncf %28 : vector<32x64xf32> to vector<32x64xbf16>
    %c128 = arith.constant 128 : index
    %c0_19 = arith.constant 0 : index
    %30 = vector.load %arg5[%c128, %c0_19] : memref<576x128xbf16, #tpu.memory_space<vmem>>, vector<64x128xbf16>
    %cst_20 = arith.constant dense<0.000000e+00> : vector<32x128xf32>
    %31 = tpu.matmul %29, %30, %cst_20 {dimension_numbers = #tpu.dot_dimension_numbers<[1], [0], [0], [1], [0, 0, 1, 1], [], []>} : vector<32x64xbf16>, vector<64x128xbf16>, vector<32x128xf32> -> vector<32x128xf32>
    %32 = arith.addf %26, %31 : vector<32x128xf32>
    %c96 = arith.constant 96 : index
    %c0_21 = arith.constant 0 : index
    %33 = vector.load %arg4[%c96, %c0_21] : memref<288x72xbf16, #tpu.memory_space<vmem>>, vector<32x72xbf16>
    %cst_22 = arith.constant dense<0.000000e+00> : vector<32x64xf32>
    %34 = tpu.matmul %33, %15, %cst_22 {dimension_numbers = #tpu.dot_dimension_numbers<[1], [0], [0], [1], [0, 0, 1, 1], [], []>} : vector<32x72xbf16>, vector<72x64xbf16>, vector<32x64xf32> -> vector<32x64xf32>
    %35 = arith.truncf %34 : vector<32x64xf32> to vector<32x64xbf16>
    %c192 = arith.constant 192 : index
    %c0_23 = arith.constant 0 : index
    %36 = vector.load %arg5[%c192, %c0_23] : memref<576x128xbf16, #tpu.memory_space<vmem>>, vector<64x128xbf16>
    %cst_24 = arith.constant dense<0.000000e+00> : vector<32x128xf32>
    %37 = tpu.matmul %35, %36, %cst_24 {dimension_numbers = #tpu.dot_dimension_numbers<[1], [0], [0], [1], [0, 0, 1, 1], [], []>} : vector<32x64xbf16>, vector<64x128xbf16>, vector<32x128xf32> -> vector<32x128xf32>
    %38 = arith.addf %32, %37 : vector<32x128xf32>
    %c128_25 = arith.constant 128 : index
    %c0_26 = arith.constant 0 : index
    %39 = vector.load %arg4[%c128_25, %c0_26] : memref<288x72xbf16, #tpu.memory_space<vmem>>, vector<32x72xbf16>
    %cst_27 = arith.constant dense<0.000000e+00> : vector<32x64xf32>
    %40 = tpu.matmul %39, %15, %cst_27 {dimension_numbers = #tpu.dot_dimension_numbers<[1], [0], [0], [1], [0, 0, 1, 1], [], []>} : vector<32x72xbf16>, vector<72x64xbf16>, vector<32x64xf32> -> vector<32x64xf32>
    %41 = arith.truncf %40 : vector<32x64xf32> to vector<32x64xbf16>
    %c256 = arith.constant 256 : index
    %c0_28 = arith.constant 0 : index
    %42 = vector.load %arg5[%c256, %c0_28] : memref<576x128xbf16, #tpu.memory_space<vmem>>, vector<64x128xbf16>
    %cst_29 = arith.constant dense<0.000000e+00> : vector<32x128xf32>
    %43 = tpu.matmul %41, %42, %cst_29 {dimension_numbers = #tpu.dot_dimension_numbers<[1], [0], [0], [1], [0, 0, 1, 1], [], []>} : vector<32x64xbf16>, vector<64x128xbf16>, vector<32x128xf32> -> vector<32x128xf32>
    %44 = arith.addf %38, %43 : vector<32x128xf32>
    %c160 = arith.constant 160 : index
    %c0_30 = arith.constant 0 : index
    %45 = vector.load %arg4[%c160, %c0_30] : memref<288x72xbf16, #tpu.memory_space<vmem>>, vector<32x72xbf16>
    %cst_31 = arith.constant dense<0.000000e+00> : vector<32x64xf32>
    %46 = tpu.matmul %45, %15, %cst_31 {dimension_numbers = #tpu.dot_dimension_numbers<[1], [0], [0], [1], [0, 0, 1, 1], [], []>} : vector<32x72xbf16>, vector<72x64xbf16>, vector<32x64xf32> -> vector<32x64xf32>
    %47 = arith.truncf %46 : vector<32x64xf32> to vector<32x64xbf16>
    %c320 = arith.constant 320 : index
    %c0_32 = arith.constant 0 : index
    %48 = vector.load %arg5[%c320, %c0_32] : memref<576x128xbf16, #tpu.memory_space<vmem>>, vector<64x128xbf16>
    %cst_33 = arith.constant dense<0.000000e+00> : vector<32x128xf32>
    %49 = tpu.matmul %47, %48, %cst_33 {dimension_numbers = #tpu.dot_dimension_numbers<[1], [0], [0], [1], [0, 0, 1, 1], [], []>} : vector<32x64xbf16>, vector<64x128xbf16>, vector<32x128xf32> -> vector<32x128xf32>
    %50 = arith.addf %44, %49 : vector<32x128xf32>
    %c192_34 = arith.constant 192 : index
    %c0_35 = arith.constant 0 : index
    %51 = vector.load %arg4[%c192_34, %c0_35] : memref<288x72xbf16, #tpu.memory_space<vmem>>, vector<32x72xbf16>
    %cst_36 = arith.constant dense<0.000000e+00> : vector<32x64xf32>
    %52 = tpu.matmul %51, %15, %cst_36 {dimension_numbers = #tpu.dot_dimension_numbers<[1], [0], [0], [1], [0, 0, 1, 1], [], []>} : vector<32x72xbf16>, vector<72x64xbf16>, vector<32x64xf32> -> vector<32x64xf32>
    %53 = arith.truncf %52 : vector<32x64xf32> to vector<32x64xbf16>
    %c384 = arith.constant 384 : index
    %c0_37 = arith.constant 0 : index
    %54 = vector.load %arg5[%c384, %c0_37] : memref<576x128xbf16, #tpu.memory_space<vmem>>, vector<64x128xbf16>
    %cst_38 = arith.constant dense<0.000000e+00> : vector<32x128xf32>
    %55 = tpu.matmul %53, %54, %cst_38 {dimension_numbers = #tpu.dot_dimension_numbers<[1], [0], [0], [1], [0, 0, 1, 1], [], []>} : vector<32x64xbf16>, vector<64x128xbf16>, vector<32x128xf32> -> vector<32x128xf32>
    %56 = arith.addf %50, %55 : vector<32x128xf32>
    %c224 = arith.constant 224 : index
    %c0_39 = arith.constant 0 : index
    %57 = vector.load %arg4[%c224, %c0_39] : memref<288x72xbf16, #tpu.memory_space<vmem>>, vector<32x72xbf16>
    %cst_40 = arith.constant dense<0.000000e+00> : vector<32x64xf32>
    %58 = tpu.matmul %57, %15, %cst_40 {dimension_numbers = #tpu.dot_dimension_numbers<[1], [0], [0], [1], [0, 0, 1, 1], [], []>} : vector<32x72xbf16>, vector<72x64xbf16>, vector<32x64xf32> -> vector<32x64xf32>
    %59 = arith.truncf %58 : vector<32x64xf32> to vector<32x64xbf16>
    %c448 = arith.constant 448 : index
    %c0_41 = arith.constant 0 : index
    %60 = vector.load %arg5[%c448, %c0_41] : memref<576x128xbf16, #tpu.memory_space<vmem>>, vector<64x128xbf16>
    %cst_42 = arith.constant dense<0.000000e+00> : vector<32x128xf32>
    %61 = tpu.matmul %59, %60, %cst_42 {dimension_numbers = #tpu.dot_dimension_numbers<[1], [0], [0], [1], [0, 0, 1, 1], [], []>} : vector<32x64xbf16>, vector<64x128xbf16>, vector<32x128xf32> -> vector<32x128xf32>
    %62 = arith.addf %56, %61 : vector<32x128xf32>
    %c256_43 = arith.constant 256 : index
    %c0_44 = arith.constant 0 : index
    %63 = vector.load %arg4[%c256_43, %c0_44] : memref<288x72xbf16, #tpu.memory_space<vmem>>, vector<32x72xbf16>
    %cst_45 = arith.constant dense<0.000000e+00> : vector<32x64xf32>
    %64 = tpu.matmul %63, %15, %cst_45 {dimension_numbers = #tpu.dot_dimension_numbers<[1], [0], [0], [1], [0, 0, 1, 1], [], []>} : vector<32x72xbf16>, vector<72x64xbf16>, vector<32x64xf32> -> vector<32x64xf32>
    %65 = arith.truncf %64 : vector<32x64xf32> to vector<32x64xbf16>
    %c512 = arith.constant 512 : index
    %c0_46 = arith.constant 0 : index
    %66 = vector.load %arg5[%c512, %c0_46] : memref<576x128xbf16, #tpu.memory_space<vmem>>, vector<64x128xbf16>
    %cst_47 = arith.constant dense<0.000000e+00> : vector<32x128xf32>
    %67 = tpu.matmul %65, %66, %cst_47 {dimension_numbers = #tpu.dot_dimension_numbers<[1], [0], [0], [1], [0, 0, 1, 1], [], []>} : vector<32x64xbf16>, vector<64x128xbf16>, vector<32x128xf32> -> vector<32x128xf32>
    %68 = arith.addf %62, %67 : vector<32x128xf32>
    %69 = vector.extract_strided_slice %68 {offsets = [0, 0], sizes = [8, 128], strides = [1, 1]} : vector<32x128xf32> to vector<8x128xf32>
    %70 = vector.extract_strided_slice %68 {offsets = [8, 0], sizes = [8, 128], strides = [1, 1]} : vector<32x128xf32> to vector<8x128xf32>
    %71 = arith.maximumf %69, %70 : vector<8x128xf32>
    %72 = vector.extract_strided_slice %68 {offsets = [16, 0], sizes = [8, 128], strides = [1, 1]} : vector<32x128xf32> to vector<8x128xf32>
    %73 = vector.extract_strided_slice %68 {offsets = [24, 0], sizes = [8, 128], strides = [1, 1]} : vector<32x128xf32> to vector<8x128xf32>
    %74 = arith.maximumf %72, %73 : vector<8x128xf32>
    %75 = arith.maximumf %71, %74 : vector<8x128xf32>
    %c0_48 = arith.constant 0 : index
    %c0_49 = arith.constant 0 : index
    %76 = vector.load %arg6[%c0_48, %c0_49] : memref<1x128xf32, #tpu.memory_space<vmem>>, vector<1x128xf32>
    %77 = vector.broadcast %76 : vector<1x128xf32> to vector<8x128xf32>
    %78 = arith.addf %75, %77 : vector<8x128xf32>
    %cst_50 = arith.constant 0.000000e+00 : f32
    %79 = vector.broadcast %cst_50 : f32 to vector<8x128xf32>
    %80 = arith.maximumf %78, %79 : vector<8x128xf32>
    %81 = arith.truncf %80 : vector<8x128xf32> to vector<8x128xbf16>
    %c0_51 = arith.constant 0 : index
    %c0_52 = arith.constant 0 : index
    %c0_53 = arith.constant 0 : index
    %82 = vector.load %arg7[%c0_51, %c0_52, %c0_53] : memref<4x2x8xbf16, #tpu.memory_space<vmem>>, vector<1x2x8xbf16>
    %83 = vector.shape_cast %82 : vector<1x2x8xbf16> to vector<2x8xbf16>
    %cst_54 = arith.constant dense<0.000000e+00> : vector<2x128xf32>
    %84 = tpu.matmul %83, %81, %cst_54 {dimension_numbers = #tpu.dot_dimension_numbers<[1], [0], [0], [1], [0, 0, 1, 1], [], []>} : vector<2x8xbf16>, vector<8x128xbf16>, vector<2x128xf32> -> vector<2x128xf32>
    %85 = arith.truncf %84 : vector<2x128xf32> to vector<2x128xbf16>
    %c0_55 = arith.constant 0 : index
    %c0_56 = arith.constant 0 : index
    %86 = vector.load %arg8[%c0_55, %c0_56] : memref<512x400xbf16, #tpu.memory_space<vmem>>, vector<128x400xbf16>
    %cst_57 = arith.constant dense<0.000000e+00> : vector<2x400xf32>
    %87 = tpu.matmul %85, %86, %cst_57 {dimension_numbers = #tpu.dot_dimension_numbers<[1], [0], [0], [1], [0, 0, 1, 1], [], []>} : vector<2x128xbf16>, vector<128x400xbf16>, vector<2x400xf32> -> vector<2x400xf32>
    %c1 = arith.constant 1 : index
    %c0_58 = arith.constant 0 : index
    %c0_59 = arith.constant 0 : index
    %88 = vector.load %arg7[%c1, %c0_58, %c0_59] : memref<4x2x8xbf16, #tpu.memory_space<vmem>>, vector<1x2x8xbf16>
    %89 = vector.shape_cast %88 : vector<1x2x8xbf16> to vector<2x8xbf16>
    %cst_60 = arith.constant dense<0.000000e+00> : vector<2x128xf32>
    %90 = tpu.matmul %89, %81, %cst_60 {dimension_numbers = #tpu.dot_dimension_numbers<[1], [0], [0], [1], [0, 0, 1, 1], [], []>} : vector<2x8xbf16>, vector<8x128xbf16>, vector<2x128xf32> -> vector<2x128xf32>
    %91 = arith.truncf %90 : vector<2x128xf32> to vector<2x128xbf16>
    %c128_61 = arith.constant 128 : index
    %c0_62 = arith.constant 0 : index
    %92 = vector.load %arg8[%c128_61, %c0_62] : memref<512x400xbf16, #tpu.memory_space<vmem>>, vector<128x400xbf16>
    %cst_63 = arith.constant dense<0.000000e+00> : vector<2x400xf32>
    %93 = tpu.matmul %91, %92, %cst_63 {dimension_numbers = #tpu.dot_dimension_numbers<[1], [0], [0], [1], [0, 0, 1, 1], [], []>} : vector<2x128xbf16>, vector<128x400xbf16>, vector<2x400xf32> -> vector<2x400xf32>
    %94 = arith.addf %87, %93 : vector<2x400xf32>
    %c2 = arith.constant 2 : index
    %c0_64 = arith.constant 0 : index
    %c0_65 = arith.constant 0 : index
    %95 = vector.load %arg7[%c2, %c0_64, %c0_65] : memref<4x2x8xbf16, #tpu.memory_space<vmem>>, vector<1x2x8xbf16>
    %96 = vector.shape_cast %95 : vector<1x2x8xbf16> to vector<2x8xbf16>
    %cst_66 = arith.constant dense<0.000000e+00> : vector<2x128xf32>
    %97 = tpu.matmul %96, %81, %cst_66 {dimension_numbers = #tpu.dot_dimension_numbers<[1], [0], [0], [1], [0, 0, 1, 1], [], []>} : vector<2x8xbf16>, vector<8x128xbf16>, vector<2x128xf32> -> vector<2x128xf32>
    %98 = arith.truncf %97 : vector<2x128xf32> to vector<2x128xbf16>
    %c256_67 = arith.constant 256 : index
    %c0_68 = arith.constant 0 : index
    %99 = vector.load %arg8[%c256_67, %c0_68] : memref<512x400xbf16, #tpu.memory_space<vmem>>, vector<128x400xbf16>
    %cst_69 = arith.constant dense<0.000000e+00> : vector<2x400xf32>
    %100 = tpu.matmul %98, %99, %cst_69 {dimension_numbers = #tpu.dot_dimension_numbers<[1], [0], [0], [1], [0, 0, 1, 1], [], []>} : vector<2x128xbf16>, vector<128x400xbf16>, vector<2x400xf32> -> vector<2x400xf32>
    %101 = arith.addf %94, %100 : vector<2x400xf32>
    %c3 = arith.constant 3 : index
    %c0_70 = arith.constant 0 : index
    %c0_71 = arith.constant 0 : index
    %102 = vector.load %arg7[%c3, %c0_70, %c0_71] : memref<4x2x8xbf16, #tpu.memory_space<vmem>>, vector<1x2x8xbf16>
    %103 = vector.shape_cast %102 : vector<1x2x8xbf16> to vector<2x8xbf16>
    %cst_72 = arith.constant dense<0.000000e+00> : vector<2x128xf32>
    %104 = tpu.matmul %103, %81, %cst_72 {dimension_numbers = #tpu.dot_dimension_numbers<[1], [0], [0], [1], [0, 0, 1, 1], [], []>} : vector<2x8xbf16>, vector<8x128xbf16>, vector<2x128xf32> -> vector<2x128xf32>
    %105 = arith.truncf %104 : vector<2x128xf32> to vector<2x128xbf16>
    %c384_73 = arith.constant 384 : index
    %c0_74 = arith.constant 0 : index
    %106 = vector.load %arg8[%c384_73, %c0_74] : memref<512x400xbf16, #tpu.memory_space<vmem>>, vector<128x400xbf16>
    %cst_75 = arith.constant dense<0.000000e+00> : vector<2x400xf32>
    %107 = tpu.matmul %105, %106, %cst_75 {dimension_numbers = #tpu.dot_dimension_numbers<[1], [0], [0], [1], [0, 0, 1, 1], [], []>} : vector<2x128xbf16>, vector<128x400xbf16>, vector<2x400xf32> -> vector<2x400xf32>
    %108 = arith.addf %101, %107 : vector<2x400xf32>
    %c0_76 = arith.constant 0 : index
    %c0_77 = arith.constant 0 : index
    %109 = vector.load %arg9[%c0_76, %c0_77] : memref<1x400xf32, #tpu.memory_space<vmem>>, vector<1x400xf32>
    %110 = vector.broadcast %109 : vector<1x400xf32> to vector<2x400xf32>
    %111 = arith.addf %108, %110 : vector<2x400xf32>
    %cst_78 = arith.constant 0.000000e+00 : f32
    %112 = vector.broadcast %cst_78 : f32 to vector<2x400xf32>
    %113 = arith.maximumf %111, %112 : vector<2x400xf32>
    %114 = arith.truncf %113 : vector<2x400xf32> to vector<2x400xbf16>
    %c0_79 = arith.constant 0 : index
    %c0_80 = arith.constant 0 : index
    %115 = vector.load %arg10[%c0_79, %c0_80] : memref<400x20xbf16, #tpu.memory_space<vmem>>, vector<400x20xbf16>
    %cst_81 = arith.constant dense<0.000000e+00> : vector<2x20xf32>
    %116 = tpu.matmul %114, %115, %cst_81 {dimension_numbers = #tpu.dot_dimension_numbers<[1], [0], [0], [1], [0, 0, 1, 1], [], []>} : vector<2x400xbf16>, vector<400x20xbf16>, vector<2x20xf32> -> vector<2x20xf32>
    %c0_82 = arith.constant 0 : index
    %c0_83 = arith.constant 0 : index
    %117 = vector.load %arg11[%c0_82, %c0_83] : memref<1x20xf32, #tpu.memory_space<vmem>>, vector<1x20xf32>
    %118 = vector.broadcast %117 : vector<1x20xf32> to vector<2x20xf32>
    %119 = arith.addf %116, %118 : vector<2x20xf32>
    %120 = arith.truncf %119 : vector<2x20xf32> to vector<2x20xbf16>
    %c0_84 = arith.constant 0 : index
    %c0_85 = arith.constant 0 : index
    %121 = vector.load %arg12[%c0_84, %c0_85] : memref<20x300xbf16, #tpu.memory_space<vmem>>, vector<20x300xbf16>
    %cst_86 = arith.constant dense<0.000000e+00> : vector<2x300xf32>
    %122 = tpu.matmul %120, %121, %cst_86 {dimension_numbers = #tpu.dot_dimension_numbers<[1], [0], [0], [1], [0, 0, 1, 1], [], []>} : vector<2x20xbf16>, vector<20x300xbf16>, vector<2x300xf32> -> vector<2x300xf32>
    %c0_87 = arith.constant 0 : index
    %c0_88 = arith.constant 0 : index
    %123 = vector.load %arg13[%c0_87, %c0_88] : memref<1x300xf32, #tpu.memory_space<vmem>>, vector<1x300xf32>
    %124 = vector.broadcast %123 : vector<1x300xf32> to vector<2x300xf32>
    %125 = arith.addf %122, %124 : vector<2x300xf32>
    %cst_89 = arith.constant 0.000000e+00 : f32
    %126 = vector.broadcast %cst_89 : f32 to vector<2x300xf32>
    %127 = arith.maximumf %125, %126 : vector<2x300xf32>
    %128 = arith.truncf %127 : vector<2x300xf32> to vector<2x300xbf16>
    %c0_90 = arith.constant 0 : index
    %c0_91 = arith.constant 0 : index
    %129 = vector.load %arg14[%c0_90, %c0_91] : memref<300x300xbf16, #tpu.memory_space<vmem>>, vector<300x300xbf16>
    %cst_92 = arith.constant dense<0.000000e+00> : vector<2x300xf32>
    %130 = tpu.matmul %128, %129, %cst_92 {dimension_numbers = #tpu.dot_dimension_numbers<[1], [0], [0], [1], [0, 0, 1, 1], [], []>} : vector<2x300xbf16>, vector<300x300xbf16>, vector<2x300xf32> -> vector<2x300xf32>
    %c0_93 = arith.constant 0 : index
    %c0_94 = arith.constant 0 : index
    %131 = vector.load %arg15[%c0_93, %c0_94] : memref<1x300xf32, #tpu.memory_space<vmem>>, vector<1x300xf32>
    %132 = vector.broadcast %131 : vector<1x300xf32> to vector<2x300xf32>
    %133 = arith.addf %130, %132 : vector<2x300xf32>
    %cst_95 = arith.constant 0.000000e+00 : f32
    %134 = vector.broadcast %cst_95 : f32 to vector<2x300xf32>
    %135 = arith.maximumf %133, %134 : vector<2x300xf32>
    %136 = arith.truncf %135 : vector<2x300xf32> to vector<2x300xbf16>
    %c0_96 = arith.constant 0 : index
    %c0_97 = arith.constant 0 : index
    %137 = vector.load %arg16[%c0_96, %c0_97] : memref<300x2xbf16, #tpu.memory_space<vmem>>, vector<300x2xbf16>
    %cst_98 = arith.constant dense<0.000000e+00> : vector<2x2xf32>
    %138 = tpu.matmul %136, %137, %cst_98 {dimension_numbers = #tpu.dot_dimension_numbers<[1], [0], [0], [1], [0, 0, 1, 1], [], []>} : vector<2x300xbf16>, vector<300x2xbf16>, vector<2x2xf32> -> vector<2x2xf32>
    %c0_99 = arith.constant 0 : index
    %c0_100 = arith.constant 0 : index
    %139 = vector.load %arg17[%c0_99, %c0_100] : memref<1x2xf32, #tpu.memory_space<vmem>>, vector<1x2xf32>
    %140 = vector.broadcast %139 : vector<1x2xf32> to vector<2x2xf32>
    %141 = arith.addf %138, %140 : vector<2x2xf32>
    %c0_101 = arith.constant 0 : index
    %c0_102 = arith.constant 0 : index
    %142 = vector.load %arg18[%c0_101, %c0_102] : memref<2x2xf32, #tpu.memory_space<vmem>>, vector<2x2xf32>
    tpu.vector_store %arg18[%c0_101, %c0_102], %141 {strides = array<i32>} : memref<2x2xf32, #tpu.memory_space<vmem>>, vector<2x2xf32>,
    return
  }
  func.func @transform_0(%arg0: i32) -> (i32, i32) {
    %c0_i32 = arith.constant 0 : i32
    %c0_i32_0 = arith.constant 0 : i32
    %c0_i32_1 = arith.constant 0 : i32
    return %c0_i32, %c0_i32_0 : i32, i32
  }
  func.func @transform_1(%arg0: i32) -> (i32, i32) {
    %c0_i32 = arith.constant 0 : i32
    %c0_i32_0 = arith.constant 0 : i32
    %c0_i32_1 = arith.constant 0 : i32
    return %c0_i32, %c0_i32_0 : i32, i32
  }
  func.func @transform_2(%arg0: i32) -> (i32, i32) {
    %c0_i32 = arith.constant 0 : i32
    %c0_i32_0 = arith.constant 0 : i32
    %c0_i32_1 = arith.constant 0 : i32
    return %c0_i32, %c0_i32_0 : i32, i32
  }
  func.func @transform_3(%arg0: i32) -> (i32, i32) {
    %c0_i32 = arith.constant 0 : i32
    %c0_i32_0 = arith.constant 0 : i32
    %c0_i32_1 = arith.constant 0 : i32
    return %c0_i32, %c0_i32_0 : i32, i32
  }
  func.func @transform_4(%arg0: i32) -> (i32, i32) {
    %c0_i32 = arith.constant 0 : i32
    %c0_i32_0 = arith.constant 0 : i32
    %c0_i32_1 = arith.constant 0 : i32
    return %c0_i32, %c0_i32_0 : i32, i32
  }
  func.func @transform_5(%arg0: i32) -> (i32, i32) {
    %c0_i32 = arith.constant 0 : i32
    %c0_i32_0 = arith.constant 0 : i32
    %c0_i32_1 = arith.constant 0 : i32
    return %c0_i32, %c0_i32_0 : i32, i32
  }
  func.func @transform_6(%arg0: i32) -> (i32, i32, i32) {
    %c0_i32 = arith.constant 0 : i32
    %c0_i32_0 = arith.constant 0 : i32
    %c0_i32_1 = arith.constant 0 : i32
    %c0_i32_2 = arith.constant 0 : i32
    return %c0_i32, %c0_i32_0, %c0_i32_1 : i32, i32, i32
  }
  func.func @transform_7(%arg0: i32) -> (i32, i32) {
    %c0_i32 = arith.constant 0 : i32
    %c0_i32_0 = arith.constant 0 : i32
    %c0_i32_1 = arith.constant 0 : i32
    return %c0_i32, %c0_i32_0 : i32, i32
  }
  func.func @transform_8(%arg0: i32) -> (i32, i32) {
    %c0_i32 = arith.constant 0 : i32
    %c0_i32_0 = arith.constant 0 : i32
    %c0_i32_1 = arith.constant 0 : i32
    return %c0_i32, %c0_i32_0 : i32, i32
  }
  func.func @transform_9(%arg0: i32) -> (i32, i32) {
    %c0_i32 = arith.constant 0 : i32
    %c0_i32_0 = arith.constant 0 : i32
    %c0_i32_1 = arith.constant 0 : i32
    return %c0_i32, %c0_i32_0 : i32, i32
  }
  func.func @transform_10(%arg0: i32) -> (i32, i32) {
    %c0_i32 = arith.constant 0 : i32
    %c0_i32_0 = arith.constant 0 : i32
    %c0_i32_1 = arith.constant 0 : i32
    return %c0_i32, %c0_i32_0 : i32, i32
  }
  func.func @transform_11(%arg0: i32) -> (i32, i32) {
    %c0_i32 = arith.constant 0 : i32
    %c0_i32_0 = arith.constant 0 : i32
    %c0_i32_1 = arith.constant 0 : i32
    return %c0_i32, %c0_i32_0 : i32, i32
  }
  func.func @transform_12(%arg0: i32) -> (i32, i32) {
    %c0_i32 = arith.constant 0 : i32
    %c0_i32_0 = arith.constant 0 : i32
    %c0_i32_1 = arith.constant 0 : i32
    return %c0_i32, %c0_i32_0 : i32, i32
  }
  func.func @transform_13(%arg0: i32) -> (i32, i32) {
    %c0_i32 = arith.constant 0 : i32
    %c0_i32_0 = arith.constant 0 : i32
    %c0_i32_1 = arith.constant 0 : i32
    return %c0_i32, %c0_i32_0 : i32, i32
  }
  func.func @transform_14(%arg0: i32) -> (i32, i32) {
    %c0_i32 = arith.constant 0 : i32
    %c0_i32_0 = arith.constant 0 : i32
    %c0_i32_1 = arith.constant 0 : i32
    return %c0_i32, %c0_i32_0 : i32, i32
  }
  func.func @transform_15(%arg0: i32) -> (i32, i32) {
    %c0_i32 = arith.constant 0 : i32
    %c0_i32_0 = arith.constant 0 : i32
    %c0_i32_1 = arith.constant 0 : i32
    return %c0_i32, %c0_i32_0 : i32, i32
  }
  func.func @transform_16(%arg0: i32) -> (i32, i32) {
    %c0_i32 = arith.constant 0 : i32
    %c0_i32_0 = arith.constant 0 : i32
    %c0_i32_1 = arith.constant 0 : i32
    return %c0_i32, %c0_i32_0 : i32, i32
  }
  func.func @transform_17(%arg0: i32) -> (i32, i32) {
    %c0_i32 = arith.constant 0 : i32
    %c0_i32_0 = arith.constant 0 : i32
    %c0_i32_1 = arith.constant 0 : i32
    return %c0_i32, %c0_i32_0 : i32, i32
  }
}

</mosaic_0001>

<bundles_post_ra>
// kernel: base_net_forward.1
= control target key start
LH: loop header
LB: loop body
LE: loop exit
PB: predicated region body
PF: predicated region fallthrough
CT: control target
= control target key end

     0   :  { %s6977_s0 = inlined_call_operand.vmem [shape: bf16[288,18], index: 0, kind: input, shape index: {}]   ;;  %s6978_s1 = inlined_call_operand.vmem [shape: bf16[18,64], index: 1, kind: input, shape index: {}]   ;;  %s6979_s2 = inlined_call_operand.vmem [shape: f32[1,64], index: 2, kind: input, shape index: {}]   ;;  %s6980_s3 = inlined_call_operand.vmem [shape: bf16[288,72], index: 3, kind: input, shape index: {}]   ;;  %s6981_s4 = inlined_call_operand.vmem [shape: bf16[576,128], index: 4, kind: input, shape index: {}]   ;;  %s6982_s5 = inlined_call_operand.vmem [shape: f32[1,128], index: 5, kind: input, shape index: {}]   ;;  %s6983_s6 = inlined_call_operand.vmem [shape: bf16[4,2,8], index: 6, kind: input, shape index: {}]   ;;  %s6984_s7 = inlined_call_operand.vmem [shape: bf16[512,400], index: 7, kind: input, shape index: {}]   ;;  %s6985_s8 = inlined_call_operand.vmem [shape: f32[1,400], index: 8, kind: input, shape index: {}]   ;;  %s6986_s9 = inlined_call_operand.vmem [shape: bf16[400,20], index: 9, kind: input, shape index: {}]   ;;  %s6987_s10 = inlined_call_operand.vmem [shape: f32[1,20], index: 10, kind: input, shape index: {}]   ;;  %s6988_s11 = inlined_call_operand.vmem [shape: bf16[20,300], index: 11, kind: input, shape index: {}]   ;;  %s6989_s12 = inlined_call_operand.vmem [shape: f32[1,300], index: 12, kind: input, shape index: {}]   ;;  %s6990_s13 = inlined_call_operand.vmem [shape: bf16[300,300], index: 13, kind: input, shape index: {}]   ;;  %s6991_s14 = inlined_call_operand.vmem [shape: f32[1,300], index: 14, kind: input, shape index: {}]   ;;  %s6992_s15 = inlined_call_operand.vmem [shape: bf16[300,2], index: 15, kind: input, shape index: {}]   ;;  %s6993_s16 = inlined_call_operand.vmem [shape: f32[1,2], index: 16, kind: input, shape index: {}]   ;;  %s6994_s17 = inlined_call_operand.hbm [shape: f32[2,2], index: 17, kind: output, shape index: {}]  }
   0x1   :  { %6997 = sst [smem:[#allocation5_spill]] %s6977_s0 }
   0x2   :  { %6998 = sst [smem:[#allocation6_spill]] %s6978_s1 }
   0x3   :  { %s6999_s26 = sld [smem:[#allocation6_spill]]  ;;  %vm251_vm0 = vcmask 1040384  }
   0x9   :  { %v96_v0 = vld [vmem:[%s6999_s26 + $0x8] sm:$0x1] }
   0xa   :  { %v192_v1 = vunpack.c.l.b16 %v96_v0 }
   0xc   :  { %v194_v2 = vpack.c.b16 %v192_v1, %v192_v1 }
   0xd   :  { %22 = vsyncpa [#allocation3], 0  ;;  %v4824_v4 = vld [vmem:[%s6999_s26] sm:$0xff]  ;;  %s7000_s30 = sld [smem:[#allocation5_spill]]  ;;  %vm196_vm1 = vcmask 146432   ;;  %vm429_vm2 = vcmask 1043456  }
   0xe   :  { %v253_v3 = vsel %vm251_vm0, %v194_v2, 0  ;;  %v5117_v54 = vld [vmem:[%s6979_s2] ss:$0 sm:$0xff]  ;;  %vm422_vm3 = vcmask 588800   ;;  %vm535_vm4 = vcmask 523264   ;;  %vm1335_vm5 = vcmask 64512  }
   0xf   :  { %261 = vmatpush.bf16.msra.mxu0 %v253_v3  ;;  %vm2623_vm6 = vcmask 130048   ;;  %vm2722_vm7 = vcmask 1041408   ;;  %vm3166_vm8 = vcmask 1045504   ;;  %vm2718_vm9 = vcmask 162816  }
  0x10   :  { %vm3162_vm10 = vcmask 359424   ;;  %vm3499_vm11 = vcmask 9216  }
  0x13   :  { %v4806_v5 = vld [vmem:[%s7000_s30] sm:$0xff]  ;;  %262 = vmatpush.bf16.msra.mxu0 %v4824_v4  ;;  %v4807_v6 = vld [vmem:[%s7000_s30 + $0x8] sm:$0xff]  ;;  %v4808_v7 = vld [vmem:[%s7000_s30 + $0x10] sm:$0xff] }
  0x14   :  { %v4809_v8 = vld [vmem:[%s7000_s30 + $0x18] sm:$0xff]  ;;  %v4810_v9 = vld [vmem:[%s7000_s30 + $0x20] sm:$0xff]  ;;  %v4811_v10 = vld [vmem:[%s7000_s30 + $0x28] sm:$0xff] }
  0x15   :  { %v4812_v11 = vld [vmem:[%s7000_s30 + $0x30] sm:$0xff]  ;;  %v4813_v12 = vld [vmem:[%s7000_s30 + $0x38] sm:$0xff]  ;;  %v4814_v13 = vld [vmem:[%s7000_s30 + $0x40] sm:$0xff] }
  0x16   :  { %3593 = vmatmul.msk.bf16.vlgmr.msra.gmra.mxu0 %vm196_vm1, %v4806_v5  ;;  %v4815_v16 = vld [vmem:[%s7000_s30 + $0x48] sm:$0xff]  ;;  %v4816_v19 = vld [vmem:[%s7000_s30 + $0x50] sm:$0xff]  ;;  %v4817_v22 = vld [vmem:[%s7000_s30 + $0x58] sm:$0xff] }
  0x17   :  { %v4818_v25 = vld [vmem:[%s7000_s30 + $0x60] sm:$0xff]  ;;  %v4819_v28 = vld [vmem:[%s7000_s30 + $0x68] sm:$0xff]  ;;  %v4820_v31 = vld [vmem:[%s7000_s30 + $0x70] sm:$0xff] }
  0x18   :  { %v4821_v34 = vld [vmem:[%s7000_s30 + $0x78] sm:$0xff]  ;;  %v4822_v37 = vld [vmem:[%s7000_s30 + $0x80] sm:$0xff]  ;;  %v4823_v40 = vld [vmem:[%s7000_s30 + $0x88] sm:$0xff]  ;;  %s5147_s30 = smov [#allocation2]  }
  0x19   :  { %s3506_s25 = sshll.u32 %s5147_s30, 4  ;;  %s3507_s25 = int_to_ptr.vmem [resolvable:$true] %s3506_s25 }
  0x26   :  { %3594 = vmatmul.msk.bf16.gmra.mxu0 %vm196_vm1, %v4807_v6 }
  0x36   :  { %3595 = vmatmul.msk.bf16.gmra.mxu0 %vm196_vm1, %v4808_v7 }
  0x46   :  { %3596 = vmatmul.msk.bf16.gmra.mxu0 %vm196_vm1, %v4809_v8 }
  0x56   :  { %3597 = vmatmul.msk.bf16.gmra.mxu0 %vm196_vm1, %v4810_v9 }
  0x66   :  { %3598 = vmatmul.msk.bf16.gmra.mxu0 %vm196_vm1, %v4811_v10 }
  0x76   :  { %3599 = vmatmul.msk.bf16.gmra.mxu0 %vm196_vm1, %v4812_v11 }
  0x86   :  { %3600 = vmatmul.msk.bf16.gmra.mxu0 %vm196_vm1, %v4813_v12 }
  0x93   :  { %v264_v14 = vpop.f32.mrf.mxu0 }
  0x96   :  { %3601 = vmatmul.msk.bf16.gmra.mxu0 %vm196_vm1, %v4814_v13 }
  0x9b   :  { %v266_v15 = vpop.f32.mrf.mxu0 }
  0xa3   :  { %v269_v17 = vpop.f32.mrf.mxu0 }
  0xa6   :  { %3602 = vmatmul.msk.bf16.gmra.mxu0 %vm196_vm1, %v4815_v16 }
  0xab   :  { %v5284_v18 = vpop.f32.mrf.mxu0 }
  0xb3   :  { %v5289_v20 = vpop.f32.mrf.mxu0 }
  0xb6   :  { %3603 = vmatmul.msk.bf16.gmra.mxu0 %vm196_vm1, %v4816_v19 }
  0xbb   :  { %v5292_v21 = vpop.f32.mrf.mxu0 }
  0xc3   :  { %v5297_v23 = vpop.f32.mrf.mxu0 }
  0xc6   :  { %3604 = vmatmul.msk.bf16.gmra.mxu0 %vm196_vm1, %v4817_v22 }
  0xcb   :  { %v5300_v24 = vpop.f32.mrf.mxu0 }
  0xd3   :  { %v5305_v26 = vpop.f32.mrf.mxu0 }
  0xd6   :  { %3605 = vmatmul.msk.bf16.gmra.mxu0 %vm196_vm1, %v4818_v25 }
  0xdb   :  { %v286_v27 = vpop.f32.mrf.mxu0 }
  0xdc   :  { %v354_v52 = vmax.f32 %v264_v14, %v286_v27 }
  0xe3   :  { %v289_v29 = vpop.f32.mrf.mxu0 }
  0xe4   :  { %v355_v56 = vmax.f32 %v266_v15, %v289_v29 }
  0xe6   :  { %3606 = vmatmul.msk.bf16.gmra.mxu0 %vm196_vm1, %v4819_v28 }
  0xeb   :  { %v291_v30 = vpop.f32.mrf.mxu0 }
  0xec   :  { %v356_v2 = vmax.f32 %v269_v17, %v291_v30 }
  0xf3   :  { %v294_v32 = vpop.f32.mrf.mxu0 }
  0xf4   :  { %v357_v5 = vmax.f32 %v5284_v18, %v294_v32 }
  0xf6   :  { %3607 = vmatmul.msk.bf16.gmra.mxu0 %vm196_vm1, %v4820_v31 }
  0xfb   :  { %v5316_v33 = vpop.f32.mrf.mxu0 }
 0x103   :  { %v5321_v35 = vpop.f32.mrf.mxu0 }
 0x104   :  { %v359_v32 = vmax.f32 %v5292_v21, %v5321_v35 }
 0x106   :  { %3608 = vmatmul.msk.bf16.gmra.mxu0 %vm196_vm1, %v4821_v34 }
 0x10b   :  { %v301_v36 = vpop.f32.mrf.mxu0 }
 0x10c   :  { %v360_v28 = vmax.f32 %v5297_v23, %v301_v36 }
 0x113   :  { %v304_v38 = vpop.f32.mrf.mxu0 }
 0x114   :  { %v361_v22 = vmax.f32 %v5300_v24, %v304_v38 }
 0x116   :  { %3609 = vmatmul.msk.bf16.gmra.mxu0 %vm196_vm1, %v4822_v37 }
 0x11b   :  { %v306_v39 = vpop.f32.mrf.mxu0 }
 0x11c   :  { %v362_v27 = vmax.f32 %v5305_v26, %v306_v39 }
 0x123   :  { %v309_v41 = vpop.f32.mrf.mxu0 }
 0x126   :  { %3610 = vmatmul.msk.bf16.gmra.mxu0 %vm196_vm1, %v4823_v40 }
 0x12b   :  { %v311_v42 = vpop.f32.mrf.mxu0 }
 0x133   :  { %v314_v43 = vpop.f32.mrf.mxu0 }
 0x13b   :  { %v316_v44 = vpop.f32.mrf.mxu0 }
 0x143   :  { %v319_v45 = vpop.f32.mrf.mxu0 }
 0x14b   :  { %v321_v46 = vpop.f32.mrf.mxu0 }
 0x153   :  { %v324_v47 = vpop.f32.mrf.mxu0 }
 0x15b   :  { %v326_v48 = vpop.f32.mrf.mxu0 }
 0x163   :  { %v329_v49 = vpop.f32.mrf.mxu0 }
 0x16b   :  { %v331_v50 = vpop.f32.mrf.mxu0 }
 0x16c   :  { %v363_v51 = vmax.f32 %v309_v41, %v331_v50  ;;  %v358_v41 = vmax.f32 %v5289_v20, %v5316_v33  ;;  %v4841_v50 = vld [vmem:[%s6981_s4 + $0x50] sm:$0xff] }
 0x16e   :  { %v372_v53 = vmax.f32 %v354_v52, %v363_v51  ;;  %v4840_v51 = vld [vmem:[%s6981_s4 + $0x48] sm:$0xff]  ;;  %v4839_v52 = vld [vmem:[%s6981_s4 + $0x40] sm:$0xff] }
 0x170   :  { %v385_v58 = vadd.f32 %v5117_v54, %v372_v53  ;;  %v4848_v53 = vld [vmem:[%s6981_s4 + $0x78] sm:$0xff] }
 0x172   :  { %v394_v61 = vmax.f32 %v385_v58, 0.0  ;;  %v4846_v58 = vld [vmem:[%s6981_s4 + $0x68] sm:$0xff] }
 0x173   :  { %v334_v55 = vpop.f32.mrf.mxu0 }
 0x174   :  { %v364_v57 = vmax.f32 %v311_v42, %v334_v55  ;;  %v4832_v55 = vld [vmem:[%s6980_s3 + $0x18] sm:$0xff] }
 0x176   :  { %v373_v59 = vmax.f32 %v355_v56, %v364_v57  ;;  %v4847_v56 = vld [vmem:[%s6981_s4 + $0x70] sm:$0xff]  ;;  %v4836_v57 = vld [vmem:[%s6981_s4 + $0x38] sm:$0xff] }
 0x177   :  { %546 = vmatpush.bf16.msra.mxu3 %v4836_v57 }
 0x178   :  { %v386_v60 = vadd.f32 %v5117_v54, %v373_v59  ;;  %v4835_v59 = vld [vmem:[%s6981_s4 + $0x30] sm:$0xff] }
 0x17a   :  { %v395_v62 = vmax.f32 %v386_v60, 0.0  ;;  %v4845_v60 = vld [vmem:[%s6981_s4 + $0x60] sm:$0xff] }
 0x17b   :  { %v336_v63 = vpop.f32.mrf.mxu0  ;;  %547 = vmatpush.bf16.msra.mxu3 %v4835_v59  ;;  %v4872_v59 = vld [vmem:[%s6981_s4 + $0xf8] sm:$0xff] }
 0x17c   :  { %v5335_v0 = vpack.c.bf16 %v395_v62, %v394_v61  ;;  %v365_v1 = vmax.f32 %v314_v43, %v336_v63  ;;  %v4834_v61 = vld [vmem:[%s6981_s4 + $0x28] sm:$0xff]  ;;  %v4837_v62 = vld [vmem:[%s6980_s3 + $0x20] sm:$0xff] }
 0x17d   :  { %v4838_v63 = vld [vmem:[%s6980_s3 + $0x28] sm:$0xff] }
 0x17e   :  { %v374_v3 = vmax.f32 %v356_v2, %v365_v1  ;;  %v4833_v1 = vld [vmem:[%s6981_s4 + $0x20] sm:$0xff]  ;;  %v4830_v2 = vld [vmem:[%s6981_s4 + $0x18] sm:$0xff] }
 0x17f   :  { %548 = vmatpush.bf16.msra.mxu3 %v4834_v61  ;;  %v4871_v61 = vld [vmem:[%s6981_s4 + $0xf0] sm:$0xff] }
 0x180   :  { %v387_v7 = vadd.f32 %v5117_v54, %v374_v3  ;;  %v4829_v3 = vld [vmem:[%s6981_s4 + $0x10] sm:$0xff] }
 0x182   :  { %v396_v10 = vmax.f32 %v387_v7, 0.0 }
 0x183   :  { %v339_v4 = vpop.f32.mrf.mxu0  ;;  %549 = vmatpush.bf16.msra.mxu3 %v4833_v1 }
 0x184   :  { %v366_v6 = vmax.f32 %v316_v44, %v339_v4  ;;  %v4828_v4 = vld [vmem:[%s6981_s4 + $0x8] sm:$0xff] }
 0x186   :  { %v375_v8 = vmax.f32 %v357_v5, %v366_v6  ;;  %v4827_v5 = vld [vmem:[%s6981_s4] sm:$0xff] }
 0x187   :  { %595 = vmatpush.bf16.msrb.mxu3 %v4830_v2 }
 0x188   :  { %v388_v9 = vadd.f32 %v5117_v54, %v375_v8 }
 0x18a   :  { %v397_v11 = vmax.f32 %v388_v9, 0.0 }
 0x18b   :  { %v341_v12 = vpop.f32.mrf.mxu0  ;;  %596 = vmatpush.bf16.msrb.mxu3 %v4829_v3  ;;  %v4870_v3 = vld [vmem:[%s6981_s4 + $0xe8] sm:$0xff] }
 0x18c   :  { %v5338_v13 = vpack.c.bf16 %v397_v11, %v396_v10  ;;  %v367_v34 = vmax.f32 %v319_v45, %v341_v12 }
 0x18e   :  { %v376_v43 = vmax.f32 %v358_v41, %v367_v34  ;;  %v4852_v34 = vld [vmem:[%s6981_s4 + $0x88] sm:$0xff]  ;;  %v4851_v41 = vld [vmem:[%s6981_s4 + $0x80] sm:$0xff] }
 0x18f   :  { %597 = vmatpush.bf16.msrb.mxu3 %v4828_v4  ;;  %v4865_v4 = vld [vmem:[%s6981_s4 + $0xd0] sm:$0xff] }
 0x193   :  { %v344_v14 = vpop.f32.mrf.mxu0  ;;  %598 = vmatpush.bf16.msrb.mxu3 %v4827_v5  ;;  %v4869_v5 = vld [vmem:[%s6981_s4 + $0xe0] sm:$0xff] }
 0x194   :  { %v368_v29 = vmax.f32 %v321_v46, %v344_v14  ;;  %v389_v46 = vadd.f32 %v5117_v54, %v376_v43  ;;  %v4850_v43 = vld [vmem:[%s6980_s3 + $0x48] sm:$0xff] }
 0x196   :  { %v377_v24 = vmax.f32 %v359_v32, %v368_v29  ;;  %v398_v33 = vmax.f32 %v389_v46, 0.0  ;;  %v4857_v32 = vld [vmem:[%s6981_s4 + $0xa0] sm:$0xff] }
 0x198   :  { %v390_v23 = vadd.f32 %v5117_v54, %v377_v24 }
 0x19a   :  { %v399_v35 = vmax.f32 %v390_v23, 0.0 }
 0x19b   :  { %v346_v15 = vpop.f32.mrf.mxu0 }
 0x19c   :  { %v369_v17 = vmax.f32 %v324_v47, %v346_v15  ;;  %v5356_v45 = vpack.c.bf16 %v399_v35, %v398_v33  ;;  %v4842_v47 = vld [vmem:[%s6981_s4 + $0x58] sm:$0xff] }
 0x19e   :  { %v378_v37 = vmax.f32 %v360_v28, %v369_v17  ;;  %v4860_v17 = vld [vmem:[%s6981_s4 + $0xb8] sm:$0xff] }
 0x1a0   :  { %v391_v26 = vadd.f32 %v5117_v54, %v378_v37 }
 0x1a2   :  { %v400_v21 = vmax.f32 %v391_v26, 0.0  ;;  %v4844_v26 = vld [vmem:[%s6980_s3 + $0x38] sm:$0xff] }
 0x1a3   :  { %v349_v16 = vpop.f32.mrf.mxu0 }
 0x1a4   :  { %v370_v19 = vmax.f32 %v326_v48, %v349_v16  ;;  %v4825_v48 = vld [vmem:[%s6980_s3] sm:$0xff] }
 0x1a6   :  { %v379_v30 = vmax.f32 %v361_v22, %v370_v19 }
 0x1a8   :  { %v392_v38 = vadd.f32 %v5117_v54, %v379_v30  ;;  %v4858_v30 = vld [vmem:[%s6981_s4 + $0xa8] sm:$0xff] }
 0x1aa   :  { %v401_v36 = vmax.f32 %v392_v38, 0.0  ;;  %v4849_v38 = vld [vmem:[%s6980_s3 + $0x40] sm:$0xff] }
 0x1ab   :  { %v351_v25 = vpop.f32.mrf.mxu0 }
 0x1ac   :  { %v371_v18 = vmax.f32 %v329_v49, %v351_v25  ;;  %v5352_v20 = vpack.c.bf16 %v401_v36, %v400_v21  ;;  %v4831_v49 = vld [vmem:[%s6980_s3 + $0x10] sm:$0xff] }
 0x1ae   :  { %v380_v31 = vmax.f32 %v362_v27, %v371_v18  ;;  %v4859_v27 = vld [vmem:[%s6981_s4 + $0xb0] sm:$0xff]  ;;  %v4854_v18 = vld [vmem:[%s6981_s4 + $0x98] sm:$0xff] }
 0x1b0   :  { %v393_v40 = vadd.f32 %v5117_v54, %v380_v31  ;;  %v4826_v54 = vld [vmem:[%s6980_s3 + $0x8] sm:$0xff]  ;;  %v4853_v31 = vld [vmem:[%s6981_s4 + $0x90] sm:$0xff] }
 0x1b2   :  { %v402_v42 = vmax.f32 %v393_v40, 0.0 }
 0x1b4   :  { %v407_v39 = vpack.c.bf16 %v402_v42, %v402_v42  ;;  %v4843_v42 = vld [vmem:[%s6980_s3 + $0x30] sm:$0xff] }
 0x1b6   :  { %v5348_v44 = vsel %vm429_vm2, %v407_v39, 0 }
 0x1b7   :  { %436 = vmatpush.bf16.msra.mxu1 %v5348_v44  ;;  %485 = vmatpush.bf16.msra.mxu2 %v5348_v44 }
 0x1bb   :  { %437 = vmatpush.bf16.msra.mxu1 %v5352_v20  ;;  %486 = vmatpush.bf16.msra.mxu2 %v5352_v20 }
 0x1bf   :  { %438 = vmatpush.bf16.msra.mxu1 %v5356_v45  ;;  %487 = vmatpush.bf16.msra.mxu2 %v5356_v45 }
 0x1c3   :  { %439 = vmatpush.bf16.msra.mxu1 %v5338_v13  ;;  %488 = vmatpush.bf16.msra.mxu2 %v5338_v13 }
 0x1c7   :  { %440 = vmatpush.bf16.msra.mxu1 %v5335_v0  ;;  %489 = vmatpush.bf16.msra.mxu2 %v5335_v0 }
 0x1ca   :  { %3619 = vmatmul.msk.bf16.vlgmr.msra.gmra.mxu1 %vm422_vm3, %v4825_v48  ;;  %3629 = vmatmul.msk.bf16.vlgmr.msra.gmra.mxu2 %vm422_vm3, %v4831_v49 }
 0x1cb   :  { %633 = vmatpush.bf16.msrb.mxu1 %v5348_v44  ;;  %693 = vmatpush.bf16.msrb.mxu2 %v4842_v47 }
 0x1cf   :  { %634 = vmatpush.bf16.msrb.mxu1 %v5352_v20  ;;  %694 = vmatpush.bf16.msrb.mxu2 %v4841_v50 }
 0x1d3   :  { %635 = vmatpush.bf16.msrb.mxu1 %v5356_v45  ;;  %695 = vmatpush.bf16.msrb.mxu2 %v4840_v51 }
 0x1d7   :  { %636 = vmatpush.bf16.msrb.mxu1 %v5338_v13  ;;  %696 = vmatpush.bf16.msrb.mxu2 %v4839_v52 }
 0x1da   :  { %3620 = vmatmul.msk.bf16.gmra.mxu1 %vm422_vm3, %v4826_v54  ;;  %3630 = vmatmul.msk.bf16.gmra.mxu2 %vm422_vm3, %v4832_v55 }
 0x1db   :  { %837 = vmatpush.bf16.msra.mxu2 %v5348_v44  ;;  %637 = vmatpush.bf16.msrb.mxu1 %v5335_v0 }
 0x1df   :  { %838 = vmatpush.bf16.msra.mxu2 %v5352_v20  ;;  %795 = vmatpush.bf16.msra.mxu1 %v4848_v53 }
 0x1e3   :  { %839 = vmatpush.bf16.msra.mxu2 %v5356_v45  ;;  %796 = vmatpush.bf16.msra.mxu1 %v4847_v56 }
 0x1e7   :  { %840 = vmatpush.bf16.msra.mxu2 %v5338_v13  ;;  %797 = vmatpush.bf16.msra.mxu1 %v4846_v58 }
 0x1ea   :  { %3675 = vmatmul.msk.bf16.vlgmr.msrb.gmra.mxu1 %vm422_vm3, %v4837_v62 }
 0x1eb   :  { %841 = vmatpush.bf16.msra.mxu2 %v5335_v0  ;;  %798 = vmatpush.bf16.msra.mxu1 %v4845_v60 }
 0x1ef   :  { %939 = vmatpush.bf16.msrb.mxu1 %v5348_v44 }
 0x1f3   :  { %940 = vmatpush.bf16.msrb.mxu1 %v5352_v20 }
 0x1f7   :  { %941 = vmatpush.bf16.msrb.mxu1 %v5356_v45 }
 0x1fa   :  { %3676 = vmatmul.msk.bf16.gmra.mxu1 %vm422_vm3, %v4838_v63  ;;  %v4866_v63 = vld [vmem:[%s6981_s4 + $0xd8] sm:$0xff] }
 0x1fb   :  { %942 = vmatpush.bf16.msrb.mxu1 %v5338_v13 }
 0x1ff   :  { %943 = vmatpush.bf16.msrb.mxu1 %v5335_v0 }
 0x247   :  { %v442_v6 = vpop.f32.mrf.mxu1 }
 0x24d   :  { %v491_v7 = vpop.f32.mrf.mxu2 }
 0x24f   :  { %v444_v8 = vpop.f32.mrf.mxu1 }
 0x250   :  { %v452_v28 = vpack.c.bf16 %v444_v8, %v442_v6 }
 0x255   :  { %v493_v9 = vpop.f32.mrf.mxu2 }
 0x256   :  { %v501_v10 = vpack.c.bf16 %v493_v9, %v491_v7  ;;  %v4864_v7 = vld [vmem:[%s6981_s4 + $0xc8] sm:$0xff] }
 0x257   :  { %v447_v11 = vpop.f32.mrf.mxu1 }
 0x258   :  { %3647 = vmatmul.msk.bf16.vlgmr.msra.gmra.mxu3 %vm535_vm4, %v501_v10  ;;  %v4863_v10 = vld [vmem:[%s6981_s4 + $0xc0] sm:$0xff] }
 0x259   :  { %735 = vmatpush.bf16.msra.mxu3 %v5348_v44 }
 0x25d   :  { %736 = vmatpush.bf16.msra.mxu3 %v5352_v20  ;;  %v496_v12 = vpop.f32.mrf.mxu2 }
 0x25f   :  { %v449_v14 = vpop.f32.mrf.mxu1 }
 0x260   :  { %v453_v24 = vpack.c.bf16 %v449_v14, %v447_v11  ;;  %v4861_v14 = vld [vmem:[%s6980_s3 + $0x60] sm:$0xff] }
 0x261   :  { %737 = vmatpush.bf16.msra.mxu3 %v5356_v45 }
 0x265   :  { %738 = vmatpush.bf16.msra.mxu3 %v5338_v13  ;;  %v498_v15 = vpop.f32.mrf.mxu2 }
 0x266   :  { %v502_v16 = vpack.c.bf16 %v498_v15, %v496_v12  ;;  %v4855_v15 = vld [vmem:[%s6980_s3 + $0x50] sm:$0xff] }
 0x267   :  { %v639_v19 = vpop.f32.mrf.mxu1 }
 0x268   :  { %3648 = vmatmul.msk.bf16.gmra.mxu3 %vm535_vm4, %v502_v16  ;;  %v4862_v16 = vld [vmem:[%s6980_s3 + $0x68] sm:$0xff] }
 0x269   :  { %739 = vmatpush.bf16.msra.mxu3 %v5335_v0 }
 0x26f   :  { %v641_v22 = vpop.f32.mrf.mxu1 }
 0x270   :  { %v649_v25 = vpack.c.bf16 %v641_v22, %v639_v19 }
 0x272   :  { %3693 = vmatmul.msk.bf16.vlgmr.msrb.gmra.mxu2 %vm535_vm4, %v649_v25 }
 0x273   :  { %999 = vmatpush.bf16.msrb.mxu2 %v4860_v17 }
 0x277   :  { %v644_v29 = vpop.f32.mrf.mxu1  ;;  %1000 = vmatpush.bf16.msrb.mxu2 %v4859_v27 }
 0x278   :  { %3665 = vmatmul.msk.bf16.vlgmr.msrb.gmra.mxu3 %vm535_vm4, %v452_v28 }
 0x279   :  { %897 = vmatpush.bf16.msrb.mxu3 %v4854_v18 }
 0x27b   :  { %1001 = vmatpush.bf16.msrb.mxu2 %v4858_v30 }
 0x27d   :  { %898 = vmatpush.bf16.msrb.mxu3 %v4853_v31 }
 0x27f   :  { %v646_v37 = vpop.f32.mrf.mxu1  ;;  %1002 = vmatpush.bf16.msrb.mxu2 %v4857_v32 }
 0x280   :  { %v650_v40 = vpack.c.bf16 %v646_v37, %v644_v29 }
 0x281   :  { %899 = vmatpush.bf16.msrb.mxu3 %v4852_v34 }
 0x282   :  { %3694 = vmatmul.msk.bf16.gmra.mxu2 %vm535_vm4, %v650_v40 }
 0x285   :  { %900 = vmatpush.bf16.msrb.mxu3 %v4851_v41 }
 0x288   :  { %3666 = vmatmul.msk.bf16.gmra.mxu3 %vm535_vm4, %v453_v24 }
 0x292   :  { %3731 = vmatmul.msk.bf16.vlgmr.msra.gmra.mxu2 %vm422_vm3, %v4849_v38 }
 0x293   :  { %1143 = vmatpush.bf16.msra.mxu2 %v5348_v44 }
 0x297   :  { %1144 = vmatpush.bf16.msra.mxu2 %v5352_v20 }
 0x298   :  { %3703 = vmatmul.msk.bf16.vlgmr.msra.gmra.mxu3 %vm422_vm3, %v4843_v42 }
 0x299   :  { %1041 = vmatpush.bf16.msra.mxu3 %v5348_v44 }
 0x29b   :  { %1145 = vmatpush.bf16.msra.mxu2 %v5356_v45 }
 0x29d   :  { %1042 = vmatpush.bf16.msra.mxu3 %v5352_v20 }
 0x29f   :  { %1146 = vmatpush.bf16.msra.mxu2 %v5338_v13 }
 0x2a1   :  { %1043 = vmatpush.bf16.msra.mxu3 %v5356_v45 }
 0x2a2   :  { %3732 = vmatmul.msk.bf16.gmra.mxu2 %vm422_vm3, %v4850_v43 }
 0x2a3   :  { %1147 = vmatpush.bf16.msra.mxu2 %v5335_v0 }
 0x2a5   :  { %1044 = vmatpush.bf16.msra.mxu3 %v5338_v13 }
 0x2a8   :  { %3704 = vmatmul.msk.bf16.gmra.mxu3 %vm422_vm3, %v4844_v26 }
 0x2a9   :  { %1045 = vmatpush.bf16.msra.mxu3 %v5335_v0 }
 0x2db   :  { %v551_v39 = vpop.f32.mrf.mxu3 }
 0x2e3   :  { %v5512_v23 = vpop.f32.mrf.mxu3 }
 0x2eb   :  { %v556_v36 = vpop.f32.mrf.mxu3 }
 0x2f3   :  { %v5514_v46 = vpop.f32.mrf.mxu3 }
 0x2f5   :  { %v698_v21 = vpop.f32.mrf.mxu2 }
 0x2fb   :  { %v600_v35 = vpop.f32.mrf.mxu3 }
 0x2fc   :  { %v601_v33 = vadd.f32 %v600_v35, %v551_v39  ;;  %v4867_v39 = vld [vmem:[%s6980_s3 + $0x70] sm:$0xff] }
 0x2fd   :  { %v5516_v47 = vpop.f32.mrf.mxu2 }
 0x2fe   :  { %v708_v48 = vadd.f32 %v698_v21, %v601_v33  ;;  %v4868_v21 = vld [vmem:[%s6980_s3 + $0x78] sm:$0xff] }
 0x2ff   :  { %v4878_v33 = vld [vmem:[%s6981_s4 + $0x118] sm:$0xff] }
 0x303   :  { %v5518_v49 = vpop.f32.mrf.mxu3 }
 0x305   :  { %v703_v50 = vpop.f32.mrf.mxu2 }
 0x30b   :  { %v605_v51 = vpop.f32.mrf.mxu3 }
 0x30c   :  { %v606_v52 = vadd.f32 %v605_v51, %v556_v36  ;;  %v4873_v36 = vld [vmem:[%s6980_s3 + $0x80] sm:$0xff] }
 0x30d   :  { %v5520_v53 = vpop.f32.mrf.mxu2 }
 0x30e   :  { %v710_v54 = vadd.f32 %v703_v50, %v606_v52  ;;  %v4877_v50 = vld [vmem:[%s6981_s4 + $0x110] sm:$0xff] }
 0x313   :  { %v5522_v55 = vpop.f32.mrf.mxu3 }
 0x315   :  { %v843_v56 = vpop.f32.mrf.mxu2 }
 0x31b   :  { %v741_v57 = vpop.f32.mrf.mxu3 }
 0x31d   :  { %v845_v58 = vpop.f32.mrf.mxu2 }
 0x31e   :  { %v853_v60 = vpack.c.bf16 %v845_v58, %v843_v56  ;;  %v4875_v58 = vld [vmem:[%s6981_s4 + $0x100] sm:$0xff] }
 0x320   :  { %3749 = vmatmul.msk.bf16.vlgmr.msrb.gmra.mxu3 %vm535_vm4, %v853_v60 }
 0x321   :  { %1203 = vmatpush.bf16.msrb.mxu3 %v4872_v59 }
 0x323   :  { %v743_v62 = vpop.f32.mrf.mxu3 }
 0x324   :  { %v751_v1 = vpack.c.bf16 %v743_v62, %v741_v57 }
 0x325   :  { %v848_v2 = vpop.f32.mrf.mxu2  ;;  %1204 = vmatpush.bf16.msrb.mxu3 %v4871_v61 }
 0x326   :  { %3721 = vmatmul.msk.bf16.vlgmr.msra.gmra.mxu1 %vm535_vm4, %v751_v1 }
 0x327   :  { %1101 = vmatpush.bf16.msra.mxu1 %v4866_v63 }
 0x329   :  { %1205 = vmatpush.bf16.msrb.mxu3 %v4870_v3 }
 0x32b   :  { %v746_v6 = vpop.f32.mrf.mxu3  ;;  %1102 = vmatpush.bf16.msra.mxu1 %v4865_v4 }
 0x32d   :  { %v850_v8 = vpop.f32.mrf.mxu2  ;;  %1206 = vmatpush.bf16.msrb.mxu3 %v4869_v5 }
 0x32e   :  { %v854_v9 = vpack.c.bf16 %v850_v8, %v848_v2 }
 0x32f   :  { %1103 = vmatpush.bf16.msra.mxu1 %v4864_v7 }
 0x330   :  { %3750 = vmatmul.msk.bf16.gmra.mxu3 %vm535_vm4, %v854_v9 }
 0x333   :  { %v748_v11 = vpop.f32.mrf.mxu3  ;;  %1104 = vmatpush.bf16.msra.mxu1 %v4863_v10 }
 0x334   :  { %v752_v12 = vpack.c.bf16 %v748_v11, %v746_v6  ;;  %v4874_v11 = vld [vmem:[%s6980_s3 + $0x88] sm:$0xff] }
 0x336   :  { %3722 = vmatmul.msk.bf16.gmra.mxu1 %vm535_vm4, %v752_v12 }
 0x340   :  { %3787 = vmatmul.msk.bf16.vlgmr.msra.gmra.mxu3 %vm422_vm3, %v4861_v14 }
 0x341   :  { %5111 = vmatpush.bf16.msra.mxu3 %v5348_v44 }
 0x345   :  { %5112 = vmatpush.bf16.msra.mxu3 %v5352_v20 }
 0x346   :  { %3759 = vmatmul.msk.bf16.vlgmr.msrb.gmra.mxu1 %vm422_vm3, %v4855_v15 }
 0x347   :  { %1245 = vmatpush.bf16.msrb.mxu1 %v5348_v44  ;;  %v4856_v44 = vld [vmem:[%s6980_s3 + $0x58] sm:$0xff] }
 0x349   :  { %5113 = vmatpush.bf16.msra.mxu3 %v5356_v45 }
 0x34b   :  { %1246 = vmatpush.bf16.msrb.mxu1 %v5352_v20 }
 0x34d   :  { %5114 = vmatpush.bf16.msra.mxu3 %v5338_v13 }
 0x34f   :  { %1247 = vmatpush.bf16.msrb.mxu1 %v5356_v45 }
 0x350   :  { %3788 = vmatmul.msk.bf16.gmra.mxu3 %vm422_vm3, %v4862_v16 }
 0x351   :  { %5115 = vmatpush.bf16.msra.mxu3 %v5335_v0 }
 0x353   :  { %1248 = vmatpush.bf16.msrb.mxu1 %v5338_v13 }
 0x356   :  { %3760 = vmatmul.msk.bf16.gmra.mxu1 %vm422_vm3, %v4856_v44 }
 0x357   :  { %1249 = vmatpush.bf16.msrb.mxu1 %v5335_v0 }
 0x3a3   :  { %v800_v20 = vpop.f32.mrf.mxu1  ;;  %v902_v19 = vpop.f32.mrf.mxu3 }
 0x3a4   :  { %v810_v22 = vadd.f32 %v800_v20, %v708_v48 }
 0x3a6   :  { %v912_v17 = vadd.f32 %v902_v19, %v810_v22 }
 0x3ab   :  { %v5578_v25 = vpop.f32.mrf.mxu1  ;;  %v5580_v45 = vpop.f32.mrf.mxu3 }
 0x3b3   :  { %v805_v27 = vpop.f32.mrf.mxu1  ;;  %v907_v18 = vpop.f32.mrf.mxu3 }
 0x3b4   :  { %v812_v28 = vadd.f32 %v805_v27, %v710_v54  ;;  %v4876_v54 = vld [vmem:[%s6981_s4 + $0x108] sm:$0xff] }
 0x3b6   :  { %v914_v29 = vadd.f32 %v907_v18, %v812_v28  ;;  %v603_v18 = vadd.f32 %v5518_v49, %v5512_v23  ;;  %v608_v28 = vadd.f32 %v5522_v55, %v5514_v46  ;;  %v4941_v23 = vld [vmem:[%s6984_s7 + $0x1ec] sm:$0xf0] }
 0x3bb   :  { %v5582_v30 = vpop.f32.mrf.mxu1  ;;  %v5584_v31 = vpop.f32.mrf.mxu3 }
 0x3c3   :  { %v945_v13 = vpop.f32.mrf.mxu1  ;;  %v1047_v32 = vpop.f32.mrf.mxu3 }
 0x3cb   :  { %v947_v34 = vpop.f32.mrf.mxu1  ;;  %v1049_v0 = vpop.f32.mrf.mxu3 }
 0x3cc   :  { %v955_v37 = vpack.c.bf16 %v947_v34, %v945_v13  ;;  %v1057_v40 = vpack.c.bf16 %v1049_v0, %v1047_v32  ;;  %v711_v34 = vadd.f32 %v5520_v53, %v608_v28  ;;  %v3980_v0 = vld [vmem:[%s6984_s7 + $0x1e0] sm:$0xf]  ;;  %v4937_v53 = vld [vmem:[%s6984_s7 + $0x1cc] sm:$0xf0]  ;;  %v3990_v28 = vld [vmem:[%s6984_s7 + $0x1f8] sm:$0xf0] }
 0x3cd   :  { %v3981_v46 = vor.u32 %v4941_v23, %v3980_v0  ;;  %v3956_v0 = vld [vmem:[%s6984_s7 + $0x1a8] sm:$0xf] }
 0x3ce   :  { %3777 = vmatmul.msk.bf16.vlgmr.msrb.gmra.mxu2 %vm535_vm4, %v955_v37  ;;  %3805 = vmatmul.msk.bf16.vlgmr.msra.gmra.mxu1 %vm535_vm4, %v1057_v40  ;;  %v813_v40 = vadd.f32 %v5582_v30, %v711_v34  ;;  %v3950_v34 = vld [vmem:[%s6984_s7 + $0x1b0] sm:$0xf0] }
 0x3cf   :  { %1305 = vmatpush.bf16.msrb.mxu2 %v4878_v33  ;;  %v3916_v33 = vld [vmem:[%s6984_s7 + $0x160] sm:$0xf] }
 0x3d3   :  { %v950_v41 = vpop.f32.mrf.mxu1  ;;  %v1052_v24 = vpop.f32.mrf.mxu3  ;;  %1306 = vmatpush.bf16.msrb.mxu2 %v4877_v50  ;;  %v4925_v50 = vld [vmem:[%s6984_s7 + $0x16c] sm:$0xf0] }
 0x3d7   :  { %1307 = vmatpush.bf16.msrb.mxu2 %v4876_v54 }
 0x3db   :  { %v952_v38 = vpop.f32.mrf.mxu1  ;;  %v1054_v42 = vpop.f32.mrf.mxu3  ;;  %1308 = vmatpush.bf16.msrb.mxu2 %v4875_v58 }
 0x3dc   :  { %v956_v43 = vpack.c.bf16 %v952_v38, %v950_v41  ;;  %v1058_v26 = vpack.c.bf16 %v1054_v42, %v1052_v24  ;;  %v4933_v41 = vld [vmem:[%s6984_s7 + $0x1ac] sm:$0xf0] }
 0x3de   :  { %3778 = vmatmul.msk.bf16.gmra.mxu2 %vm535_vm4, %v956_v43  ;;  %3806 = vmatmul.msk.bf16.gmra.mxu1 %vm535_vm4, %v1058_v26  ;;  %v3932_v26 = vld [vmem:[%s6984_s7 + $0x180] sm:$0xf] }
 0x3ee   :  { %3815 = vmatmul.msk.bf16.vlgmr.msra.gmra.mxu2 %vm422_vm3, %v4867_v39  ;;  %3843 = vmatmul.msk.bf16.vlgmr.msrb.gmra.mxu1 %vm422_vm3, %v4873_v36 }
 0x3ef   :  { %1599 = vmatpush.bf16.msra.mxu2 %v3981_v46  ;;  %v4936_v46 = vld [vmem:[%s6984_s7 + $0x1cc] sm:$0xf] }
 0x3fe   :  { %3816 = vmatmul.msk.bf16.gmra.mxu2 %vm422_vm3, %v4868_v21 }
 0x44b   :  { %v1106_v35 = vpop.f32.mrf.mxu1 }
 0x451   :  { %v1004_v48 = vpop.f32.mrf.mxu2 }
 0x452   :  { %v1014_v51 = vadd.f32 %v1004_v48, %v912_v17 }
 0x453   :  { %v1108_v52 = vpop.f32.mrf.mxu1 }
 0x454   :  { %v1116_v56 = vadd.f32 %v1106_v35, %v1014_v51 }
 0x459   :  { %v1006_v57 = vpop.f32.mrf.mxu2 }
 0x45b   :  { %v1111_v59 = vpop.f32.mrf.mxu1 }
 0x461   :  { %v1009_v60 = vpop.f32.mrf.mxu2 }
 0x462   :  { %v1016_v61 = vadd.f32 %v1009_v60, %v914_v29  ;;  %v709_v29 = vadd.f32 %v5516_v47, %v603_v18  ;;  %v3964_v47 = vld [vmem:[%s6984_s7 + $0x1c0] sm:$0xf]  ;;  %v4940_v18 = vld [vmem:[%s6984_s7 + $0x1ec] sm:$0xf] }
 0x463   :  { %v1113_v62 = vpop.f32.mrf.mxu1  ;;  %v3965_v55 = vor.u32 %v4937_v53, %v3964_v47  ;;  %v3900_v60 = vld [vmem:[%s6984_s7 + $0x140] sm:$0xf]  ;;  %v3993_v23 = vor.u32 %v4940_v18, %v3990_v28  ;;  %v3974_v47 = vld [vmem:[%s6984_s7 + $0x1d8] sm:$0xf0]  ;;  %v4110_v18 = vld [vmem:[%s6984_s7 + $0xf0] sm:$0xf0] }
 0x464   :  { %v1118_v63 = vadd.f32 %v1111_v59, %v1016_v61  ;;  %v811_v13 = vadd.f32 %v5578_v25, %v709_v29  ;;  %v915_v25 = vadd.f32 %v5584_v31, %v813_v40  ;;  %v4929_v31 = vld [vmem:[%s6984_s7 + $0x18c] sm:$0xf0]  ;;  %v5118_v59 = vld [vmem:[%s6982_s5] ss:$0 sm:$0xff] }
 0x465   :  { %1600 = vmatpush.bf16.msra.mxu2 %v3965_v55  ;;  %v3933_v36 = vor.u32 %v4929_v31, %v3932_v26  ;;  %v4921_v61 = vld [vmem:[%s6984_s7 + $0x14c] sm:$0xf0]  ;;  %v4927_v55 = vld [vmem:[%s6984_s7 + $0x184] sm:$0xf]  ;;  %v3918_v31 = vld [vmem:[%s6984_s7 + $0x170] sm:$0xf0] }
 0x466   :  { %v913_v37 = vadd.f32 %v5580_v45, %v811_v13  ;;  %v3948_v45 = vld [vmem:[%s6984_s7 + $0x1a0] sm:$0xf]  ;;  %v4923_v26 = vld [vmem:[%s6984_s7 + $0x164] sm:$0xf] }
 0x467   :  { %v3949_v42 = vor.u32 %v4933_v41, %v3948_v45  ;;  %v3940_v45 = vld [vmem:[%s6984_s7 + $0x188] sm:$0xf]  ;;  %v3977_v41 = vor.u32 %v4936_v46, %v3974_v47  ;;  %v4903_v46 = vld [vmem:[%s6984_s7 + $0xc4] sm:$0xf]  ;;  %v4094_v47 = vld [vmem:[%s6984_s7 + $0xd0] sm:$0xf0] }
 0x468   :  { %v1015_v49 = vadd.f32 %v1006_v57, %v913_v37  ;;  %v4934_v37 = vld [vmem:[%s6984_s7 + $0x1b4] sm:$0xf0] }
 0x469   :  { %v1011_v1 = vpop.f32.mrf.mxu2  ;;  %1601 = vmatpush.bf16.msra.mxu2 %v3949_v42  ;;  %v3957_v53 = vor.u32 %v4934_v37, %v3956_v0 }
 0x46a   :  { %v1117_v24 = vadd.f32 %v1108_v52, %v1015_v49  ;;  %v1017_v38 = vadd.f32 %v1011_v1, %v915_v25  ;;  %v3934_v25 = vld [vmem:[%s6984_s7 + $0x190] sm:$0xf0] }
 0x46b   :  { %v1251_v2 = vpop.f32.mrf.mxu1  ;;  %v3937_v42 = vor.u32 %v4927_v55, %v3934_v25  ;;  %v4097_v55 = vor.u32 %v4903_v46, %v4094_v47  ;;  %v4076_v25 = vld [vmem:[%s6984_s7 + $0xa0] sm:$0xf]  ;;  %v4973_v46 = vld [vmem:[%s6984_s7 + $0x2ec] sm:$0xf0]  ;;  %v4116_v47 = vld [vmem:[%s6984_s7 + $0xe8] sm:$0xf] }
 0x46c   :  { %v1119_v39 = vadd.f32 %v1113_v62, %v1017_v38  ;;  %v3958_v38 = vld [vmem:[%s6984_s7 + $0x1b8] sm:$0xf0] }
 0x46d   :  { %1602 = vmatpush.bf16.msra.mxu2 %v3933_v36  ;;  %v4926_v36 = vld [vmem:[%s6984_s7 + $0x174] sm:$0xf0] }
 0x471   :  { %v1149_v3 = vpop.f32.mrf.mxu2 }
 0x473   :  { %v1253_v4 = vpop.f32.mrf.mxu1 }
 0x474   :  { %v1261_v5 = vpack.c.bf16 %v1253_v4, %v1251_v2  ;;  %v4939_v2 = vld [vmem:[%s6984_s7 + $0x1e4] sm:$0xf]  ;;  %v3988_v4 = vld [vmem:[%s6984_s7 + $0x1e8] sm:$0xf] }
 0x476   :  { %3861 = vmatmul.msk.bf16.vlgmr.msrb.gmra.mxu2 %vm535_vm4, %v1261_v5  ;;  %v4942_v5 = vld [vmem:[%s6984_s7 + $0x1f4] sm:$0xf0] }
 0x479   :  { %v1151_v6 = vpop.f32.mrf.mxu2 }
 0x47a   :  { %v1159_v7 = vpack.c.bf16 %v1151_v6, %v1149_v3  ;;  %v3982_v3 = vld [vmem:[%s6984_s7 + $0x1f0] sm:$0xf0] }
 0x47c   :  { %3833 = vmatmul.msk.bf16.vlgmr.msrb.gmra.mxu3 %vm535_vm4, %v1159_v7  ;;  %v3884_v7 = vld [vmem:[%s6984_s7 + $0x120] sm:$0xf] }
 0x481   :  { %v1154_v8 = vpop.f32.mrf.mxu2 }
 0x489   :  { %v1156_v9 = vpop.f32.mrf.mxu2 }
 0x48a   :  { %v1160_v10 = vpack.c.bf16 %v1156_v9, %v1154_v8  ;;  %v4917_v8 = vld [vmem:[%s6984_s7 + $0x12c] sm:$0xf0] }
 0x48c   :  { %3834 = vmatmul.msk.bf16.gmra.mxu3 %vm535_vm4, %v1160_v10  ;;  %v3985_v10 = vor.u32 %v4939_v2, %v3982_v3  ;;  %v4915_v2 = vld [vmem:[%s6984_s7 + $0x124] sm:$0xf]  ;;  %v3886_v3 = vld [vmem:[%s6984_s7 + $0x130] sm:$0xf0] }
 0x49c   :  { %3844 = vmatmul.msk.bf16.vlgmr.msra.gmra.mxu3 %vm422_vm3, %v4874_v11  ;;  %v3989_v11 = vor.u32 %v4942_v5, %v3988_v4  ;;  %v3892_v4 = vld [vmem:[%s6984_s7 + $0x128] sm:$0xf]  ;;  %v4918_v5 = vld [vmem:[%s6984_s7 + $0x134] sm:$0xf0] }
 0x4f9   :  { %v1310_v27 = vpop.f32.mrf.mxu2 }
 0x4ff   :  { %v1208_v12 = vpop.f32.mrf.mxu3 }
 0x500   :  { %v1218_v14 = vadd.f32 %v1208_v12, %v1116_v56  ;;  %v3917_v56 = vor.u32 %v4925_v50, %v3916_v33  ;;  %v4935_v12 = vld [vmem:[%s6984_s7 + $0x1c4] sm:$0xf]  ;;  %v3942_v33 = vld [vmem:[%s6984_s7 + $0x198] sm:$0xf0] }
 0x501   :  { %v1312_v32 = vpop.f32.mrf.mxu2 }
 0x502   :  { %v1320_v51 = vadd.f32 %v1310_v27, %v1218_v14  ;;  %1603 = vmatpush.bf16.msra.mxu2 %v3917_v56  ;;  %v3864_v14 = vld [vmem:[%s6983_s6 + $0x1] sm:$0x1]  ;;  %v1334_v27 = vld [vmem:[%s6983_s6] sm:$0x1]  ;;  %v4922_v56 = vld [vmem:[%s6984_s7 + $0x154] sm:$0xf0] }
 0x507   :  { %v1210_v15 = vpop.f32.mrf.mxu3 }
 0x508   :  { %v1219_v43 = vadd.f32 %v1210_v15, %v1117_v24  ;;  %v3966_v15 = vld [vmem:[%s6984_s7 + $0x1d0] sm:$0xf0]  ;;  %v4932_v24 = vld [vmem:[%s6984_s7 + $0x1ac] sm:$0xf] }
 0x509   :  { %v3969_v29 = vor.u32 %v4935_v12, %v3966_v15  ;;  %v3889_v12 = vor.u32 %v4915_v2, %v3886_v3  ;;  %v4911_v15 = vld [vmem:[%s6984_s7 + $0x104] sm:$0xf]  ;;  %v4900_v3 = vld [vmem:[%s6984_s7 + $0xac] sm:$0xf] }
 0x50a   :  { %v1321_v21 = vadd.f32 %v1312_v32, %v1219_v43  ;;  %v4931_v32 = vld [vmem:[%s6984_s7 + $0x1a4] sm:$0xf] }
 0x50b   :  { %v3953_v49 = vor.u32 %v4931_v32, %v3950_v34 }
 0x50c   :  { %v1324_v57 = vmax.f32 %v1320_v51, %v1321_v21  ;;  %v3961_v21 = vor.u32 %v4932_v24, %v3958_v38  ;;  %v4919_v51 = vld [vmem:[%s6984_s7 + $0x144] sm:$0xf] }
 0x50f   :  { %v1213_v16 = vpop.f32.mrf.mxu3 }
 0x510   :  { %v1220_v44 = vadd.f32 %v1213_v16, %v1118_v63  ;;  %v3901_v63 = vor.u32 %v4921_v61, %v3900_v60  ;;  %v3972_v16 = vld [vmem:[%s6984_s7 + $0x1c8] sm:$0xf]  ;;  %v4924_v60 = vld [vmem:[%s6984_s7 + $0x16c] sm:$0xf]  ;;  %v3926_v61 = vld [vmem:[%s6984_s7 + $0x178] sm:$0xf0] }
 0x512   :  { %1604 = vmatpush.bf16.msra.mxu2 %v3901_v63 }
 0x517   :  { %v1215_v20 = vpop.f32.mrf.mxu3 }
 0x518   :  { %v1221_v35 = vadd.f32 %v1215_v20, %v1119_v39  ;;  %v3885_v20 = vor.u32 %v4917_v8, %v3884_v7  ;;  %v3924_v39 = vld [vmem:[%s6984_s7 + $0x168] sm:$0xf]  ;;  %v4904_v7 = vld [vmem:[%s6984_s7 + $0xcc] sm:$0xf]  ;;  %v4102_v8 = vld [vmem:[%s6984_s7 + $0xd8] sm:$0xf0] }
 0x519   :  { %v3925_v50 = vor.u32 %v4926_v36, %v3924_v39 }
 0x51a   :  { %1605 = vmatpush.bf16.msra.mxu2 %v3885_v20  ;;  %v4914_v20 = vld [vmem:[%s6984_s7 + $0x114] sm:$0xf0] }
 0x51f   :  { %v1256_v19 = vpop.f32.mrf.mxu3 }
 0x527   :  { %v1258_v22 = vpop.f32.mrf.mxu3 }
 0x528   :  { %v1262_v17 = vpack.c.bf16 %v1258_v22, %v1256_v19  ;;  %v3868_v22 = vld [vmem:[%s6984_s7 + $0x100] sm:$0xf] }
 0x52a   :  { %3862 = vmatmul.msk.bf16.gmra.mxu2 %vm535_vm4, %v1262_v17  ;;  %v4913_v17 = vld [vmem:[%s6984_s7 + $0x10c] sm:$0xf0] }
 0x52b   :  { %v3869_v40 = vor.u32 %v4913_v17, %v3868_v22  ;;  %v4108_v22 = vld [vmem:[%s6984_s7 + $0xe0] sm:$0xf]  ;;  %v4909_v17 = vld [vmem:[%s6984_s7 + $0xec] sm:$0xf0] }
 0x52c   :  { %v4109_v0 = vor.u32 %v4909_v17, %v4108_v22  ;;  %v3998_v17 = vld [vmem:[%s6984_s7 + $0x10] sm:$0xf0] }
 0x52d   :  { %1606 = vmatpush.bf16.msra.mxu2 %v3869_v40  ;;  %v4092_v40 = vld [vmem:[%s6984_s7 + $0xc0] sm:$0xf] }
 0x531   :  { %1638 = vmatpush.bf16.msrb.mxu2 %v3993_v23  ;;  %v4905_v23 = vld [vmem:[%s6984_s7 + $0xcc] sm:$0xf0] }
 0x535   :  { %1639 = vmatpush.bf16.msrb.mxu2 %v3977_v41  ;;  %v4078_v41 = vld [vmem:[%s6984_s7 + $0xb0] sm:$0xf0] }
 0x539   :  { %1640 = vmatpush.bf16.msrb.mxu2 %v3961_v21  ;;  %v4044_v21 = vld [vmem:[%s6984_s7 + $0x60] sm:$0xf] }
 0x5ad   :  { %v1315_v30 = vpop.f32.mrf.mxu2 }
 0x5ae   :  { %v1322_v52 = vadd.f32 %v1315_v30, %v1220_v44  ;;  %v4938_v44 = vld [vmem:[%s6984_s7 + $0x1d4] sm:$0xf0] }
 0x5af   :  { %v3973_v13 = vor.u32 %v4938_v44, %v3972_v16  ;;  %v4930_v30 = vld [vmem:[%s6984_s7 + $0x194] sm:$0xf0]  ;;  %v3870_v16 = vld [vmem:[%s6984_s7 + $0x110] sm:$0xf0]  ;;  %v3876_v44 = vld [vmem:[%s6984_s7 + $0x108] sm:$0xf] }
 0x5b0   :  { %v3941_v43 = vor.u32 %v4930_v30, %v3940_v45  ;;  %v3873_v32 = vor.u32 %v4911_v15, %v3870_v16  ;;  %v3877_v34 = vor.u32 %v4914_v20, %v3876_v44  ;;  %v4901_v45 = vld [vmem:[%s6984_s7 + $0xac] sm:$0xf0]  ;;  %v4899_v30 = vld [vmem:[%s6984_s7 + $0xa4] sm:$0xf]  ;;  %v3996_v15 = vld [vmem:[%s6984_s7] sm:$0xf] }
 0x5b1   :  { %v4077_v24 = vor.u32 %v4901_v45, %v4076_v25  ;;  %v4081_v38 = vor.u32 %v4899_v30, %v4078_v41  ;;  %v4881_v16 = vld [vmem:[%s6984_s7 + $0xc] sm:$0xf0]  ;;  %v4879_v44 = vld [vmem:[%s6984_s7 + $0x4] sm:$0xf]  ;;  %v4222_v30 = vld [vmem:[%s6984_s7 + $0x2c0] sm:$0xf] }
 0x5b2   :  { %v3997_v22 = vor.u32 %v4881_v16, %v3996_v15  ;;  %v4969_v41 = vld [vmem:[%s6984_s7 + $0x2cc] sm:$0xf0]  ;;  %v4126_v16 = vld [vmem:[%s6984_s7 + $0x200] sm:$0xf] }
 0x5b5   :  { %v1317_v48 = vpop.f32.mrf.mxu2 }
 0x5b6   :  { %v1323_v54 = vadd.f32 %v1317_v48, %v1221_v35  ;;  %v4928_v35 = vld [vmem:[%s6984_s7 + $0x18c] sm:$0xf]  ;;  %v3921_v48 = vor.u32 %v4923_v26, %v3918_v31  ;;  %v4895_v26 = vld [vmem:[%s6984_s7 + $0x84] sm:$0xf]  ;;  %v4062_v31 = vld [vmem:[%s6984_s7 + $0x90] sm:$0xf0] }
 0x5b7   :  { %v4065_v36 = vor.u32 %v4895_v26, %v4062_v31  ;;  %v4206_v26 = vld [vmem:[%s6984_s7 + $0x2a0] sm:$0xf]  ;;  %v4965_v31 = vld [vmem:[%s6984_s7 + $0x2ac] sm:$0xf0] }
 0x5b8   :  { %v1325_v58 = vmax.f32 %v1322_v52, %v1323_v54  ;;  %v3902_v52 = vld [vmem:[%s6984_s7 + $0x150] sm:$0xf0]  ;;  %v3908_v54 = vld [vmem:[%s6984_s7 + $0x148] sm:$0xf] }
 0x5b9   :  { %v3905_v63 = vor.u32 %v4919_v51, %v3902_v52  ;;  %v4028_v52 = vld [vmem:[%s6984_s7 + $0x40] sm:$0xf] }
 0x5ba   :  { %v1326_v62 = vmax.f32 %v1324_v57, %v1325_v58  ;;  %v3945_v57 = vor.u32 %v4928_v35, %v3942_v33  ;;  %v4908_v58 = vld [vmem:[%s6984_s7 + $0xec] sm:$0xf]  ;;  %v4893_v35 = vld [vmem:[%s6984_s7 + $0x6c] sm:$0xf0]  ;;  %v4891_v33 = vld [vmem:[%s6984_s7 + $0x64] sm:$0xf] }
 0x5bc   :  { %v1331_v1 = vadd.f32 %v5118_v59, %v1326_v62  ;;  %v4118_v59 = vld [vmem:[%s6984_s7 + $0xf8] sm:$0xf0]  ;;  %1641 = vmatpush.bf16.msrb.mxu2 %v3945_v57  ;;  %v4030_v57 = vld [vmem:[%s6984_s7 + $0x50] sm:$0xf0] }
 0x5bd   :  { %v4121_v62 = vor.u32 %v4908_v58, %v4118_v59 }
 0x5be   :  { %v1332_v6 = vmax.f32 %v1331_v1, 0.0  ;;  %v3909_v1 = vor.u32 %v4922_v56, %v3908_v54  ;;  %v4889_v54 = vld [vmem:[%s6984_s7 + $0x4c] sm:$0xf0]  ;;  %v4887_v56 = vld [vmem:[%s6984_s7 + $0x44] sm:$0xf] }
 0x5bf   :  { %1850 = vmatpush.bf16.msrb.mxu0 %v4121_v62  ;;  %v4029_v58 = vor.u32 %v4889_v54, %v4028_v52  ;;  %v4033_v59 = vor.u32 %v4887_v56, %v4030_v57  ;;  %v4883_v62 = vld [vmem:[%s6984_s7 + $0x24] sm:$0xf]  ;;  %v4961_v52 = vld [vmem:[%s6984_s7 + $0x28c] sm:$0xf0]  ;;  %v4068_v54 = vld [vmem:[%s6984_s7 + $0x88] sm:$0xf] }
 0x5c0   :  { %v1333_v9 = vpack.c.bf16 %v1332_v6, %v1332_v6  ;;  %v3929_v6 = vor.u32 %v4924_v60, %v3926_v61  ;;  %v4012_v60 = vld [vmem:[%s6984_s7 + $0x20] sm:$0xf]  ;;  %v4885_v61 = vld [vmem:[%s6984_s7 + $0x2c] sm:$0xf0]  ;;  %v4898_v56 = vld [vmem:[%s6984_s7 + $0x94] sm:$0xf0] }
 0x5c2   :  { %v5705_v19 = vsel %vm429_vm2, %v1333_v9, 0  ;;  %v4920_v9 = vld [vmem:[%s6984_s7 + $0x14c] sm:$0xf]  ;;  %1642 = vmatpush.bf16.msrb.mxu2 %v3929_v6 }
 0x5c3   :  { %1349 = vmatpush.bf16.msrb.mxu3 %v5705_v19  ;;  %1400 = vmatpush.bf16.msra.mxu1 %v5705_v19  ;;  %v4896_v6 = vld [vmem:[%s6984_s7 + $0x8c] sm:$0xf] }
 0x5c6   :  { %3865 = vmatmul.msk.bf16.vlgmr.msra.gmra.mxu1 %vm1335_vm5, %v3864_v14  ;;  %3863 = vmatmul.msk.bf16.vlgmr.msrb.gmra.mxu3 %vm1335_vm5, %v1334_v27  ;;  %v3893_v14 = vor.u32 %v4918_v5, %v3892_v4  ;;  %v4907_v27 = vld [vmem:[%s6984_s7 + $0xe4] sm:$0xf]  ;;  %v4086_v4 = vld [vmem:[%s6984_s7 + $0xb8] sm:$0xf0] }
 0x5c7   :  { %1612 = vmatpush.bf16.msra.mxu3 %v3985_v10  ;;  %1625 = vmatpush.bf16.msrb.mxu1 %v3989_v11  ;;  %v3910_v10 = vld [vmem:[%s6984_s7 + $0x158] sm:$0xf0]  ;;  %v4105_v11 = vor.u32 %v4904_v7, %v4102_v8  ;;  %v4113_v37 = vor.u32 %v4907_v27, %v4110_v18  ;;  %v4089_v5 = vor.u32 %v4900_v3, %v4086_v4  ;;  %v4912_v27 = vld [vmem:[%s6984_s7 + $0x10c] sm:$0xf]  ;;  %v4158_v3 = vld [vmem:[%s6984_s7 + $0x240] sm:$0xf] }
 0x5c8   :  { %v3913_v28 = vor.u32 %v4920_v9, %v3910_v10  ;;  %v4070_v7 = vld [vmem:[%s6984_s7 + $0x98] sm:$0xf0]  ;;  %v4892_v9 = vld [vmem:[%s6984_s7 + $0x6c] sm:$0xf]  ;;  %v4953_v4 = vld [vmem:[%s6984_s7 + $0x24c] sm:$0xf0] }
 0x5c9   :  { %1851 = vmatpush.bf16.msrb.mxu0 %v4105_v11  ;;  %v4073_v8 = vor.u32 %v4896_v6, %v4070_v7  ;;  %v4054_v10 = vld [vmem:[%s6984_s7 + $0x78] sm:$0xf0]  ;;  %v4890_v6 = vld [vmem:[%s6984_s7 + $0x54] sm:$0xf0]  ;;  %v4159_v7 = vor.u32 %v4953_v4, %v4158_v3  ;;  %v4951_v3 = vld [vmem:[%s6984_s7 + $0x244] sm:$0xf] }
 0x5ca   :  { %1643 = vmatpush.bf16.msrb.mxu2 %v3913_v28  ;;  %v4057_v11 = vor.u32 %v4892_v9, %v4054_v10  ;;  %v3878_v18 = vld [vmem:[%s6984_s7 + $0x118] sm:$0xf0]  ;;  %v4001_v28 = vor.u32 %v4879_v44, %v3998_v17  ;;  %v4142_v9 = vld [vmem:[%s6984_s7 + $0x220] sm:$0xf]  ;;  %v4949_v10 = vld [vmem:[%s6984_s7 + $0x22c] sm:$0xf0] }
 0x5cb   :  { %1613 = vmatpush.bf16.msra.mxu3 %v3969_v29  ;;  %1626 = vmatpush.bf16.msrb.mxu1 %v3973_v13  ;;  %v4916_v29 = vld [vmem:[%s6984_s7 + $0x12c] sm:$0xf]  ;;  %v3894_v13 = vld [vmem:[%s6984_s7 + $0x138] sm:$0xf0]  ;;  %v4945_v44 = vld [vmem:[%s6984_s7 + $0x20c] sm:$0xf0] }
 0x5cc   :  { %v4127_v17 = vor.u32 %v4945_v44, %v4126_v16  ;;  %v4160_v4 = vld [vmem:[%s6984_s7 + $0x250] sm:$0xf0]  ;;  %v4950_v44 = vld [vmem:[%s6984_s7 + $0x234] sm:$0xf0] }
 0x5cd   :  { %1852 = vmatpush.bf16.msrb.mxu0 %v4089_v5  ;;  %v4036_v5 = vld [vmem:[%s6984_s7 + $0x48] sm:$0xf] }
 0x5cf   :  { %1614 = vmatpush.bf16.msra.mxu3 %v3953_v49  ;;  %1627 = vmatpush.bf16.msrb.mxu1 %v3957_v53  ;;  %v3897_v49 = vor.u32 %v4916_v29, %v3894_v13  ;;  %v4093_v53 = vor.u32 %v4905_v23, %v4092_v40  ;;  %v3881_v29 = vor.u32 %v4912_v27, %v3878_v18  ;;  %v4884_v13 = vld [vmem:[%s6984_s7 + $0x2c] sm:$0xf]  ;;  %v4238_v23 = vld [vmem:[%s6984_s7 + $0x2e0] sm:$0xf] }
 0x5d0   :  { %v4239_v25 = vor.u32 %v4973_v46, %v4238_v23  ;;  %v4122_v18 = vld [vmem:[%s6983_s6 + $0x2] sm:$0x1]  ;;  %v4967_v23 = vld [vmem:[%s6984_s7 + $0x2c4] sm:$0xf]  ;;  %v4224_v46 = vld [vmem:[%s6984_s7 + $0x2d0] sm:$0xf0] }
 0x5d1   :  { %1644 = vmatpush.bf16.msrb.mxu2 %v3897_v49  ;;  %1853 = vmatpush.bf16.msrb.mxu0 %v4073_v8  ;;  %v4910_v49 = vld [vmem:[%s6984_s7 + $0xf4] sm:$0xf0]  ;;  %v4037_v8 = vor.u32 %v4890_v6, %v4036_v5  ;;  %v4166_v5 = vld [vmem:[%s6984_s7 + $0x248] sm:$0xf]  ;;  %v4163_v6 = vor.u32 %v4951_v3, %v4160_v4  ;;  %v4995_v3 = vld [vmem:[%s6984_s7 + $0x3a4] sm:$0xf] }
 0x5d2   :  { %v4117_v45 = vor.u32 %v4910_v49, %v4116_v47  ;;  %v4230_v47 = vld [vmem:[%s6984_s7 + $0x2c8] sm:$0xf]  ;;  %v4227_v49 = vor.u32 %v4967_v23, %v4224_v46  ;;  %v4338_v4 = vld [vmem:[%s6984_s7 + $0x3b0] sm:$0xf0] }
 0x5d3   :  { %1615 = vmatpush.bf16.msra.mxu3 %v3937_v42  ;;  %1628 = vmatpush.bf16.msrb.mxu1 %v3941_v43  ;;  %v4060_v42 = vld [vmem:[%s6984_s7 + $0x80] sm:$0xf]  ;;  %v4897_v43 = vld [vmem:[%s6984_s7 + $0x8c] sm:$0xf0] }
 0x5d4   :  { %v4061_v39 = vor.u32 %v4897_v43, %v4060_v42  ;;  %v4223_v42 = vor.u32 %v4969_v41, %v4222_v30  ;;  %v4963_v41 = vld [vmem:[%s6984_s7 + $0x2a4] sm:$0xf] }
 0x5d5   :  { %1854 = vmatpush.bf16.msrb.mxu0 %v4057_v11  ;;  %1645 = vmatpush.bf16.msrb.mxu2 %v3881_v29  ;;  %v4020_v11 = vld [vmem:[%s6984_s7 + $0x28] sm:$0xf]  ;;  %v4240_v29 = vld [vmem:[%s6984_s7 + $0x2f0] sm:$0xf0] }
 0x5d7   :  { %1616 = vmatpush.bf16.msra.mxu3 %v3921_v48  ;;  %1629 = vmatpush.bf16.msrb.mxu1 %v3925_v50  ;;  %v4046_v48 = vld [vmem:[%s6984_s7 + $0x70] sm:$0xf0]  ;;  %v4045_v50 = vor.u32 %v4893_v35, %v4044_v21 }
 0x5d8   :  { %v4049_v51 = vor.u32 %v4891_v33, %v4046_v48  ;;  %v4207_v48 = vor.u32 %v4965_v31, %v4206_v26  ;;  %v4964_v26 = vld [vmem:[%s6984_s7 + $0x2ac] sm:$0xf]  ;;  %v4216_v31 = vld [vmem:[%s6984_s7 + $0x2b8] sm:$0xf0] }
 0x5db   :  { %1617 = vmatpush.bf16.msra.mxu3 %v3905_v63  ;;  %1630 = vmatpush.bf16.msrb.mxu1 %v3909_v1  ;;  %v4014_v63 = vld [vmem:[%s6984_s7 + $0x30] sm:$0xf0]  ;;  %v4013_v1 = vor.u32 %v4885_v61, %v4012_v60  ;;  %v4957_v60 = vld [vmem:[%s6984_s7 + $0x26c] sm:$0xf0]  ;;  %v4052_v61 = vld [vmem:[%s6984_s7 + $0x68] sm:$0xf] }
 0x5dc   :  { %v4017_v2 = vor.u32 %v4883_v62, %v4014_v63  ;;  %v4894_v62 = vld [vmem:[%s6984_s7 + $0x74] sm:$0xf0] }
 0x5df   :  { %1618 = vmatpush.bf16.msra.mxu3 %v3889_v12  ;;  %1631 = vmatpush.bf16.msrb.mxu1 %v3893_v14  ;;  %v4888_v12 = vld [vmem:[%s6984_s7 + $0x4c] sm:$0xf]  ;;  %v4038_v14 = vld [vmem:[%s6984_s7 + $0x58] sm:$0xf0] }
 0x5e0   :  { %v4041_v20 = vor.u32 %v4888_v12, %v4038_v14  ;;  %v4886_v12 = vld [vmem:[%s6984_s7 + $0x34] sm:$0xf0]  ;;  %v4143_v14 = vor.u32 %v4949_v10, %v4142_v9  ;;  %v4168_v9 = vld [vmem:[%s6984_s7 + $0x258] sm:$0xf0] }
 0x5e1   :  { %v4021_v15 = vor.u32 %v4886_v12, %v4020_v11  ;;  %v4947_v12 = vld [vmem:[%s6984_s7 + $0x224] sm:$0xf] }
 0x5e2   :  { %1855 = vmatpush.bf16.msrb.mxu0 %v4041_v20  ;;  %v4004_v20 = vld [vmem:[%s6984_s7 + $0x8] sm:$0xf] }
 0x5e3   :  { %1619 = vmatpush.bf16.msra.mxu3 %v3873_v32  ;;  %1632 = vmatpush.bf16.msrb.mxu1 %v3877_v34  ;;  %v4022_v32 = vld [vmem:[%s6984_s7 + $0x38] sm:$0xf0] }
 0x5e4   :  { %v4025_v34 = vor.u32 %v4884_v13, %v4022_v32  ;;  %v4246_v13 = vld [vmem:[%s6984_s7 + $0x2e8] sm:$0xf] }
 0x5e6   :  { %1856 = vmatpush.bf16.msrb.mxu0 %v4025_v34  ;;  %v4972_v34 = vld [vmem:[%s6984_s7 + $0x2ec] sm:$0xf] }
 0x5e7   :  { %1811 = vmatpush.bf16.msrb.mxu3 %v4109_v0  ;;  %1824 = vmatpush.bf16.msra.mxu1 %v4113_v37  ;;  %v4880_v0 = vld [vmem:[%s6984_s7 + $0xc] sm:$0xf]  ;;  %v4006_v37 = vld [vmem:[%s6984_s7 + $0x18] sm:$0xf0] }
 0x5e8   :  { %v4009_v40 = vor.u32 %v4880_v0, %v4006_v37  ;;  %v4248_v0 = vld [vmem:[%s6984_s7 + $0x2f8] sm:$0xf0] }
 0x5ea   :  { %1857 = vmatpush.bf16.msrb.mxu0 %v4009_v40  ;;  %v4251_v40 = vor.u32 %v4972_v34, %v4248_v0  ;;  %v4946_v0 = vld [vmem:[%s6984_s7 + $0x214] sm:$0xf0] }
 0x5eb   :  { %1812 = vmatpush.bf16.msrb.mxu3 %v4093_v53  ;;  %1825 = vmatpush.bf16.msra.mxu1 %v4097_v55 }
 0x5ee   :  { %2113 = vmatpush.bf16.msra.mxu0 %v4251_v40  ;;  %v4136_v40 = vld [vmem:[%s6984_s7 + $0x218] sm:$0xf0] }
 0x5ef   :  { %1813 = vmatpush.bf16.msrb.mxu3 %v4077_v24  ;;  %1826 = vmatpush.bf16.msra.mxu1 %v4081_v38  ;;  %v4100_v24 = vld [vmem:[%s6984_s7 + $0xc8] sm:$0xf]  ;;  %v4906_v38 = vld [vmem:[%s6984_s7 + $0xd4] sm:$0xf0] }
 0x5f0   :  { %v4101_v43 = vor.u32 %v4906_v38, %v4100_v24  ;;  %v4208_v24 = vld [vmem:[%s6984_s7 + $0x2b0] sm:$0xf0]  ;;  %v4214_v38 = vld [vmem:[%s6984_s7 + $0x2a8] sm:$0xf] }
 0x5f3   :  { %1814 = vmatpush.bf16.msrb.mxu3 %v4061_v39  ;;  %1827 = vmatpush.bf16.msra.mxu1 %v4065_v36  ;;  %v4084_v39 = vld [vmem:[%s6984_s7 + $0xa8] sm:$0xf]  ;;  %v4902_v36 = vld [vmem:[%s6984_s7 + $0xb4] sm:$0xf0] }
 0x5f7   :  { %1815 = vmatpush.bf16.msrb.mxu3 %v4045_v50  ;;  %1828 = vmatpush.bf16.msra.mxu1 %v4049_v51  ;;  %v4085_v50 = vor.u32 %v4902_v36, %v4084_v39  ;;  %v4190_v51 = vld [vmem:[%s6984_s7 + $0x280] sm:$0xf]  ;;  %v4219_v36 = vor.u32 %v4964_v26, %v4216_v31  ;;  %v5005_v31 = vld [vmem:[%s6984_s7 + $0x3ec] sm:$0xf0] }
 0x5f8   :  { %v4191_v57 = vor.u32 %v4961_v52, %v4190_v51  ;;  %v4960_v51 = vld [vmem:[%s6984_s7 + $0x28c] sm:$0xf]  ;;  %v4200_v52 = vld [vmem:[%s6984_s7 + $0x298] sm:$0xf0]  ;;  %v4368_v26 = vld [vmem:[%s6984_s7 + $0x3e0] sm:$0xf] }
 0x5fb   :  { %1816 = vmatpush.bf16.msrb.mxu3 %v4029_v58  ;;  %1829 = vmatpush.bf16.msra.mxu1 %v4033_v59  ;;  %v4069_v58 = vor.u32 %v4898_v56, %v4068_v54  ;;  %v4174_v59 = vld [vmem:[%s6984_s7 + $0x260] sm:$0xf]  ;;  %v4203_v56 = vor.u32 %v4960_v51, %v4200_v52  ;;  %v5001_v52 = vld [vmem:[%s6984_s7 + $0x3cc] sm:$0xf0] }
 0x5ff   :  { %1817 = vmatpush.bf16.msrb.mxu3 %v4013_v1  ;;  %1830 = vmatpush.bf16.msra.mxu1 %v4017_v2  ;;  %v4175_v1 = vor.u32 %v4957_v60, %v4174_v59  ;;  %v4053_v2 = vor.u32 %v4894_v62, %v4052_v61  ;;  %v4182_v59 = vld [vmem:[%s6984_s7 + $0x268] sm:$0xf]  ;;  %v4958_v61 = vld [vmem:[%s6984_s7 + $0x274] sm:$0xf0]  ;;  %v4956_v62 = vld [vmem:[%s6984_s7 + $0x26c] sm:$0xf] }
 0x603   :  { %1818 = vmatpush.bf16.msrb.mxu3 %v3997_v22  ;;  %1831 = vmatpush.bf16.msra.mxu1 %v4001_v28  ;;  %v4882_v22 = vld [vmem:[%s6984_s7 + $0x14] sm:$0xf0]  ;;  %v4971_v28 = vld [vmem:[%s6984_s7 + $0x2e4] sm:$0xf] }
 0x604   :  { %v4005_v27 = vor.u32 %v4882_v22, %v4004_v20  ;;  %v4243_v32 = vor.u32 %v4971_v28, %v4240_v29  ;;  %v4948_v20 = vld [vmem:[%s6984_s7 + $0x22c] sm:$0xf]  ;;  %v4152_v22 = vld [vmem:[%s6984_s7 + $0x238] sm:$0xf0]  ;;  %v4943_v28 = vld [vmem:[%s6984_s7 + $0x204] sm:$0xf] }
 0x605   :  { %v4128_v29 = vld [vmem:[%s6984_s7 + $0x210] sm:$0xf0] }
 0x606   :  { %v4131_v34 = vor.u32 %v4943_v28, %v4128_v29 }
 0x643   :  { %v1402_v53 = vpop.f32.mrf.mxu1 }
 0x644   :  { %v1406_v55 = vpack.c.bf16 %v1402_v53, %v1402_v53  ;;  %v4970_v53 = vld [vmem:[%s6984_s7 + $0x2d4] sm:$0xf0] }
 0x646   :  { %1607 = vmatmul.bf16.vlgmr.msra.gmra.mxu2 %v1406_v55  ;;  %1620 = vmatmul.bf16.vlgmr.msra.gmra.mxu3 %v1406_v55 }
 0x647   :  { %1633 = vmatmul.bf16.vlgmr.msrb.gmra.mxu1 %v1406_v55  ;;  %1875 = vmatpush.bf16.msra.mxu3 %v5705_v19 }
 0x648   :  { %2074 = vmatpush.bf16.msrb.mxu1 %v4239_v25  ;;  %1837 = vmatpush.bf16.msra.mxu2 %v4117_v45  ;;  %v4232_v25 = vld [vmem:[%s6984_s7 + $0x2d8] sm:$0xf0]  ;;  %v4231_v45 = vor.u32 %v4970_v53, %v4230_v47 }
 0x649   :  { %v1351_v21 = vpop.f32.mrf.mxu3 }
 0x64a   :  { %v1355_v35 = vpack.c.bf16 %v1351_v21, %v1351_v21  ;;  %v4959_v21 = vld [vmem:[%s6984_s7 + $0x284] sm:$0xf] }
 0x64b   :  { %v1404_v33 = vpop.f32.mrf.mxu1 }
 0x64c   :  { %2075 = vmatpush.bf16.msrb.mxu1 %v4223_v42  ;;  %1838 = vmatpush.bf16.msra.mxu2 %v4101_v43  ;;  %v4211_v42 = vor.u32 %v4963_v41, %v4208_v24  ;;  %v4966_v43 = vld [vmem:[%s6984_s7 + $0x2b4] sm:$0xf0]  ;;  %v4198_v33 = vld [vmem:[%s6984_s7 + $0x288] sm:$0xf] }
 0x64d   :  { %1858 = vmatmul.bf16.vlgmr.msrb.gmra.mxu0 %v1355_v35  ;;  %v4215_v39 = vor.u32 %v4966_v43, %v4214_v38 }
 0x650   :  { %2076 = vmatpush.bf16.msrb.mxu1 %v4207_v48  ;;  %1839 = vmatpush.bf16.msra.mxu2 %v4085_v50  ;;  %v4962_v50 = vld [vmem:[%s6984_s7 + $0x294] sm:$0xf0] }
 0x651   :  { %v1353_v63 = vpop.f32.mrf.mxu3  ;;  %v4199_v54 = vor.u32 %v4962_v50, %v4198_v33  ;;  %v5004_v33 = vld [vmem:[%s6984_s7 + $0x3ec] sm:$0xf]  ;;  %v4352_v50 = vld [vmem:[%s6984_s7 + $0x3c0] sm:$0xf] }
 0x652   :  { %v4184_v63 = vld [vmem:[%s6984_s7 + $0x278] sm:$0xf0] }
 0x654   :  { %2077 = vmatpush.bf16.msrb.mxu1 %v4191_v57  ;;  %1840 = vmatpush.bf16.msra.mxu2 %v4069_v58  ;;  %v4955_v57 = vld [vmem:[%s6984_s7 + $0x264] sm:$0xf]  ;;  %v4176_v58 = vld [vmem:[%s6984_s7 + $0x270] sm:$0xf0] }
 0x655   :  { %v4179_v60 = vor.u32 %v4955_v57, %v4176_v58  ;;  %v4353_v57 = vor.u32 %v5001_v52, %v4352_v50  ;;  %v4288_v50 = vld [vmem:[%s6984_s7 + $0x340] sm:$0xf]  ;;  %v4983_v52 = vld [vmem:[%s6984_s7 + $0x344] sm:$0xf] }
 0x656   :  { %1646 = vmatmul.bf16.vlgmr.msrb.gmra.mxu2 %v1406_v55  ;;  %1819 = vmatmul.bf16.vlgmr.msrb.gmra.mxu3 %v1355_v35  ;;  %v4968_v55 = vld [vmem:[%s6984_s7 + $0x2cc] sm:$0xf] }
 0x657   :  { %1832 = vmatmul.bf16.vlgmr.msra.gmra.mxu1 %v1355_v35  ;;  %v4235_v30 = vor.u32 %v4968_v55, %v4232_v25 }
 0x658   :  { %2078 = vmatpush.bf16.msrb.mxu1 %v4175_v1  ;;  %1841 = vmatpush.bf16.msra.mxu2 %v4053_v2  ;;  %v4183_v1 = vor.u32 %v4958_v61, %v4182_v59  ;;  %v4187_v2 = vor.u32 %v4956_v62, %v4184_v63  ;;  %v5000_v59 = vld [vmem:[%s6984_s7 + $0x3cc] sm:$0xf]  ;;  %v4362_v62 = vld [vmem:[%s6984_s7 + $0x3d8] sm:$0xf0]  ;;  %v4336_v63 = vld [vmem:[%s6984_s7 + $0x3a0] sm:$0xf] }
 0x659   :  { %2114 = vmatpush.bf16.msra.mxu0 %v4235_v30 }
 0x65c   :  { %2079 = vmatpush.bf16.msrb.mxu1 %v4159_v7  ;;  %1842 = vmatpush.bf16.msra.mxu2 %v4037_v8  ;;  %v4954_v7 = vld [vmem:[%s6984_s7 + $0x254] sm:$0xf0]  ;;  %v4952_v8 = vld [vmem:[%s6984_s7 + $0x24c] sm:$0xf] }
 0x65d   :  { %2115 = vmatpush.bf16.msra.mxu0 %v4219_v36  ;;  %v4167_v10 = vor.u32 %v4954_v7, %v4166_v5  ;;  %v4171_v11 = vor.u32 %v4952_v8, %v4168_v9  ;;  %v4369_v36 = vor.u32 %v5005_v31, %v4368_v26  ;;  %v4346_v7 = vld [vmem:[%s6984_s7 + $0x3b8] sm:$0xf0]  ;;  %v4341_v8 = vor.u32 %v4995_v3, %v4338_v4  ;;  %v4306_v26 = vld [vmem:[%s6984_s7 + $0x370] sm:$0xf0]  ;;  %v4312_v31 = vld [vmem:[%s6984_s7 + $0x368] sm:$0xf] }
 0x65e   :  { %v4979_v3 = vld [vmem:[%s6984_s7 + $0x324] sm:$0xf]  ;;  %v4274_v4 = vld [vmem:[%s6984_s7 + $0x330] sm:$0xf0] }
 0x660   :  { %2080 = vmatpush.bf16.msrb.mxu1 %v4143_v14  ;;  %1843 = vmatpush.bf16.msra.mxu2 %v4021_v15  ;;  %v4144_v14 = vld [vmem:[%s6984_s7 + $0x230] sm:$0xf0]  ;;  %v4150_v15 = vld [vmem:[%s6984_s7 + $0x228] sm:$0xf] }
 0x661   :  { %2116 = vmatpush.bf16.msra.mxu0 %v4203_v56  ;;  %v4147_v16 = vor.u32 %v4947_v12, %v4144_v14  ;;  %v4354_v56 = vld [vmem:[%s6984_s7 + $0x3d0] sm:$0xf0] }
 0x664   :  { %2081 = vmatpush.bf16.msrb.mxu1 %v4127_v17  ;;  %1844 = vmatpush.bf16.msra.mxu2 %v4005_v27  ;;  %v4151_v27 = vor.u32 %v4950_v44, %v4150_v15 }
 0x665   :  { %2117 = vmatpush.bf16.msra.mxu0 %v4187_v2  ;;  %v4365_v2 = vor.u32 %v5000_v59, %v4362_v62  ;;  %v4298_v62 = vld [vmem:[%s6984_s7 + $0x358] sm:$0xf0] }
 0x666   :  { %4123 = vmatmul.msk.bf16.vlgmr.msra.gmra.mxu3 %vm1335_vm5, %v4122_v18  ;;  %v4155_v18 = vor.u32 %v4948_v20, %v4152_v22  ;;  %v4360_v20 = vld [vmem:[%s6984_s7 + $0x3c8] sm:$0xf]  ;;  %v5002_v22 = vld [vmem:[%s6984_s7 + $0x3d4] sm:$0xf0] }
 0x667   :  { %1845 = vmatmul.bf16.vlgmr.msra.gmra.mxu2 %v1355_v35  ;;  %v4192_v35 = vld [vmem:[%s6984_s7 + $0x290] sm:$0xf0] }
 0x668   :  { %2142 = vmatpush.bf16.msra.mxu1 %v5705_v19  ;;  %v4974_v19 = vld [vmem:[%s6984_s7 + $0x2f4] sm:$0xf0]  ;;  %2087 = vmatpush.bf16.msrb.mxu2 %v4243_v32  ;;  %v4195_v48 = vor.u32 %v4959_v21, %v4192_v35  ;;  %v4370_v21 = vld [vmem:[%s6984_s7 + $0x3f0] sm:$0xf0] }
 0x669   :  { %v4247_v37 = vor.u32 %v4974_v19, %v4246_v13  ;;  %2118 = vmatpush.bf16.msra.mxu0 %v4171_v11  ;;  %v4134_v13 = vld [vmem:[%s6984_s7 + $0x208] sm:$0xf]  ;;  %v5006_v11 = vld [vmem:[%s6984_s7 + $0x3f4] sm:$0xf0] }
 0x66a   :  { %v4135_v46 = vor.u32 %v4946_v0, %v4134_v13  ;;  %v4991_v0 = vld [vmem:[%s6984_s7 + $0x384] sm:$0xf] }
 0x66b   :  { %2100 = vmatpush.bf16.msrb.mxu3 %v4247_v37  ;;  %v4944_v37 = vld [vmem:[%s6984_s7 + $0x20c] sm:$0xf] }
 0x66c   :  { %2088 = vmatpush.bf16.msrb.mxu2 %v4227_v49  ;;  %v4139_v47 = vor.u32 %v4944_v37, %v4136_v40  ;;  %v4322_v40 = vld [vmem:[%s6984_s7 + $0x390] sm:$0xf0] }
 0x66d   :  { %2119 = vmatpush.bf16.msra.mxu0 %v4155_v18  ;;  %v4344_v18 = vld [vmem:[%s6984_s7 + $0x3a8] sm:$0xf] }
 0x66f   :  { %2101 = vmatpush.bf16.msrb.mxu3 %v4231_v45 }
 0x670   :  { %2089 = vmatpush.bf16.msrb.mxu2 %v4211_v42 }
 0x671   :  { %2120 = vmatpush.bf16.msra.mxu0 %v4139_v47  ;;  %v4325_v47 = vor.u32 %v4991_v0, %v4322_v40  ;;  %v5022_v0 = vld [vmem:[%s6986_s9 + $0x78] sm:$0xff]  ;;  %v5013_v40 = vld [vmem:[%s6986_s9 + $0x30] sm:$0xff] }
 0x673   :  { %2102 = vmatpush.bf16.msrb.mxu3 %v4215_v39  ;;  %v5003_v39 = vld [vmem:[%s6984_s7 + $0x3e4] sm:$0xf] }
 0x674   :  { %2090 = vmatpush.bf16.msrb.mxu2 %v4195_v48  ;;  %v4373_v35 = vor.u32 %v5003_v39, %v4370_v21  ;;  %v4378_v48 = vld [vmem:[%s6984_s7 + $0x3f8] sm:$0xf0]  ;;  %v4990_v39 = vld [vmem:[%s6984_s7 + $0x374] sm:$0xf0] }
 0x675   :  { %v4381_v51 = vor.u32 %v5004_v33, %v4378_v48  ;;  %v4313_v21 = vor.u32 %v4990_v39, %v4312_v31  ;;  %v4314_v33 = vld [vmem:[%s6984_s7 + $0x378] sm:$0xf0] }
 0x677   :  { %2103 = vmatpush.bf16.msrb.mxu3 %v4199_v54  ;;  %v4999_v54 = vld [vmem:[%s6984_s7 + $0x3c4] sm:$0xf]  ;;  %2380 = vmatpush.bf16.msrb.mxu0 %v4381_v51  ;;  %v4985_v51 = vld [vmem:[%s6984_s7 + $0x34c] sm:$0xf0] }
 0x678   :  { %2091 = vmatpush.bf16.msrb.mxu2 %v4179_v60  ;;  %v4357_v58 = vor.u32 %v4999_v54, %v4354_v56  ;;  %v4289_v54 = vor.u32 %v4985_v51, %v4288_v50  ;;  %v4290_v56 = vld [vmem:[%s6984_s7 + $0x350] sm:$0xf0] }
 0x679   :  { %v4293_v59 = vor.u32 %v4983_v52, %v4290_v56  ;;  %v5018_v52 = vld [vmem:[%s6986_s9 + $0x58] sm:$0xff]  ;;  %v5009_v56 = vld [vmem:[%s6986_s9 + $0x10] sm:$0xff] }
 0x67b   :  { %2104 = vmatpush.bf16.msrb.mxu3 %v4183_v1  ;;  %v4997_v1 = vld [vmem:[%s6984_s7 + $0x3ac] sm:$0xf0]  ;;  %2381 = vmatpush.bf16.msrb.mxu0 %v4365_v2 }
 0x67c   :  { %2092 = vmatpush.bf16.msrb.mxu2 %v4163_v6  ;;  %v4337_v5 = vor.u32 %v4997_v1, %v4336_v63  ;;  %v4996_v6 = vld [vmem:[%s6984_s7 + $0x3ac] sm:$0xf]  ;;  %v4272_v63 = vld [vmem:[%s6984_s7 + $0x320] sm:$0xf]  ;;  %v4981_v2 = vld [vmem:[%s6984_s7 + $0x32c] sm:$0xf0] }
 0x67d   :  { %v4349_v9 = vor.u32 %v4996_v6, %v4346_v7  ;;  %v4277_v6 = vor.u32 %v4979_v3, %v4274_v4  ;;  %v4280_v7 = vld [vmem:[%s6984_s7 + $0x328] sm:$0xf] }
 0x67f   :  { %2105 = vmatpush.bf16.msrb.mxu3 %v4167_v10  ;;  %v4376_v10 = vld [vmem:[%s6984_s7 + $0x3e8] sm:$0xf]  ;;  %2382 = vmatpush.bf16.msrb.mxu0 %v4349_v9  ;;  %v4980_v9 = vld [vmem:[%s6984_s7 + $0x32c] sm:$0xf] }
 0x680   :  { %2093 = vmatpush.bf16.msrb.mxu2 %v4147_v16  ;;  %v4377_v16 = vor.u32 %v5006_v11, %v4376_v10  ;;  %v4282_v11 = vld [vmem:[%s6984_s7 + $0x338] sm:$0xf0] }
 0x683   :  { %2106 = vmatpush.bf16.msrb.mxu3 %v4151_v27  ;;  %v4361_v27 = vor.u32 %v5002_v22, %v4360_v20  ;;  %v4258_v22 = vld [vmem:[%s6984_s7 + $0x310] sm:$0xf0] }
 0x684   :  { %2094 = vmatpush.bf16.msrb.mxu2 %v4131_v34  ;;  %v4993_v34 = vld [vmem:[%s6984_s7 + $0x38c] sm:$0xf0] }
 0x687   :  { %2107 = vmatpush.bf16.msrb.mxu3 %v4135_v46  ;;  %v4994_v46 = vld [vmem:[%s6984_s7 + $0x394] sm:$0xf0] }
 0x688   :  { %2341 = vmatpush.bf16.msra.mxu2 %v4369_v36 }
 0x68b   :  { %2354 = vmatpush.bf16.msra.mxu3 %v4373_v35  ;;  %v4988_v35 = vld [vmem:[%s6984_s7 + $0x36c] sm:$0xf] }
 0x68c   :  { %2342 = vmatpush.bf16.msra.mxu2 %v4353_v57  ;;  %v4317_v48 = vor.u32 %v4988_v35, %v4314_v33  ;;  %v4296_v57 = vld [vmem:[%s6984_s7 + $0x348] sm:$0xf]  ;;  %v5025_v35 = vld [vmem:[%s6986_s9 + $0x90] sm:$0xff] }
 0x68f   :  { %2355 = vmatpush.bf16.msra.mxu3 %v4357_v58  ;;  %v4986_v58 = vld [vmem:[%s6984_s7 + $0x354] sm:$0xf0] }
 0x690   :  { %2343 = vmatpush.bf16.msra.mxu2 %v4337_v5  ;;  %v4273_v5 = vor.u32 %v4981_v2, %v4272_v63  ;;  %v5015_v63 = vld [vmem:[%s6986_s9 + $0x40] sm:$0xff] }
 0x693   :  { %2356 = vmatpush.bf16.msra.mxu3 %v4341_v8  ;;  %v4982_v8 = vld [vmem:[%s6984_s7 + $0x334] sm:$0xf0] }
 0x694   :  { %v4281_v10 = vor.u32 %v4982_v8, %v4280_v7 }
 0x697   :  { %2357 = vmatpush.bf16.msra.mxu3 %v4325_v47  ;;  %v5012_v47 = vld [vmem:[%s6986_s9 + $0x28] sm:$0xff] }
 0x6c4   :  { %v6212_v17 = vpop.f32.mrf.mxu1 }
 0x6c9   :  { %v1608_v32 = vpop.f32.mrf.mxu2  ;;  %v1621_v19 = vpop.f32.mrf.mxu3 }
 0x6ca   :  { %v1859_v23 = vpop.f32.mrf.mxu0 }
 0x6cc   :  { %v1636_v49 = vpop.f32.mrf.mxu1 }
 0x6d1   :  { %v1610_v53 = vpop.f32.mrf.mxu2  ;;  %v1623_v55 = vpop.f32.mrf.mxu3 }
 0x6d2   :  { %v1861_v25 = vpop.f32.mrf.mxu0  ;;  %v4992_v53 = vld [vmem:[%s6984_s7 + $0x38c] sm:$0xf]  ;;  %v4330_v55 = vld [vmem:[%s6984_s7 + $0x398] sm:$0xf0] }
 0x6d3   :  { %v4333_v25 = vor.u32 %v4992_v53, %v4330_v55 }
 0x6d4   :  { %v1833_v45 = vpop.f32.mrf.mxu1 }
 0x6d5   :  { %v6232_v30 = vadd.f32 %v1833_v45, %v1621_v19  ;;  %v4320_v19 = vld [vmem:[%s6984_s7 + $0x380] sm:$0xf]  ;;  %2383 = vmatpush.bf16.msrb.mxu0 %v4333_v25 }
 0x6d6   :  { %v4321_v37 = vor.u32 %v4993_v34, %v4320_v19  ;;  %v4304_v45 = vld [vmem:[%s6984_s7 + $0x360] sm:$0xf]  ;;  %v5030_v19 = vld [vmem:[%s6986_s9 + $0xb8] sm:$0xff] }
 0x6d7   :  { %v5014_v34 = vld [vmem:[%s6986_s9 + $0x38] sm:$0xff] }
 0x6d8   :  { %2344 = vmatpush.bf16.msra.mxu2 %v4321_v37  ;;  %v5029_v37 = vld [vmem:[%s6986_s9 + $0xb0] sm:$0xff] }
 0x6d9   :  { %v1647_v41 = vpop.f32.mrf.mxu2  ;;  %v1820_v24 = vpop.f32.mrf.mxu3  ;;  %2384 = vmatpush.bf16.msrb.mxu0 %v4317_v48 }
 0x6da   :  { %v6234_v38 = vadd.f32 %v1859_v23, %v1647_v41  ;;  %v6236_v42 = vadd.f32 %v1820_v24, %v1608_v32  ;;  %v4252_v32 = vld [vmem:[%s6983_s6 + $0x3] sm:$0x1]  ;;  %v4328_v23 = vld [vmem:[%s6984_s7 + $0x388] sm:$0xf]  ;;  %v4989_v41 = vld [vmem:[%s6984_s7 + $0x36c] sm:$0xf0] }
 0x6db   :  { %v4329_v49 = vor.u32 %v4994_v46, %v4328_v23  ;;  %v4987_v24 = vld [vmem:[%s6984_s7 + $0x364] sm:$0xf]  ;;  %v5021_v23 = vld [vmem:[%s6986_s9 + $0x70] sm:$0xff]  ;;  %v5028_v46 = vld [vmem:[%s6986_s9 + $0xa8] sm:$0xff] }
 0x6dc   :  { %v1835_v43 = vpop.f32.mrf.mxu1  ;;  %v4309_v36 = vor.u32 %v4987_v24, %v4306_v26  ;;  %v5011_v24 = vld [vmem:[%s6986_s9 + $0x20] sm:$0xff] }
 0x6dd   :  { %v4305_v43 = vor.u32 %v4989_v41, %v4304_v45  ;;  %v5027_v41 = vld [vmem:[%s6986_s9 + $0xa0] sm:$0xff] }
 0x6de   :  { %2358 = vmatpush.bf16.msra.mxu3 %v4309_v36 }
 0x6df   :  { %2345 = vmatpush.bf16.msra.mxu2 %v4305_v43  ;;  %v5019_v43 = vld [vmem:[%s6986_s9 + $0x60] sm:$0xff] }
 0x6e1   :  { %v1649_v60 = vpop.f32.mrf.mxu2  ;;  %v1822_v61 = vpop.f32.mrf.mxu3 }
 0x6e2   :  { %v4297_v60 = vor.u32 %v4986_v58, %v4296_v57  ;;  %v4984_v61 = vld [vmem:[%s6984_s7 + $0x34c] sm:$0xf]  ;;  %2359 = vmatpush.bf16.msra.mxu3 %v4293_v59  ;;  %v5017_v57 = vld [vmem:[%s6986_s9 + $0x50] sm:$0xff]  ;;  %v5023_v58 = vld [vmem:[%s6986_s9 + $0x80] sm:$0xff] }
 0x6e3   :  { %2346 = vmatpush.bf16.msra.mxu2 %v4289_v54  ;;  %v4301_v1 = vor.u32 %v4984_v61, %v4298_v62  ;;  %v5024_v54 = vld [vmem:[%s6986_s9 + $0x88] sm:$0xff]  ;;  %v5031_v59 = vld [vmem:[%s6986_s9 + $0xc0] sm:$0xff] }
 0x6e4   :  { %v5016_v61 = vld [vmem:[%s6986_s9 + $0x48] sm:$0xff]  ;;  %v5007_v62 = vld [vmem:[%s6986_s9] sm:$0xff] }
 0x6e5   :  { %2385 = vmatpush.bf16.msrb.mxu0 %v4301_v1  ;;  %v2397_v1 = vld [vmem:[%s6985_s8] sm:$0xf] }
 0x6e6   :  { %2360 = vmatpush.bf16.msra.mxu3 %v4277_v6  ;;  %v2401_v2 = vperm.slane %v2397_v1, 2  ;;  %v2402_v3 = vperm.slane %v2397_v1, 3 }
 0x6e7   :  { %2347 = vmatpush.bf16.msra.mxu2 %v4273_v5 }
 0x6e9   :  { %v1877_v12 = vpop.f32.mrf.mxu3 }
 0x6ea   :  { %v1846_v14 = vpop.f32.mrf.mxu2  ;;  %v1881_v15 = vpack.c.bf16 %v1877_v12, %v1877_v12  ;;  %v4285_v12 = vor.u32 %v4980_v9, %v4282_v11  ;;  %v2400_v11 = vperm.slane %v2397_v1, 1 }
 0x6eb   :  { %v6299_v44 = vadd.f32 %v1846_v14, %v6212_v17  ;;  %v4998_v17 = vld [vmem:[%s6984_s7 + $0x3b4] sm:$0xf0]  ;;  %v4256_v14 = vld [vmem:[%s6984_s7 + $0x300] sm:$0xf] }
 0x6ec   :  { %2082 = vmatmul.bf16.vlgmr.msrb.gmra.mxu1 %v1881_v15  ;;  %2095 = vmatmul.bf16.vlgmr.msrb.gmra.mxu2 %v1881_v15  ;;  %v4345_v13 = vor.u32 %v4998_v17, %v4344_v18  ;;  %v4978_v18 = vld [vmem:[%s6984_s7 + $0x314] sm:$0xf0] }
 0x6ed   :  { %2108 = vmatmul.bf16.vlgmr.msrb.gmra.mxu3 %v1881_v15  ;;  %2121 = vmatmul.bf16.vlgmr.msra.gmra.mxu0 %v1881_v15  ;;  %v4977_v15 = vld [vmem:[%s6984_s7 + $0x30c] sm:$0xf0] }
 0x6ee   :  { %2367 = vmatpush.bf16.msrb.mxu1 %v4377_v16  ;;  %v4975_v16 = vld [vmem:[%s6984_s7 + $0x304] sm:$0xf]  ;;  %2386 = vmatpush.bf16.msrb.mxu0 %v4285_v12  ;;  %v4257_v20 = vor.u32 %v4977_v15, %v4256_v14 }
 0x6ef   :  { %v4261_v17 = vor.u32 %v4975_v16, %v4258_v22 }
 0x6f0   :  { %2348 = vmatpush.bf16.msra.mxu2 %v4257_v20 }
 0x6f1   :  { %v1879_v28 = vpop.f32.mrf.mxu3  ;;  %2361 = vmatpush.bf16.msra.mxu3 %v4261_v17 }
 0x6f2   :  { %v1848_v29 = vpop.f32.mrf.mxu2  ;;  %2368 = vmatpush.bf16.msrb.mxu1 %v4361_v27  ;;  %v4264_v27 = vld [vmem:[%s6984_s7 + $0x308] sm:$0xf] }
 0x6f3   :  { %v4265_v28 = vor.u32 %v4978_v18, %v4264_v27  ;;  %v4976_v29 = vld [vmem:[%s6984_s7 + $0x30c] sm:$0xf] }
 0x6f4   :  { %2627 = vmatpush.bf16.msrb.mxu2 %v5014_v34 }
 0x6f5   :  { %2640 = vmatpush.bf16.msrb.mxu3 %v5022_v0 }
 0x6f6   :  { %2369 = vmatpush.bf16.msrb.mxu1 %v4345_v13  ;;  %v4266_v13 = vld [vmem:[%s6984_s7 + $0x318] sm:$0xf0] }
 0x6f8   :  { %2628 = vmatpush.bf16.msrb.mxu2 %v5013_v40 }
 0x6f9   :  { %2641 = vmatpush.bf16.msrb.mxu3 %v5021_v23  ;;  %v2684_v23 = vld [vmem:[%s6988_s11 + $0x18] sm:$0x33] }
 0x6fa   :  { %2370 = vmatpush.bf16.msrb.mxu1 %v4329_v49  ;;  %v5020_v49 = vld [vmem:[%s6986_s9 + $0x68] sm:$0xff] }
 0x6fc   :  { %4253 = vmatmul.msk.bf16.vlgmr.msra.gmra.mxu1 %vm1335_vm5, %v4252_v32  ;;  %v4269_v32 = vor.u32 %v4976_v29, %v4266_v13  ;;  %2629 = vmatpush.bf16.msrb.mxu2 %v5012_v47  ;;  %v2706_v47 = vunpack.c.l.b16 %v2684_v23 }
 0x6fd   :  { %2642 = vmatpush.bf16.msrb.mxu3 %v5020_v49  ;;  %v2707_v49 = vunpack.c.h.b16 %v2684_v23  ;;  %v5087_v23 = vld [vmem:[%s6990_s13 + $0x1a0] sm:$0xf0] }
 0x6fe   :  { %2371 = vmatpush.bf16.msrb.mxu1 %v4313_v21  ;;  %2387 = vmatpush.bf16.msrb.mxu0 %v4269_v32 }
 0x700   :  { %2630 = vmatpush.bf16.msrb.mxu2 %v5011_v24 }
 0x701   :  { %2643 = vmatpush.bf16.msrb.mxu3 %v5019_v43 }
 0x702   :  { %2372 = vmatpush.bf16.msrb.mxu1 %v4297_v60  ;;  %2673 = vmatpush.bf16.msra.mxu0 %v5031_v59  ;;  %v5008_v60 = vld [vmem:[%s6986_s9 + $0x8] sm:$0xff]  ;;  %v4574_v59 = vld [vmem:[%s6990_s13 + $0x9c] sm:$0xf0] }
 0x705   :  { %2644 = vmatpush.bf16.msrb.mxu3 %v5018_v52  ;;  %v5056_v52 = vld [vmem:[%s6990_s13 + $0xac] sm:$0xf] }
 0x706   :  { %2373 = vmatpush.bf16.msrb.mxu1 %v4281_v10  ;;  %v2399_v10 = vperm.slane %v2397_v1, 0  ;;  %v4562_v1 = vld [vmem:[%s6990_s13 + $0x84] sm:$0xf0] }
 0x709   :  { %2645 = vmatpush.bf16.msrb.mxu3 %v5017_v57  ;;  %v5053_v57 = vld [vmem:[%s6990_s13 + $0x94] sm:$0xf] }
 0x70a   :  { %2374 = vmatpush.bf16.msrb.mxu1 %v4265_v28 }
 0x70d   :  { %2646 = vmatpush.bf16.msrb.mxu3 %v5016_v61  ;;  %v5075_v61 = vld [vmem:[%s6990_s13 + $0x140] sm:$0xf0] }
 0x70e   :  { %2653 = vmatpush.bf16.msra.mxu1 %v5030_v19 }
 0x711   :  { %2647 = vmatpush.bf16.msrb.mxu3 %v5015_v63  ;;  %v5050_v63 = vld [vmem:[%s6990_s13 + $0x7c] sm:$0xf] }
 0x712   :  { %2654 = vmatpush.bf16.msra.mxu1 %v5029_v37 }
 0x716   :  { %2655 = vmatpush.bf16.msra.mxu1 %v5028_v46  ;;  %v2685_v46 = vld [vmem:[%s6988_s11 + $0x20] sm:$0x3] }
 0x71a   :  { %2656 = vmatpush.bf16.msra.mxu1 %v5027_v41 }
 0x769   :  { %v2083_v53 = vpop.f32.mrf.mxu1 }
 0x76a   :  { %v6465_v55 = vadd.f32 %v2083_v53, %v6236_v42  ;;  %v2122_v25 = vpop.f32.mrf.mxu0  ;;  %v2708_v53 = vunpack.c.l.b16 %v2685_v46 }
 0x76b   :  { %v2129_v45 = vadd.f32 %v2122_v25, %v6234_v38  ;;  %v5026_v38 = vld [vmem:[%s6986_s9 + $0x98] sm:$0xff]  ;;  %v2713_v25 = vpack.c.b16 %v2707_v49, %v2707_v49 }
 0x76c   :  { %2657 = vmatpush.bf16.msra.mxu1 %v5026_v38  ;;  %v5033_v38 = vld [vmem:[%s6988_s11 + $0x8] sm:$0xf0] }
 0x76d   :  { %v2727_v24 = vsel %vm2722_vm7, %v2713_v25, 0  ;;  %v5066_v25 = vld [vmem:[%s6990_s13 + $0xf8] sm:$0xf0] }
 0x76f   :  { %v2096_v42 = vpop.f32.mrf.mxu2 }
 0x770   :  { %v2127_v26 = vadd.f32 %v2096_v42, %v6232_v30  ;;  %v2109_v31 = vpop.f32.mrf.mxu3  ;;  %2658 = vmatpush.bf16.msra.mxu1 %v5025_v35  ;;  %v4485_v42 = vld [vmem:[%s6988_s11] sm:$0xf] }
 0x771   :  { %v2128_v39 = vadd.f32 %v2109_v31, %v6299_v44  ;;  %v2085_v36 = vpop.f32.mrf.mxu1  ;;  %v5010_v44 = vld [vmem:[%s6986_s9 + $0x18] sm:$0xff]  ;;  %v4486_v31 = vor.u32 %v5033_v38, %v4485_v42  ;;  %v5119_v38 = vld [vmem:[%s6987_s10] ss:$0 sm:$0xff] }
 0x772   :  { %v2124_v21 = vpop.f32.mrf.mxu0  ;;  %2631 = vmatpush.bf16.msrb.mxu2 %v5010_v44  ;;  %v4493_v36 = vld [vmem:[%s6988_s11 + $0x8] sm:$0xf]  ;;  %v5078_v44 = vld [vmem:[%s6990_s13 + $0x158] sm:$0xf0] }
 0x773   :  { %v5034_v21 = vld [vmem:[%s6988_s11 + $0x10] sm:$0xf0] }
 0x774   :  { %2659 = vmatpush.bf16.msra.mxu1 %v5024_v54  ;;  %v4586_v54 = vld [vmem:[%s6990_s13 + $0xb4] sm:$0xf0] }
 0x776   :  { %2632 = vmatpush.bf16.msrb.mxu2 %v5009_v56  ;;  %v4589_v56 = vor.u32 %v5056_v52, %v4586_v54  ;;  %v5038_v54 = vld [vmem:[%s6990_s13 + $0x1c] sm:$0xf] }
 0x777   :  { %v2098_v33 = vpop.f32.mrf.mxu2 }
 0x778   :  { %v2111_v48 = vpop.f32.mrf.mxu3  ;;  %2660 = vmatpush.bf16.msra.mxu1 %v5023_v58  ;;  %v4494_v33 = vor.u32 %v5034_v21, %v4493_v36  ;;  %v4536_v21 = vld [vmem:[%s6990_s13 + $0x48] sm:$0xf] }
 0x779   :  { %v2144_v50 = vpop.f32.mrf.mxu1  ;;  %v4680_v48 = vld [vmem:[%s6990_s13 + $0x168] sm:$0xf] }
 0x77a   :  { %v2148_v51 = vpack.c.bf16 %v2144_v50, %v2144_v50  ;;  %2633 = vmatpush.bf16.msrb.mxu2 %v5008_v60  ;;  %v5081_v50 = vld [vmem:[%s6990_s13 + $0x170] sm:$0xf0]  ;;  %v4656_v60 = vld [vmem:[%s6990_s13 + $0x138] sm:$0xf] }
 0x77c   :  { %2349 = vmatmul.bf16.vlgmr.msra.gmra.mxu2 %v2148_v51  ;;  %2362 = vmatmul.bf16.vlgmr.msra.gmra.mxu3 %v2148_v51 }
 0x77d   :  { %2375 = vmatmul.bf16.vlgmr.msrb.gmra.mxu1 %v2148_v51  ;;  %2388 = vmatmul.bf16.vlgmr.msrb.gmra.mxu0 %v2148_v51  ;;  %v4668_v51 = vld [vmem:[%s6990_s13 + $0x150] sm:$0xf] }
 0x77e   :  { %2634 = vmatpush.bf16.msrb.mxu2 %v5007_v62  ;;  %2751 = vmatpush.bf16.msrb.mxu0 %v2727_v24  ;;  %v4669_v58 = vor.u32 %v5078_v44, %v4668_v51  ;;  %v4577_v62 = vor.u32 %v5053_v57, %v4574_v59  ;;  %v5084_v24 = vld [vmem:[%s6990_s13 + $0x188] sm:$0xf0]  ;;  %v4608_v51 = vld [vmem:[%s6990_s13 + $0xd8] sm:$0xf] }
 0x781   :  { %v2146_v30 = vpop.f32.mrf.mxu1 }
 0x782   :  { %v4681_v30 = vor.u32 %v5081_v50, %v4680_v48 }
 0x7fa   :  { %v2376_v4 = vpop.f32.mrf.mxu1  ;;  %v2389_v5 = vpop.f32.mrf.mxu0 }
 0x7fb   :  { %v2395_v6 = vadd.f32 %v2376_v4, %v2128_v39  ;;  %v2396_v7 = vadd.f32 %v2389_v5, %v2129_v45  ;;  %v2714_v45 = vpack.c.b16 %v2708_v53, %v2708_v53  ;;  %v4487_v39 = vld [vmem:[%s6988_s11 + $0xc] sm:$0xf0]  ;;  %v4657_v4 = vor.u32 %v5075_v61, %v4656_v60  ;;  %v4644_v5 = vld [vmem:[%s6990_s13 + $0x120] sm:$0xf] }
 0x7fc   :  { %v4620_v53 = vld [vmem:[%s6990_s13 + $0xf0] sm:$0xf]  ;;  %v4596_v60 = vld [vmem:[%s6990_s13 + $0xc0] sm:$0xf] }
 0x7fd   :  { %v2409_v8 = vadd.f32 %v2401_v2, %v2395_v6  ;;  %v2410_v9 = vadd.f32 %v2402_v3, %v2396_v7  ;;  %v2730_v43 = vsel %vm2722_vm7, %v2714_v45, 0  ;;  %v4584_v2 = vld [vmem:[%s6990_s13 + $0xa8] sm:$0xf]  ;;  %v5057_v3 = vld [vmem:[%s6990_s13 + $0xb0] sm:$0xf0] }
 0x7fe   :  { %2764 = vmatpush.bf16.msra.mxu3 %v2730_v43  ;;  %v5072_v6 = vld [vmem:[%s6990_s13 + $0x128] sm:$0xf0]  ;;  %v4585_v7 = vor.u32 %v5057_v3, %v4584_v2  ;;  %v5058_v2 = vld [vmem:[%s6990_s13 + $0xb8] sm:$0xf0]  ;;  %v5035_v3 = vld [vmem:[%s6990_s13 + $0x4] sm:$0xf] }
 0x7ff   :  { %v2413_v12 = vmax.f32 %v2409_v8, 0.0  ;;  %v2414_v14 = vmax.f32 %v2410_v9, 0.0  ;;  %v2350_v15 = vpop.f32.mrf.mxu2  ;;  %v2363_v16 = vpop.f32.mrf.mxu3  ;;  %v4565_v8 = vor.u32 %v5050_v63, %v4562_v1  ;;  %v5047_v9 = vld [vmem:[%s6990_s13 + $0x64] sm:$0xf]  ;;  %v5060_v63 = vld [vmem:[%s6990_s13 + $0xc8] sm:$0xf0] }
 0x800   :  { %v2393_v20 = vadd.f32 %v2350_v15, %v6465_v55  ;;  %v2394_v22 = vadd.f32 %v2363_v16, %v2127_v26  ;;  %v2712_v55 = vpack.c.b16 %v2706_v47, %v2706_v47  ;;  %v5032_v26 = vld [vmem:[%s6988_s11 + $0x4] sm:$0xf]  ;;  %v4550_v15 = vld [vmem:[%s6990_s13 + $0x6c] sm:$0xf0]  ;;  %3176 = vmatpush.bf16.msrb.mxu1 %v4585_v7  ;;  %v4548_v47 = vld [vmem:[%s6990_s13 + $0x60] sm:$0xf] }
 0x801   :  { %v2417_v27 = vpack.c.bf16 %v2413_v12, %v2413_v12  ;;  %v2418_v18 = vpack.c.bf16 %v2414_v14, %v2414_v14  ;;  %v4490_v35 = vor.u32 %v5032_v26, %v4487_v39  ;;  %v5041_v26 = vld [vmem:[%s6990_s13 + $0x34] sm:$0xf]  ;;  %v4592_v1 = vld [vmem:[%s6990_s13 + $0xb0] sm:$0xf]  ;;  %v4682_v7 = vld [vmem:[%s6990_s13 + $0x174] sm:$0xf0] }
 0x802   :  { %v2407_v17 = vadd.f32 %v2399_v10, %v2393_v20  ;;  %v2408_v28 = vadd.f32 %v2400_v11, %v2394_v22  ;;  %v2378_v29 = vpop.f32.mrf.mxu1  ;;  %v2391_v13 = vpop.f32.mrf.mxu0  ;;  %v2724_v41 = vsel %vm2722_vm7, %v2712_v55, 0  ;;  %2765 = vmatpush.bf16.msra.mxu3 %v4494_v33  ;;  %v4572_v10 = vld [vmem:[%s6990_s13 + $0x90] sm:$0xf]  ;;  %v5054_v11 = vld [vmem:[%s6990_s13 + $0x98] sm:$0xf0]  ;;  %v4621_v33 = vor.u32 %v5066_v25, %v4620_v53 }
 0x803   :  { %2661 = vmatmul.bf16.vlgmr.msra.gmra.mxu1 %v2417_v27  ;;  %4482 = vmatmul.msk.bf16.vlgmr.msra.gmra.mxu0 %vm2623_vm6, %v2418_v18  ;;  %v4573_v16 = vor.u32 %v5054_v11, %v4572_v10  ;;  %v4716_v20 = vld [vmem:[%s6990_s13 + $0x1b0] sm:$0xf]  ;;  %v5090_v22 = vld [vmem:[%s6990_s13 + $0x1b8] sm:$0x30]  ;;  %v4645_v18 = vor.u32 %v5072_v6, %v4644_v5  ;;  %v5051_v29 = vld [vmem:[%s6990_s13 + $0x80] sm:$0xf0] }
 0x804   :  { %v2411_v32 = vmax.f32 %v2407_v17, 0.0  ;;  %v2412_v19 = vmax.f32 %v2408_v28, 0.0  ;;  %2738 = vmatpush.bf16.msra.mxu2 %v2724_v41  ;;  %2752 = vmatpush.bf16.msrb.mxu0 %v4490_v35  ;;  %v4717_v27 = vor.u32 %v5090_v22, %v4716_v20  ;;  %v4632_v17 = vld [vmem:[%s6990_s13 + $0x108] sm:$0xf]  ;;  %v4560_v28 = vld [vmem:[%s6990_s13 + $0x78] sm:$0xf] }
 0x805   :  { %v5069_v13 = vld [vmem:[%s6990_s13 + $0x110] sm:$0xf0]  ;;  %3177 = vmatpush.bf16.msrb.mxu1 %v4573_v16  ;;  %v5048_v55 = vld [vmem:[%s6990_s13 + $0x68] sm:$0xf0]  ;;  %v4692_v41 = vld [vmem:[%s6990_s13 + $0x180] sm:$0xf] }
 0x806   :  { %v2415_v34 = vpack.c.bf16 %v2411_v32, %v2411_v32  ;;  %v2416_v0 = vpack.c.bf16 %v2412_v19, %v2412_v19  ;;  %v4553_v32 = vor.u32 %v5047_v9, %v4550_v15  ;;  %v5044_v19 = vld [vmem:[%s6990_s13 + $0x4c] sm:$0xf]  ;;  %v4633_v49 = vor.u32 %v5069_v13, %v4632_v17  ;;  %v5045_v35 = vld [vmem:[%s6990_s13 + $0x50] sm:$0xf0]  ;;  %v5082_v9 = vld [vmem:[%s6990_s13 + $0x178] sm:$0xf0] }
 0x807   :  { %v2352_v37 = vpop.f32.mrf.mxu2  ;;  %v2365_v40 = vpop.f32.mrf.mxu3  ;;  %v4549_v39 = vor.u32 %v5048_v55, %v4548_v47  ;;  %v4693_v36 = vor.u32 %v5084_v24, %v4692_v41  ;;  %v4537_v57 = vor.u32 %v5045_v35, %v4536_v21  ;;  %v5080_v5 = vld [vmem:[%s6990_s13 + $0x16c] sm:$0xf]  ;;  %v4580_v20 = vld [vmem:[%s6990_s13 + $0x98] sm:$0xf]  ;;  %v5055_v22 = vld [vmem:[%s6990_s13 + $0xa0] sm:$0xf0] }
 0x808   :  { %2635 = vmatmul.bf16.vlgmr.msrb.gmra.mxu2 %v2415_v34  ;;  %2648 = vmatmul.bf16.vlgmr.msrb.gmra.mxu3 %v2416_v0  ;;  %v3168_v34 = vsel %vm3166_vm8, %v4717_v27, 0  ;;  %v4538_v0 = vld [vmem:[%s6990_s13 + $0x54] sm:$0xf0]  ;;  %v4561_v37 = vor.u32 %v5051_v29, %v4560_v28  ;;  %v4685_v27 = vor.u32 %v5080_v5, %v4682_v7  ;;  %v4581_v17 = vor.u32 %v5055_v22, %v4580_v20  ;;  %v4568_v28 = vld [vmem:[%s6990_s13 + $0x80] sm:$0xf] }
 0x809   :  { %2739 = vmatpush.bf16.msra.mxu2 %v4486_v31  ;;  %3215 = vmatpush.bf16.msrb.mxu3 %v4589_v56  ;;  %v4704_v40 = vld [vmem:[%s6990_s13 + $0x198] sm:$0xf]  ;;  %v4541_v45 = vor.u32 %v5044_v19, %v4538_v0  ;;  %v4526_v31 = vld [vmem:[%s6990_s13 + $0x3c] sm:$0xf0]  ;;  %v4514_v56 = vld [vmem:[%s6990_s13 + $0x24] sm:$0xf0] }
 0x80a   :  { %3207 = vmatpush.bf16.msra.mxu0 %v3168_v34  ;;  %v4705_v46 = vor.u32 %v5087_v23, %v4704_v40  ;;  %3178 = vmatpush.bf16.msrb.mxu1 %v4561_v37  ;;  %v4529_v44 = vor.u32 %v5041_v26, %v4526_v31  ;;  %v4517_v61 = vor.u32 %v5038_v54, %v4514_v56  ;;  %v5052_v29 = vld [vmem:[%s6990_s13 + $0x88] sm:$0xf0]  ;;  %v5042_v19 = vld [vmem:[%s6990_s13 + $0x38] sm:$0xf0]  ;;  %v5077_v34 = vld [vmem:[%s6990_s13 + $0x154] sm:$0xf] }
 0x80b   :  { %v4569_v13 = vor.u32 %v5052_v29, %v4568_v28  ;;  %v4670_v37 = vld [vmem:[%s6990_s13 + $0x15c] sm:$0xf0]  ;;  %v4676_v40 = vld [vmem:[%s6990_s13 + $0x158] sm:$0xf]  ;;  %v5079_v23 = vld [vmem:[%s6990_s13 + $0x160] sm:$0xf0] }
 0x80c   :  { %v4677_v47 = vor.u32 %v5079_v23, %v4676_v40  ;;  %v5049_v53 = vld [vmem:[%s6990_s13 + $0x70] sm:$0xf0]  ;;  %v4512_v25 = vld [vmem:[%s6990_s13 + $0x18] sm:$0xf]  ;;  %v5074_v24 = vld [vmem:[%s6990_s13 + $0x13c] sm:$0xf] }
 0x80d   :  { %3189 = vmatpush.bf16.msrb.mxu2 %v4681_v30  ;;  %3216 = vmatpush.bf16.msrb.mxu3 %v4577_v62  ;;  %v5063_v30 = vld [vmem:[%s6990_s13 + $0xe0] sm:$0xf0]  ;;  %v5076_v26 = vld [vmem:[%s6990_s13 + $0x148] sm:$0xf0]  ;;  %v4544_v31 = vld [vmem:[%s6990_s13 + $0x50] sm:$0xf] }
 0x80e   :  { %3208 = vmatpush.bf16.msra.mxu0 %v4705_v46  ;;  %3179 = vmatpush.bf16.msrb.mxu1 %v4549_v39  ;;  %v4609_v59 = vor.u32 %v5063_v30, %v4608_v51  ;;  %v4673_v46 = vor.u32 %v5077_v34, %v4670_v37  ;;  %v4500_v35 = vld [vmem:[%s6990_s13] sm:$0xf]  ;;  %v4646_v51 = vld [vmem:[%s6990_s13 + $0x12c] sm:$0xf0]  ;;  %v4652_v30 = vld [vmem:[%s6990_s13 + $0x128] sm:$0xf] }
 0x80f   :  { %v4532_v56 = vld [vmem:[%s6990_s13 + $0x38] sm:$0xf]  ;;  %v5089_v7 = vld [vmem:[%s6990_s13 + $0x1b4] sm:$0xf]  ;;  %v5062_v20 = vld [vmem:[%s6990_s13 + $0xdc] sm:$0xf] }
 0x810   :  { %v4610_v22 = vld [vmem:[%s6990_s13 + $0xe4] sm:$0xf0]  ;;  %v4598_v37 = vld [vmem:[%s6990_s13 + $0xcc] sm:$0xf0]  ;;  %v5083_v40 = vld [vmem:[%s6990_s13 + $0x184] sm:$0xf] }
 0x811   :  { %3190 = vmatpush.bf16.msrb.mxu2 %v4669_v58  ;;  %3217 = vmatpush.bf16.msrb.mxu3 %v4565_v8  ;;  %v4688_v8 = vld [vmem:[%s6990_s13 + $0x170] sm:$0xf]  ;;  %v4706_v28 = vld [vmem:[%s6990_s13 + $0x1a4] sm:$0xf0] }
 0x812   :  { %3209 = vmatpush.bf16.msra.mxu0 %v4693_v36  ;;  %3180 = vmatpush.bf16.msrb.mxu1 %v4537_v57  ;;  %v5046_v36 = vld [vmem:[%s6990_s13 + $0x58] sm:$0xf0]  ;;  %v5043_v57 = vld [vmem:[%s6990_s13 + $0x40] sm:$0xf0]  ;;  %v4694_v23 = vld [vmem:[%s6990_s13 + $0x18c] sm:$0xf0] }
 0x813   :  { %v4545_v21 = vor.u32 %v5046_v36, %v4544_v31  ;;  %v5091_v31 = vld [vmem:[%s6990_s13 + $0x1c0] sm:$0x30] }
 0x815   :  { %3191 = vmatpush.bf16.msrb.mxu2 %v4657_v4  ;;  %3218 = vmatpush.bf16.msrb.mxu3 %v4553_v32  ;;  %v4502_v4 = vld [vmem:[%s6990_s13 + $0xc] sm:$0xf0] }
 0x816   :  { %v4505_v16 = vor.u32 %v5035_v3, %v4502_v4  ;;  %v4524_v32 = vld [vmem:[%s6990_s13 + $0x30] sm:$0xf]  ;;  %v5040_v3 = vld [vmem:[%s6990_s13 + $0x28] sm:$0xf0]  ;;  %v5065_v4 = vld [vmem:[%s6990_s13 + $0xf4] sm:$0xf] }
 0x817   :  { %v4525_v0 = vor.u32 %v5042_v19, %v4524_v32  ;;  %v5064_v32 = vld [vmem:[%s6990_s13 + $0xe8] sm:$0xf0]  ;;  %v4613_v19 = vor.u32 %v5062_v20, %v4610_v22  ;;  %v5100_v20 = vld [vmem:[%s6992_s15 + $0x40] sm:$0xff] }
 0x818   :  { %v2853_v22 = vld [vmem:[%s6991_s14] sm:$0x7] }
 0x819   :  { %3192 = vmatpush.bf16.msrb.mxu2 %v4645_v18  ;;  %3219 = vmatpush.bf16.msrb.mxu3 %v4541_v45  ;;  %v4689_v18 = vor.u32 %v5082_v9, %v4688_v8  ;;  %v5039_v45 = vld [vmem:[%s6990_s13 + $0x20] sm:$0xf0]  ;;  %v4718_v8 = vld [vmem:[%s6990_s13 + $0x1bc] sm:$0x30] }
 0x81a   :  { %3181 = vmatpush.bf16.msrb.mxu1 %v4525_v0  ;;  %v4513_v41 = vor.u32 %v5039_v45, %v4512_v25  ;;  %v5059_v0 = vld [vmem:[%s6990_s13 + $0xc4] sm:$0xf] }
 0x81d   :  { %3193 = vmatpush.bf16.msrb.mxu2 %v4633_v49  ;;  %3220 = vmatpush.bf16.msrb.mxu3 %v4529_v44  ;;  %v4556_v49 = vld [vmem:[%s6990_s13 + $0x68] sm:$0xf]  ;;  %v5073_v44 = vld [vmem:[%s6990_s13 + $0x130] sm:$0xf0] }
 0x81e   :  { %v4557_v55 = vor.u32 %v5049_v53, %v4556_v49  ;;  %3182 = vmatpush.bf16.msrb.mxu1 %v4513_v41  ;;  %v4653_v54 = vor.u32 %v5073_v44, %v4652_v30  ;;  %v4601_v49 = vor.u32 %v5059_v0, %v4598_v37  ;;  %v4697_v53 = vor.u32 %v5083_v40, %v4694_v23  ;;  %v5108_v40 = vld [vmem:[%s6992_s15 + $0x80] sm:$0xff] }
 0x821   :  { %3194 = vmatpush.bf16.msrb.mxu2 %v4621_v33  ;;  %3221 = vmatpush.bf16.msrb.mxu3 %v4517_v61  ;;  %v5036_v33 = vld [vmem:[%s6990_s13 + $0x8] sm:$0xf0] }
 0x825   :  { %3195 = vmatpush.bf16.msrb.mxu2 %v4609_v59  ;;  %3222 = vmatpush.bf16.msrb.mxu3 %v4505_v16  ;;  %v5068_v59 = vld [vmem:[%s6990_s13 + $0x10c] sm:$0xf]  ;;  %v5037_v16 = vld [vmem:[%s6990_s13 + $0x10] sm:$0xf0] }
 0x880   :  { %v6603_v12 = vpop.f32.mrf.mxu1  ;;  %v6605_v14 = vpop.f32.mrf.mxu0 }
 0x888   :  { %v2664_v43 = vpop.f32.mrf.mxu1  ;;  %v2677_v42 = vpop.f32.mrf.mxu0 }
 0x889   :  { %v4658_v43 = vld [vmem:[%s6990_s13 + $0x144] sm:$0xf0]  ;;  %v4664_v42 = vld [vmem:[%s6990_s13 + $0x140] sm:$0xf] }
 0x88a   :  { %v4665_v39 = vor.u32 %v5076_v26, %v4664_v42  ;;  %v4724_v26 = vld [vmem:[%s6990_s13 + $0x1b8] sm:$0xf] }
 0x88b   :  { %v2636_v48 = vpop.f32.mrf.mxu2  ;;  %v2649_v50 = vpop.f32.mrf.mxu3 }
 0x88c   :  { %v2637_v52 = vadd.f32 %v5119_v38, %v2636_v48  ;;  %v4661_v38 = vor.u32 %v5074_v24, %v4658_v43  ;;  %v5071_v48 = vld [vmem:[%s6990_s13 + $0x124] sm:$0xf] }
 0x88e   :  { %v2650_v58 = vadd.f32 %v2649_v50, %v2637_v52  ;;  %v4501_v50 = vor.u32 %v5036_v33, %v4500_v35  ;;  %v4649_v52 = vor.u32 %v5071_v48, %v4646_v51  ;;  %v4725_v33 = vor.u32 %v5091_v31, %v4724_v26 }
 0x890   :  { %v2663_v62 = vadd.f32 %v6603_v12, %v2650_v58  ;;  %v4597_v12 = vor.u32 %v5060_v63, %v4596_v60  ;;  %3183 = vmatpush.bf16.msrb.mxu1 %v4501_v50  ;;  %v4533_v58 = vor.u32 %v5043_v57, %v4532_v56  ;;  %v4634_v60 = vld [vmem:[%s6990_s13 + $0x114] sm:$0xf0]  ;;  %v5070_v63 = vld [vmem:[%s6990_s13 + $0x118] sm:$0xf0]  ;;  %v5088_v56 = vld [vmem:[%s6990_s13 + $0x1a8] sm:$0xf0] }
 0x891   :  { %v4637_v61 = vor.u32 %v5068_v59, %v4634_v60 }
 0x892   :  { %v2676_v6 = vadd.f32 %v6605_v14, %v2663_v62  ;;  %v4593_v14 = vor.u32 %v5058_v2, %v4592_v1  ;;  %3196 = vmatpush.bf16.msrb.mxu2 %v4597_v12  ;;  %v4640_v62 = vld [vmem:[%s6990_s13 + $0x110] sm:$0xf]  ;;  %v4520_v2 = vld [vmem:[%s6990_s13 + $0x20] sm:$0xf]  ;;  %v5067_v12 = vld [vmem:[%s6990_s13 + $0x100] sm:$0xf0] }
 0x893   :  { %v2638_v10 = vpop.f32.mrf.mxu2  ;;  %v2651_v11 = vpop.f32.mrf.mxu3  ;;  %v4641_v1 = vor.u32 %v5070_v63, %v4640_v62  ;;  %v4521_v5 = vor.u32 %v5040_v3, %v4520_v2  ;;  %v4700_v62 = vld [vmem:[%s6990_s13 + $0x188] sm:$0xf]  ;;  %v5085_v63 = vld [vmem:[%s6990_s13 + $0x190] sm:$0xf0] }
 0x894   :  { %v2679_v15 = vpack.c.bf16 %v2676_v6, %v2676_v6  ;;  %v4622_v6 = vld [vmem:[%s6990_s13 + $0xfc] sm:$0xf0]  ;;  %v4721_v10 = vor.u32 %v5089_v7, %v4718_v8  ;;  %v4628_v11 = vld [vmem:[%s6990_s13 + $0xf8] sm:$0xf]  ;;  %v4701_v2 = vor.u32 %v5085_v63, %v4700_v62  ;;  %v5097_v3 = vld [vmem:[%s6992_s15 + $0x28] sm:$0xff] }
 0x895   :  { %v4625_v9 = vor.u32 %v5065_v4, %v4622_v6  ;;  %v5096_v4 = vld [vmem:[%s6992_s15 + $0x20] sm:$0xff]  ;;  %v5095_v6 = vld [vmem:[%s6992_s15 + $0x18] sm:$0xff]  ;;  %v5106_v7 = vld [vmem:[%s6992_s15 + $0x70] sm:$0xff] }
 0x896   :  { %4495 = vmatmul.msk.bf16.vlgmr.msra.gmra.mxu2 %vm2718_vm9, %v2679_v15  ;;  %4496 = vmatmul.msk.bf16.vlgmr.msrb.gmra.mxu0 %vm2718_vm9, %v2679_v15  ;;  %v5094_v8 = vld [vmem:[%s6992_s15 + $0x10] sm:$0xff]  ;;  %v5120_v63 = vld [vmem:[%s6993_s16] ss:$0 sm:$0xff] }
 0x897   :  { %4497 = vmatmul.msk.bf16.vlgmr.msra.gmra.mxu3 %vm2718_vm9, %v2679_v15  ;;  %3254 = vmatpush.bf16.msra.mxu2 %v4593_v14  ;;  %v4508_v15 = vld [vmem:[%s6990_s13 + $0x8] sm:$0xf]  ;;  %v4629_v14 = vor.u32 %v5067_v12, %v4628_v11  ;;  %v5104_v11 = vld [vmem:[%s6992_s15 + $0x60] sm:$0xff] }
 0x898   :  { %3228 = vmatpush.bf16.msrb.mxu0 %v4685_v27  ;;  %3267 = vmatpush.bf16.msra.mxu3 %v4689_v18  ;;  %v3171_v27 = vsel %vm3166_vm8, %v4721_v10, 0  ;;  %v4509_v18 = vor.u32 %v5037_v16, %v4508_v15  ;;  %v5093_v10 = vld [vmem:[%s6992_s15 + $0x8] sm:$0xff]  ;;  %v5092_v12 = vld [vmem:[%s6992_s15] sm:$0xff]  ;;  %v5103_v15 = vld [vmem:[%s6992_s15 + $0x58] sm:$0xff] }
 0x899   :  { %3246 = vmatpush.bf16.msra.mxu1 %v3171_v27  ;;  %v5101_v16 = vld [vmem:[%s6992_s15 + $0x48] sm:$0xff]  ;;  %v4803_v27 = vld [vmem:[%s6992_s15 + $0x90] sm:$0xf] }
 0x89b   :  { %3255 = vmatpush.bf16.msra.mxu2 %v4581_v17  ;;  %v5086_v17 = vld [vmem:[%s6990_s13 + $0x19c] sm:$0xf] }
 0x89c   :  { %3229 = vmatpush.bf16.msrb.mxu0 %v4673_v46  ;;  %3268 = vmatpush.bf16.msra.mxu3 %v4677_v47  ;;  %v4709_v29 = vor.u32 %v5086_v17, %v4706_v28  ;;  %v4604_v46 = vld [vmem:[%s6990_s13 + $0xc8] sm:$0xf]  ;;  %v5061_v47 = vld [vmem:[%s6990_s13 + $0xd0] sm:$0xf0]  ;;  %v2855_v28 = vperm.slane %v2853_v22, 0 }
 0x89d   :  { %v4605_v25 = vor.u32 %v5061_v47, %v4604_v46 }
 0x89e   :  { %3247 = vmatpush.bf16.msra.mxu1 %v4709_v29 }
 0x89f   :  { %3256 = vmatpush.bf16.msra.mxu2 %v4569_v13  ;;  %v4616_v13 = vld [vmem:[%s6990_s13 + $0xe0] sm:$0xf] }
 0x8a0   :  { %3230 = vmatpush.bf16.msrb.mxu0 %v4661_v38  ;;  %3269 = vmatpush.bf16.msra.mxu3 %v4665_v39  ;;  %v4617_v34 = vor.u32 %v5064_v32, %v4616_v13 }
 0x8a2   :  { %3248 = vmatpush.bf16.msra.mxu1 %v4697_v53 }
 0x8a3   :  { %3257 = vmatpush.bf16.msra.mxu2 %v4557_v55  ;;  %v2686_v55 = vld [vmem:[%s6989_s12] sm:$0x7]  ;;  %s3508_s12 = sshll.u32 %s6994_s17, 4  ;;  %s3509_s12 = int_to_ptr.hbm [resolvable:$true] %s3508_s12 }
 0x8a4   :  { %3231 = vmatpush.bf16.msrb.mxu0 %v4649_v52  ;;  %3270 = vmatpush.bf16.msra.mxu3 %v4653_v54  ;;  %v2689_v45 = vperm.slane %v2686_v55, 1  ;;  %v2688_v42 = vperm.slane %v2686_v55, 0  ;;  %v2690_v38 = vperm.slane %v2686_v55, 2  ;;  %v3174_v52 = vsel %vm3166_vm8, %v4725_v33, 0  ;;  %v4712_v54 = vld [vmem:[%s6990_s13 + $0x1a0] sm:$0xf] }
 0x8a5   :  { %v4713_v60 = vor.u32 %v5088_v56, %v4712_v54 }
 0x8a7   :  { %3258 = vmatpush.bf16.msra.mxu2 %v4545_v21 }
 0x8a8   :  { %3232 = vmatpush.bf16.msrb.mxu0 %v4637_v61  ;;  %3271 = vmatpush.bf16.msra.mxu3 %v4641_v1  ;;  %v5098_v1 = vld [vmem:[%s6992_s15 + $0x30] sm:$0xff] }
 0x8ab   :  { %3259 = vmatpush.bf16.msra.mxu2 %v4533_v58  ;;  %v5099_v58 = vld [vmem:[%s6992_s15 + $0x38] sm:$0xff] }
 0x8ac   :  { %3233 = vmatpush.bf16.msrb.mxu0 %v4625_v9  ;;  %3272 = vmatpush.bf16.msra.mxu3 %v4629_v14  ;;  %v5105_v9 = vld [vmem:[%s6992_s15 + $0x68] sm:$0xff]  ;;  %v5102_v14 = vld [vmem:[%s6992_s15 + $0x50] sm:$0xff] }
 0x8af   :  { %3260 = vmatpush.bf16.msra.mxu2 %v4521_v5  ;;  %v5107_v5 = vld [vmem:[%s6992_s15 + $0x78] sm:$0xff] }
 0x8b0   :  { %3234 = vmatpush.bf16.msrb.mxu0 %v4613_v19  ;;  %3273 = vmatpush.bf16.msra.mxu3 %v4617_v34  ;;  %v5109_v19 = vld [vmem:[%s6992_s15 + $0x88] sm:$0xff] }
 0x8b3   :  { %3261 = vmatpush.bf16.msra.mxu2 %v4509_v18  ;;  %v5110_v18 = vld [vmem:[%s6992_s15 + $0x90] sm:$0x30] }
 0x8b4   :  { %3235 = vmatpush.bf16.msrb.mxu0 %v4601_v49  ;;  %3274 = vmatpush.bf16.msra.mxu3 %v4605_v25  ;;  %v4804_v17 = vor.u32 %v5110_v18, %v4803_v27 }
 0x8b6   :  { %v3458_v29 = vsel %vm3166_vm8, %v4804_v17, 0 }
 0x913   :  { %v2754_v41 = vpop.f32.mrf.mxu0 }
 0x914   :  { %v2755_v24 = vadd.f32 %v2754_v41, %v2689_v45  ;;  %v2856_v45 = vperm.slane %v2853_v22, 1 }
 0x916   :  { %v2772_v43 = vmax.f32 %v2755_v24, 0.0 }
 0x918   :  { %v2775_v39 = vpack.c.bf16 %v2772_v43, %v2772_v43 }
 0x919   :  { %v2741_v36 = vpop.f32.mrf.mxu2 }
 0x91a   :  { %v2742_v21 = vadd.f32 %v2741_v36, %v2688_v42  ;;  %v2767_v35 = vpop.f32.mrf.mxu3  ;;  %3197 = vmatmul.bf16.vlgmr.msrb.gmra.mxu2 %v2775_v39 }
 0x91b   :  { %v2768_v48 = vadd.f32 %v2767_v35, %v2690_v38  ;;  %v2756_v50 = vpop.f32.mrf.mxu0  ;;  %3491 = vmatpush.bf16.msrb.mxu2 %v3458_v29 }
 0x91c   :  { %v2771_v51 = vmax.f32 %v2742_v21, 0.0 }
 0x91d   :  { %v2773_v30 = vmax.f32 %v2768_v48, 0.0  ;;  %v2857_v48 = vperm.slane %v2853_v22, 2 }
 0x91e   :  { %v2774_v44 = vpack.c.bf16 %v2771_v51, %v2771_v51 }
 0x91f   :  { %v2776_v57 = vpack.c.bf16 %v2773_v30, %v2773_v30  ;;  %3492 = vmatpush.bf16.msrb.mxu2 %v5109_v19 }
 0x920   :  { %3184 = vmatmul.bf16.vlgmr.msrb.gmra.mxu1 %v2774_v44  ;;  %3223 = vmatmul.bf16.vlgmr.msrb.gmra.mxu3 %v2774_v44 }
 0x921   :  { %4726 = vmatmul.msk.bf16.vlgmr.msra.gmra.mxu0 %vm3162_vm10, %v2776_v57  ;;  %v2743_v59 = vpop.f32.mrf.mxu2  ;;  %3285 = vmatpush.bf16.msrb.mxu1 %v3174_v52 }
 0x922   :  { %v2769_v61 = vpop.f32.mrf.mxu3  ;;  %3460 = vmatpush.bf16.msra.mxu0 %v5099_v58 }
 0x923   :  { %3493 = vmatpush.bf16.msrb.mxu2 %v5108_v40 }
 0x925   :  { %3286 = vmatpush.bf16.msrb.mxu1 %v4713_v60 }
 0x926   :  { %3461 = vmatpush.bf16.msra.mxu0 %v5098_v1 }
 0x929   :  { %3287 = vmatpush.bf16.msrb.mxu1 %v4701_v2 }
 0x92a   :  { %3262 = vmatmul.bf16.vlgmr.msra.gmra.mxu2 %v2774_v44  ;;  %3462 = vmatpush.bf16.msra.mxu0 %v5097_v3 }
 0x92e   :  { %3463 = vmatpush.bf16.msra.mxu0 %v5096_v4 }
 0x930   :  { %4727 = vmatmul.msk.bf16.vlgmr.msra.gmra.mxu1 %vm3162_vm10, %v2776_v57  ;;  %3275 = vmatmul.bf16.vlgmr.msra.gmra.mxu3 %v2775_v39 }
 0x931   :  { %3236 = vmatmul.bf16.vlgmr.msrb.gmra.mxu0 %v2775_v39  ;;  %3473 = vmatpush.bf16.msra.mxu1 %v5107_v5 }
 0x932   :  { %3464 = vmatpush.bf16.msra.mxu0 %v5095_v6 }
 0x935   :  { %3474 = vmatpush.bf16.msra.mxu1 %v5106_v7 }
 0x936   :  { %3465 = vmatpush.bf16.msra.mxu0 %v5094_v8 }
 0x939   :  { %3475 = vmatpush.bf16.msra.mxu1 %v5105_v9 }
 0x93a   :  { %3466 = vmatpush.bf16.msra.mxu0 %v5093_v10 }
 0x93d   :  { %3476 = vmatpush.bf16.msra.mxu1 %v5104_v11 }
 0x93e   :  { %3467 = vmatpush.bf16.msra.mxu0 %v5092_v12 }
 0x940   :  { %4728 = vmatmul.msk.bf16.vlgmr.msrb.gmra.mxu1 %vm3162_vm10, %v2776_v57 }
 0x941   :  { %3477 = vmatpush.bf16.msra.mxu1 %v5103_v15 }
 0x945   :  { %3478 = vmatpush.bf16.msra.mxu1 %v5102_v14 }
 0x949   :  { %3479 = vmatpush.bf16.msra.mxu1 %v5101_v16 }
 0x94d   :  { %3480 = vmatpush.bf16.msra.mxu1 %v5100_v20 }
 0x99d   :  { %v3185_v13 = vpop.f32.mrf.mxu1  ;;  %v3198_v32 = vpop.f32.mrf.mxu2 }
 0x99e   :  { %v3186_v34 = vadd.f32 %v3185_v13, %v2855_v28  ;;  %v3211_v0 = vpop.f32.mrf.mxu0 }
 0x9a0   :  { %v3199_v37 = vadd.f32 %v3198_v32, %v3186_v34 }
 0x9a2   :  { %v3212_v23 = vadd.f32 %v3211_v0, %v3199_v37 }
 0x9a3   :  { %v3224_v46 = vpop.f32.mrf.mxu3 }
 0x9a4   :  { %v3293_v47 = vmax.f32 %v3212_v23, 0.0  ;;  %v3225_v24 = vadd.f32 %v3224_v46, %v2856_v45 }
 0x9a5   :  { %v3187_v49 = vpop.f32.mrf.mxu1  ;;  %v3200_v53 = vpop.f32.mrf.mxu2 }
 0x9a6   :  { %v3296_v55 = vpack.c.bf16 %v3293_v47, %v3293_v47  ;;  %v3213_v25 = vpop.f32.mrf.mxu0 }
 0x9a8   :  { %3468 = vmatmul.bf16.vlgmr.msra.gmra.mxu0 %v3296_v55 }
 0x9ab   :  { %v3226_v41 = vpop.f32.mrf.mxu3 }
 0x9ad   :  { %v3250_v43 = vpop.f32.mrf.mxu1  ;;  %v3263_v42 = vpop.f32.mrf.mxu2 }
 0x9ae   :  { %v3237_v38 = vpop.f32.mrf.mxu0  ;;  %v3264_v51 = vadd.f32 %v3263_v42, %v2857_v48 }
 0x9af   :  { %v3238_v26 = vadd.f32 %v3237_v38, %v3225_v24 }
 0x9b1   :  { %v3251_v31 = vadd.f32 %v3250_v43, %v3238_v26 }
 0x9b3   :  { %v3294_v39 = vmax.f32 %v3251_v31, 0.0  ;;  %v3276_v36 = vpop.f32.mrf.mxu3 }
 0x9b4   :  { %v3277_v44 = vadd.f32 %v3276_v36, %v3264_v51 }
 0x9b5   :  { %v3297_v21 = vpack.c.bf16 %v3294_v39, %v3294_v39  ;;  %v3252_v35 = vpop.f32.mrf.mxu1  ;;  %v3265_v33 = vpop.f32.mrf.mxu2 }
 0x9b6   :  { %v3239_v50 = vpop.f32.mrf.mxu0 }
 0x9b7   :  { %3481 = vmatmul.bf16.vlgmr.msra.gmra.mxu1 %v3297_v21 }
 0x9bb   :  { %v3278_v30 = vpop.f32.mrf.mxu3 }
 0x9bd   :  { %v3289_v52 = vpop.f32.mrf.mxu1 }
 0x9be   :  { %v3290_v54 = vadd.f32 %v3289_v52, %v3277_v44 }
 0x9c0   :  { %v3295_v56 = vmax.f32 %v3290_v54, 0.0 }
 0x9c2   :  { %v3298_v57 = vpack.c.bf16 %v3295_v56, %v3295_v56 }
 0x9c4   :  { %4805 = vmatmul.msk.bf16.vlgmr.msrb.gmra.mxu2 %vm3162_vm10, %v3298_v57 }
 0x9c5   :  { %v3291_v58 = vpop.f32.mrf.mxu1 }
 0xa25   :  { %v3469_v59 = vpop.f32.mrf.mxu0 }
 0xa26   :  { %v3470_v1 = vadd.f32 %v5120_v63, %v3469_v59 }
 0xa2d   :  { %v3471_v60 = vpop.f32.mrf.mxu0 }
 0xa34   :  { %v3482_v61 = vpop.f32.mrf.mxu1 }
 0xa35   :  { %v3483_v2 = vadd.f32 %v3482_v61, %v3470_v1 }
 0xa3c   :  { %v3484_v62 = vpop.f32.mrf.mxu1 }
 0xa47   :  { %v3495_v3 = vpop.f32.mrf.mxu2 }
 0xa48   :  { %v3496_v4 = vadd.f32 %v3495_v3, %v3483_v2 }
 0xa4a   :  { %3500 = vst.msk [vmem:[#allocation2] sm:$0x3] %vm3499_vm11, %v3496_v4 }
 0xa4b   :  { %3511 = dma.vmem_to_hbm [thread:$0]  %s3507_s25, 32, %s3509_s12, [#allocation3]  }
 0xa4f   :  { %v3497_v5 = vpop.f32.mrf.mxu2 }
 0xa50   :  { %5145 = dma.done.wait [#allocation3], 32  }
 0xa51   :  { %5146 = vsyncadd [#allocation3], 4294967264 }
 0xa52   :  { %3516 = vsyncpa [#allocation3], 1 }

</bundles_post_ra>
